<compile_context>
chip_gen: v7x
topology: tpu7x:2x2x1
jax: 0.10.0
libtpu: 0.0.40
codegen_flags: <defaults>
</compile_context>

<pallas_src>
import functools
import warnings

import jax
import jax.numpy as jnp
from jax import lax
from jax.experimental import pallas as pl
from jax.experimental.pallas import tpu as pltpu


_SQRT_2_OVER_PI = 0.7978845608028654
_INV_SQRT2 = 0.7071067811865476


# ----------------------------- in-kernel helpers -----------------------------

def _gelu_tanh(x):
    # tanh-approx GELU: the transcendental routes to the EUP slot (separate bundle slot,
    # co-issues with MXU work), unlike the long erf VALU polynomial.  Deviates from
    # torch.nn.GELU's default exact-erf form by at most ~3e-3.
    return 0.5 * x * (1.0 + jnp.tanh(_SQRT_2_OVER_PI * (x + 0.044715 * (x * x * x))))


def _gelu_erf(x):
    # Exact (erf) GELU == torch.nn.GELU default.
    return 0.5 * x * (1.0 + lax.erf(x * _INV_SQRT2))


def _layernorm(x, gamma, beta, eps=1e-6):
    mean = jnp.mean(x, axis=-1, keepdims=True)
    var = jnp.mean(jnp.square(x - mean), axis=-1, keepdims=True)
    return (x - mean) * lax.rsqrt(var + eps) * gamma + beta


# --------------------------------- kernel ------------------------------------

def mixer_block_kernel(n_repeat, row_chunk, n_chains, gelu_mode,
                       x_ref,
                       g1_ref, be1_ref, g2_ref, be2_ref,
                       tw1_ref, tb1_ref, ws1_ref, bs1_ref,
                       ws2_ref, bs2_ref, tw2_ref, tb2_ref,
                       cw1_ref, cb1_ref, cw2_ref, cb2_ref,
                       o_ref):
    gelu = _gelu_tanh if gelu_mode == "tanh" else _gelu_erf
    f32, bf16 = jnp.float32, jnp.bfloat16

    bt, N, C = x_ref.shape

    # Hoist grid-constant weight/bias loads once (shared by the bt samples in this step).
    # Biases stay (rows, 1) / (1, cols); the adds broadcast with stride-0 (no materialized
    # jnp.broadcast_to held live across the unrolled fixed-point loop).
    g1, be1 = g1_ref[...], be1_ref[...]
    g2, be2 = g2_ref[...], be2_ref[...]
    tw1, tb1 = tw1_ref[...], tb1_ref[...]
    ws1, bs1 = ws1_ref[...], bs1_ref[...]
    ws2, bs2 = ws2_ref[...], bs2_ref[...]
    tw2, tb2 = tw2_ref[...], tb2_ref[...]
    cw1, cb1 = cw1_ref[...], cb1_ref[...]
    cw2, cb2 = cw2_ref[...], cb2_ref[...]

    ch_w = C // n_chains
    col_splits = [(c * ch_w, ch_w) for c in range(n_chains)]
    n_chunks = N // row_chunk

    # bt is small (<= 4); this unroll is intentional so the scheduler can overlap
    # independent samples' VPU/EUP and MXU work (static indices, no dynamic loads).
    for bb in range(bt):
        x = x_ref[bb]                                   # [N, C] f32

        # ---------------- token mixing: x + iMlp(norm1(x).T).T ----------------
        xn = _layernorm(x, g1, be1)                     # [N, C] f32

        # Split the independent C axis (lanes) into n_chains chains; their GELU->matmul
        # pipelines are interleaved in one loop body so VPU/EUP work of one chain hides
        # under the MXU work of the other.
        t0_parts = []
        for c0, cw in col_splits:
            xn_h = xn[:, c0:c0 + cw].astype(bf16)       # [N, cw]
            t0_parts.append(jnp.dot(tw1, xn_h, preferred_element_type=f32) + tb1)  # [T, cw]
        t0_parts = tuple(t0_parts)

        def fixed_point_step(_, carry, _t0=t0_parts):
            nxt = []
            for tc, t0 in zip(carry, _t0):
                u = gelu(tc)
                u = jnp.dot(ws1, u.astype(bf16), preferred_element_type=f32) + bs1  # [H, cw]
                u = gelu(u)
                u = jnp.dot(ws2, u.astype(bf16), preferred_element_type=f32) + bs2  # [T, cw]
                nxt.append(u + t0)
            return tuple(nxt)

        t_parts = lax.fori_loop(0, n_repeat, fixed_point_step, t0_parts, unroll=True)

        for (c0, cw), th in zip(col_splits, t_parts):
            # fc2 result is already [N, cw] -> no [C, N] transpose before the residual.
            s_h = jnp.dot(tw2, gelu(th).astype(bf16), preferred_element_type=f32)
            # tb2 is (N, 1): per-token bias broadcast along lanes.  The token-mix residual
            # is staged in the output VMEM block (no extra scratch).
            o_ref[bb, :, c0:c0 + cw] = x[:, c0:c0 + cw] + s_h + tb2

        # --------- channel mixing: x + Mlp(norm2(x)), row-chunked over N ---------
        def channel_chunk(r0):
            xr = o_ref[bb, pl.ds(r0, row_chunk), :]     # [rc, C] f32
            h = jnp.dot(_layernorm(xr, g2, be2).astype(bf16), cw1,
                        preferred_element_type=f32) + cb1
            h = gelu(h)
            h = jnp.dot(h.astype(bf16), cw2, preferred_element_type=f32) + cb2
            o_ref[bb, pl.ds(r0, row_chunk), :] = xr + h

        if n_chunks == 1:
            channel_chunk(0)
        else:
            # Real loop boundary (not a Python unroll): bounds the [rc, Dc] intermediate's
            # live range — matters most on v7x's 64 MiB VMEM.
            @pl.loop(0, n_chunks)
            def _(ci):
                channel_chunk(pl.multiple_of(ci * row_chunk, row_chunk))


# --------------------------------- wrapper -----------------------------------

def _const_spec(shape, single_buffer):
    """BlockSpec for a grid-constant operand (same block every grid step)."""
    ndim = len(shape)
    index_map = lambda i, _n=ndim: (0,) * _n
    if single_buffer:
        # Grid-constant weights need no double buffering; halves their VMEM footprint.
        return pl.BlockSpec(shape, index_map, pipeline_mode=pl.Buffered(1))
    return pl.BlockSpec(shape, index_map)


def _pick_vmem_limit_bytes():
    cap = 128 * 1024 * 1024
    try:
        cap = int(getattr(pltpu.get_tpu_info(), "vmem_capacity_bytes", cap))
    except Exception:
        cap = 64 * 1024 * 1024          # unknown chip: assume the smaller (v7x) VMEM
    # ~96 MiB on 128 MiB parts (v5e/v6e), ~48 MiB on 64 MiB parts (v7x).
    return int(min(cap * 3 // 4, 100 * 1024 * 1024))


def _pick_row_chunk(N, requested):
    if requested is not None:
        if N % requested != 0:
            raise ValueError("row_chunk must divide N")
        return requested
    if N <= 256:
        return N
    for rc in (256, 128, 64, 32, 16, 8):
        if N % rc == 0:
            return rc
    return N


def _pick_batch_block(B, requested):
    if requested is not None:
        if B % requested != 0:
            raise ValueError("batch_block must divide B")
        return requested
    # Keep >= 2 grid steps so the "parallel" batch axis feeds both v7x TensorCores;
    # cap at 4 samples per step to bound the per-step VMEM working set.
    for bt in (4, 3, 2):
        if B % bt == 0 and B // bt >= 2:
            return bt
    return 1


def _mixer_block_impl(x, params, n_repeat, row_chunk, batch_block, n_chains,
                      gelu_mode, single_buffer_consts):
    B, N, C = x.shape
    T = params["tw1t"].shape[0]
    H = params["ws1t"].shape[0]
    Dc = params["cw1"].shape[1]

    rc = _pick_row_chunk(N, row_chunk)
    bt = _pick_batch_block(B, batch_block)
    nch = n_chains if (n_chains >= 1 and C % max(n_chains, 1) == 0
                       and C >= 8 * n_chains) else 1

    cs = lambda shape: _const_spec(shape, single_buffer_consts)
    in_specs = [
        pl.BlockSpec((bt, N, C), lambda i: (i, 0, 0)),      # x
        cs((1, C)), cs((1, C)),                             # norm1 gamma / beta
        cs((1, C)), cs((1, C)),                             # norm2 gamma / beta
        cs((T, N)), cs((T, 1)),                             # token fc1  (pre-transposed)
        cs((H, T)), cs((H, 1)),                             # token fc_sn1
        cs((T, H)), cs((T, 1)),                             # token fc_sn2
        cs((N, T)), cs((N, 1)),                             # token fc2
        cs((C, Dc)), cs((1, Dc)),                           # channel fc1
        cs((Dc, C)), cs((1, C)),                            # channel fc2
    ]

    flops = 2 * B * (N * C * T + n_repeat * 2 * C * T * H + C * T * N
                     + N * C * Dc + N * Dc * C)
    transcendentals = B * (n_repeat * (C * T + C * H) + C * T + N * Dc)
    param_bytes = sum(int(v.size) * v.dtype.itemsize for v in params.values())
    bytes_accessed = 2 * B * N * C * 4 + param_bytes

    kernel = functools.partial(mixer_block_kernel, n_repeat, rc, nch, gelu_mode)
    return pl.pallas_call(
        kernel,
        grid=(B // bt,),
        in_specs=in_specs,
        out_specs=pl.BlockSpec((bt, N, C), lambda i: (i, 0, 0)),
        out_shape=jax.ShapeDtypeStruct((B, N, C), jnp.float32),
        compiler_params=pltpu.CompilerParams(
            dimension_semantics=("parallel",),               # batch axis: megacore sharding
            vmem_limit_bytes=_pick_vmem_limit_bytes(),       # per-generation VMEM budget
        ),
        cost_estimate=pl.CostEstimate(
            flops=int(flops),
            transcendentals=int(transcendentals),
            bytes_accessed=int(bytes_accessed)),
    )(x,
      params["g1"], params["be1"], params["g2"], params["be2"],
      params["tw1t"], params["tb1"], params["ws1t"], params["bs1"],
      params["ws2t"], params["bs2"], params["tw2t"], params["tb2"],
      params["cw1"], params["cb1"], params["cw2"], params["cb2"])


# Narrow "feature unsupported" errors only; anything else re-raises from the fallback call.
_SINGLE_BUFFER_FALLBACK_ERRORS = (
    AttributeError, TypeError, ValueError, NotImplementedError, pltpu.LoweringException)


def mixer_block(x, params, n_repeat=4, row_chunk=None, batch_block=None,
                n_chains=2, gelu="tanh"):
    """Fused MixerBlock forward.  gelu="tanh" (EUP, fast) or "erf" (exact torch.nn.GELU)."""
    try:
        return _mixer_block_impl(x, params, n_repeat, row_chunk, batch_block,
                                 n_chains, gelu, single_buffer_consts=True)
    except _SINGLE_BUFFER_FALLBACK_ERRORS as e:
        # TODO(synk): pl.Buffered(1) single-buffering of grid-constant weights rejected by
        # this JAX build; retrying with default double-buffering (2x weight VMEM on v7x).
        warnings.warn(
            "single-buffered grid-constant weights (pl.Buffered(1)) rejected "
            f"({type(e).__name__}: {e}); retrying with default double-buffering.")
        return _mixer_block_impl(x, params, n_repeat, row_chunk, batch_block,
                                 n_chains, gelu, single_buffer_consts=False)


# ----------------------- parameter setup (plain JAX glue) --------------------

def _spectral_norm_fc(w, coeff=0.9, n_power_iterations=8):
    """w: [in, out] f32. Returns w / max(1, sigma/coeff), sigma via power iteration."""
    u = jnp.ones((w.shape[1],), jnp.float32) / jnp.sqrt(float(w.shape[1]))
    v = w @ u
    for _ in range(n_power_iterations):
        v = w @ u
        v = v / (jnp.linalg.norm(v) + 1e-12)
        u = w.T @ v
        u = u / (jnp.linalg.norm(u) + 1e-12)
    sigma = v @ (w @ u)
    return w / jnp.maximum(1.0, sigma / coeff)


def init_params(key, dim, seq_len, mlp_ratio=(0.5, 4.0), hidden_ratio=1.0,
                coeff=0.9, n_power_iterations=8):
    # NOTE: for production sizes, pick dim / tokens_dim / channels_dim as multiples of 128
    # and seq_len as a multiple of 16 (bf16 sublane pack) to avoid masked MXU passes.
    tokens_dim = int(mlp_ratio[0] * dim)
    channels_dim = int(mlp_ratio[1] * dim)
    hidden = int(tokens_dim * hidden_ratio)

    ks = jax.random.split(key, 12)
    scale = 0.05
    w = lambda k, i, o: (scale * jax.random.normal(k, (i, o))).astype(jnp.float32)
    col = lambda k, o: (scale * jax.random.normal(k, (o, 1))).astype(jnp.float32)
    row = lambda k, o: (scale * jax.random.normal(k, (1, o))).astype(jnp.float32)
    bf = lambda a: a.astype(jnp.bfloat16)        # weights stored bf16 for the MXU

    ws1 = _spectral_norm_fc(w(ks[2], tokens_dim, hidden), coeff, n_power_iterations)
    ws2 = _spectral_norm_fc(w(ks[4], hidden, tokens_dim), coeff, n_power_iterations)

    return dict(
        # LayerNorms (f32)
        g1=jnp.ones((1, dim), jnp.float32), be1=jnp.zeros((1, dim), jnp.float32),
        g2=jnp.ones((1, dim), jnp.float32), be2=jnp.zeros((1, dim), jnp.float32),
        # token-mixing iMlp weights stored PRE-TRANSPOSED ([out, in] == torch layout, bf16);
        # biases stored as column vectors [out, 1] (f32) for the transposed-state layout.
        tw1t=bf(w(ks[0], seq_len, tokens_dim).T), tb1=col(ks[1], tokens_dim),
        ws1t=bf(ws1.T), bs1=col(ks[3], hidden),
        ws2t=bf(ws2.T), bs2=col(ks[5], tokens_dim),
        tw2t=bf(w(ks[6], tokens_dim, seq_len).T), tb2=col(ks[7], seq_len),
        # channel-mixing Mlp ([in, out] weights, row biases)
        cw1=bf(w(ks[8], dim, channels_dim)), cb1=row(ks[9], channels_dim),
        cw2=bf(w(ks[10], channels_dim, dim)), cb2=row(ks[11], dim),
    )


# ----------------------------- pure-JAX reference ----------------------------

def reference_mixer_block(x, p, n_repeat=4, gelu="tanh"):
    act = _gelu_tanh if gelu == "tanh" else _gelu_erf
    f32 = lambda a: a.astype(jnp.float32)

    def ln(v, g, be):
        m = jnp.mean(v, -1, keepdims=True)
        va = jnp.mean(jnp.square(v - m), -1, keepdims=True)
        return (v - m) / jnp.sqrt(va + 1e-6) * g + be

    # token mixing (mirrors the PyTorch transpose(1, 2) formulation)
    xn = ln(x, f32(p["g1"]), f32(p["be1"]))                 # [B, N, C]
    y = jnp.swapaxes(xn, 1, 2)                              # [B, C, N]
    t = y @ f32(p["tw1t"]).T + f32(p["tb1"])[:, 0]          # [B, C, T]
    t_in = t
    for _ in range(n_repeat):
        t = act(t)
        t = t @ f32(p["ws1t"]).T + f32(p["bs1"])[:, 0]
        t = act(t)
        t = t @ f32(p["ws2t"]).T + f32(p["bs2"])[:, 0]
        t = t + t_in
    t = act(t)
    t = t @ f32(p["tw2t"]).T + f32(p["tb2"])[:, 0]          # [B, C, N]
    x = x + jnp.swapaxes(t, 1, 2)

    # channel mixing
    xn2 = ln(x, f32(p["g2"]), f32(p["be2"]))
    h = act(xn2 @ f32(p["cw1"]) + f32(p["cb1"]))
    h = h @ f32(p["cw2"]) + f32(p["cb2"])
    return x + h


# ------------------------------------ main ------------------------------------

if __name__ == "__main__":
    B, N, C = 4, 16, 32          # batch, seq_len, dim  (tokens_dim=16, channels_dim=128)
    n_repeat = 4

    key = jax.random.PRNGKey(0)
    kx, kp = jax.random.split(key)
    x = jax.random.normal(kx, (B, N, C), dtype=jnp.float32)
    params = init_params(kp, dim=C, seq_len=N)

    # Default config: tanh-approx GELU (EUP), 2 interleaved token chains, batch_block auto
    # (= 2 here -> grid of 2), row_chunk=8 so the channel-mixing pl.loop runs 2 chunks.
    out = jax.block_until_ready(mixer_block(x, params, n_repeat=n_repeat, row_chunk=8))
    ref = reference_mixer_block(x, params, n_repeat=n_repeat, gelu="tanh")
    assert out.shape == (B, N, C)
    assert jnp.allclose(out, ref, atol=2e-2, rtol=2e-2), (
        f"tanh-GELU max abs err {jnp.max(jnp.abs(out - ref))}")

    # Exact-erf GELU path: matches torch.nn.GELU default numerics.
    out_erf = jax.block_until_ready(
        mixer_block(x, params, n_repeat=n_repeat, row_chunk=8, gelu="erf"))
    ref_erf = reference_mixer_block(x, params, n_repeat=n_repeat, gelu="erf")
    assert jnp.allclose(out_erf, ref_erf, atol=2e-2, rtol=2e-2), (
        f"erf-GELU max abs err {jnp.max(jnp.abs(out_erf - ref_erf))}")

    print("KERNEL_OK")
</pallas_src>

<mosaic_0001>
module attributes {stable_mosaic.version = 11 : i64} {
  func.func @mixer_block_kernel(%arg0: i32, %arg1: memref<2x16x32xf32, #tpu.memory_space<vmem>>, %arg2: memref<1x32xf32, #tpu.memory_space<vmem>>, %arg3: memref<1x32xf32, #tpu.memory_space<vmem>>, %arg4: memref<1x32xf32, #tpu.memory_space<vmem>>, %arg5: memref<1x32xf32, #tpu.memory_space<vmem>>, %arg6: memref<16x16xbf16, #tpu.memory_space<vmem>>, %arg7: memref<16x1xf32, #tpu.memory_space<vmem>>, %arg8: memref<16x16xbf16, #tpu.memory_space<vmem>>, %arg9: memref<16x1xf32, #tpu.memory_space<vmem>>, %arg10: memref<16x16xbf16, #tpu.memory_space<vmem>>, %arg11: memref<16x1xf32, #tpu.memory_space<vmem>>, %arg12: memref<16x16xbf16, #tpu.memory_space<vmem>>, %arg13: memref<16x1xf32, #tpu.memory_space<vmem>>, %arg14: memref<32x128xbf16, #tpu.memory_space<vmem>>, %arg15: memref<1x128xf32, #tpu.memory_space<vmem>>, %arg16: memref<128x32xbf16, #tpu.memory_space<vmem>>, %arg17: memref<1x32xf32, #tpu.memory_space<vmem>>, %arg18: memref<2x16x32xf32, #tpu.memory_space<vmem>>) attributes {dimension_semantics = [#tpu.dimension_semantics<parallel>], iteration_bounds = array<i64: 2>, scalar_prefetch = 0 : i64, scratch_operands = 0 : i64, tpu.core_type = #tpu.core_type<tc>, window_params = [{transform_indices = @transform_0, window_bounds = array<i64: 2, 16, 32>}, {pipeline_mode = #tpu.pipeline_mode<synchronous>, transform_indices = @transform_1, window_bounds = array<i64: 1, 32>}, {pipeline_mode = #tpu.pipeline_mode<synchronous>, transform_indices = @transform_2, window_bounds = array<i64: 1, 32>}, {pipeline_mode = #tpu.pipeline_mode<synchronous>, transform_indices = @transform_3, window_bounds = array<i64: 1, 32>}, {pipeline_mode = #tpu.pipeline_mode<synchronous>, transform_indices = @transform_4, window_bounds = array<i64: 1, 32>}, {pipeline_mode = #tpu.pipeline_mode<synchronous>, transform_indices = @transform_5, window_bounds = array<i64: 16, 16>}, {pipeline_mode = #tpu.pipeline_mode<synchronous>, transform_indices = @transform_6, window_bounds = array<i64: 16, 1>}, {pipeline_mode = #tpu.pipeline_mode<synchronous>, transform_indices = @transform_7, window_bounds = array<i64: 16, 16>}, {pipeline_mode = #tpu.pipeline_mode<synchronous>, transform_indices = @transform_8, window_bounds = array<i64: 16, 1>}, {pipeline_mode = #tpu.pipeline_mode<synchronous>, transform_indices = @transform_9, window_bounds = array<i64: 16, 16>}, {pipeline_mode = #tpu.pipeline_mode<synchronous>, transform_indices = @transform_10, window_bounds = array<i64: 16, 1>}, {pipeline_mode = #tpu.pipeline_mode<synchronous>, transform_indices = @transform_11, window_bounds = array<i64: 16, 16>}, {pipeline_mode = #tpu.pipeline_mode<synchronous>, transform_indices = @transform_12, window_bounds = array<i64: 16, 1>}, {pipeline_mode = #tpu.pipeline_mode<synchronous>, transform_indices = @transform_13, window_bounds = array<i64: 32, 128>}, {pipeline_mode = #tpu.pipeline_mode<synchronous>, transform_indices = @transform_14, window_bounds = array<i64: 1, 128>}, {pipeline_mode = #tpu.pipeline_mode<synchronous>, transform_indices = @transform_15, window_bounds = array<i64: 128, 32>}, {pipeline_mode = #tpu.pipeline_mode<synchronous>, transform_indices = @transform_16, window_bounds = array<i64: 1, 32>}, {transform_indices = @transform_17, window_bounds = array<i64: 2, 16, 32>}]} {
    %c0 = arith.constant 0 : index
    %c0_0 = arith.constant 0 : index
    %0 = vector.load %arg2[%c0, %c0_0] : memref<1x32xf32, #tpu.memory_space<vmem>>, vector<1x32xf32>
    %c0_1 = arith.constant 0 : index
    %c0_2 = arith.constant 0 : index
    %1 = vector.load %arg3[%c0_1, %c0_2] : memref<1x32xf32, #tpu.memory_space<vmem>>, vector<1x32xf32>
    %c0_3 = arith.constant 0 : index
    %c0_4 = arith.constant 0 : index
    %2 = vector.load %arg4[%c0_3, %c0_4] : memref<1x32xf32, #tpu.memory_space<vmem>>, vector<1x32xf32>
    %c0_5 = arith.constant 0 : index
    %c0_6 = arith.constant 0 : index
    %3 = vector.load %arg5[%c0_5, %c0_6] : memref<1x32xf32, #tpu.memory_space<vmem>>, vector<1x32xf32>
    %c0_7 = arith.constant 0 : index
    %c0_8 = arith.constant 0 : index
    %4 = vector.load %arg6[%c0_7, %c0_8] : memref<16x16xbf16, #tpu.memory_space<vmem>>, vector<16x16xbf16>
    %c0_9 = arith.constant 0 : index
    %c0_10 = arith.constant 0 : index
    %5 = vector.load %arg7[%c0_9, %c0_10] : memref<16x1xf32, #tpu.memory_space<vmem>>, vector<16x1xf32>
    %c0_11 = arith.constant 0 : index
    %c0_12 = arith.constant 0 : index
    %6 = vector.load %arg8[%c0_11, %c0_12] : memref<16x16xbf16, #tpu.memory_space<vmem>>, vector<16x16xbf16>
    %c0_13 = arith.constant 0 : index
    %c0_14 = arith.constant 0 : index
    %7 = vector.load %arg9[%c0_13, %c0_14] : memref<16x1xf32, #tpu.memory_space<vmem>>, vector<16x1xf32>
    %c0_15 = arith.constant 0 : index
    %c0_16 = arith.constant 0 : index
    %8 = vector.load %arg10[%c0_15, %c0_16] : memref<16x16xbf16, #tpu.memory_space<vmem>>, vector<16x16xbf16>
    %c0_17 = arith.constant 0 : index
    %c0_18 = arith.constant 0 : index
    %9 = vector.load %arg11[%c0_17, %c0_18] : memref<16x1xf32, #tpu.memory_space<vmem>>, vector<16x1xf32>
    %c0_19 = arith.constant 0 : index
    %c0_20 = arith.constant 0 : index
    %10 = vector.load %arg12[%c0_19, %c0_20] : memref<16x16xbf16, #tpu.memory_space<vmem>>, vector<16x16xbf16>
    %c0_21 = arith.constant 0 : index
    %c0_22 = arith.constant 0 : index
    %11 = vector.load %arg13[%c0_21, %c0_22] : memref<16x1xf32, #tpu.memory_space<vmem>>, vector<16x1xf32>
    %c0_23 = arith.constant 0 : index
    %c0_24 = arith.constant 0 : index
    %12 = vector.load %arg14[%c0_23, %c0_24] : memref<32x128xbf16, #tpu.memory_space<vmem>>, vector<32x128xbf16>
    %c0_25 = arith.constant 0 : index
    %c0_26 = arith.constant 0 : index
    %13 = vector.load %arg15[%c0_25, %c0_26] : memref<1x128xf32, #tpu.memory_space<vmem>>, vector<1x128xf32>
    %c0_27 = arith.constant 0 : index
    %c0_28 = arith.constant 0 : index
    %14 = vector.load %arg16[%c0_27, %c0_28] : memref<128x32xbf16, #tpu.memory_space<vmem>>, vector<128x32xbf16>
    %c0_29 = arith.constant 0 : index
    %c0_30 = arith.constant 0 : index
    %15 = vector.load %arg17[%c0_29, %c0_30] : memref<1x32xf32, #tpu.memory_space<vmem>>, vector<1x32xf32>
    %c0_31 = arith.constant 0 : index
    %c0_32 = arith.constant 0 : index
    %c0_33 = arith.constant 0 : index
    %16 = vector.load %arg1[%c0_31, %c0_32, %c0_33] : memref<2x16x32xf32, #tpu.memory_space<vmem>>, vector<1x16x32xf32>
    %17 = vector.shape_cast %16 : vector<1x16x32xf32> to vector<16x32xf32>
    %cst = arith.constant dense<0.000000e+00> : vector<16xf32>
    %18 = vector.multi_reduction <add>, %17, %cst [1] : vector<16x32xf32> to vector<16xf32>
    %19 = vector.shape_cast %18 : vector<16xf32> to vector<16x1xf32>
    %cst_34 = arith.constant 3.200000e+01 : f32
    %20 = vector.broadcast %cst_34 : f32 to vector<16x1xf32>
    %21 = arith.divf %19, %20 : vector<16x1xf32>
    %22 = vector.broadcast %21 : vector<16x1xf32> to vector<16x32xf32>
    %23 = arith.subf %17, %22 : vector<16x32xf32>
    %24 = arith.mulf %23, %23 : vector<16x32xf32>
    %cst_35 = arith.constant dense<0.000000e+00> : vector<16xf32>
    %25 = vector.multi_reduction <add>, %24, %cst_35 [1] : vector<16x32xf32> to vector<16xf32>
    %26 = vector.shape_cast %25 : vector<16xf32> to vector<16x1xf32>
    %cst_36 = arith.constant 3.200000e+01 : f32
    %27 = vector.broadcast %cst_36 : f32 to vector<16x1xf32>
    %28 = arith.divf %26, %27 : vector<16x1xf32>
    %29 = vector.broadcast %21 : vector<16x1xf32> to vector<16x32xf32>
    %30 = arith.subf %17, %29 : vector<16x32xf32>
    %cst_37 = arith.constant 9.99999997E-7 : f32
    %31 = vector.broadcast %cst_37 : f32 to vector<16x1xf32>
    %32 = arith.addf %28, %31 : vector<16x1xf32>
    %33 = math.rsqrt %32 : vector<16x1xf32>
    %34 = vector.broadcast %33 : vector<16x1xf32> to vector<16x32xf32>
    %35 = arith.mulf %30, %34 : vector<16x32xf32>
    %36 = vector.broadcast %0 : vector<1x32xf32> to vector<16x32xf32>
    %37 = arith.mulf %35, %36 : vector<16x32xf32>
    %38 = vector.broadcast %1 : vector<1x32xf32> to vector<16x32xf32>
    %39 = arith.addf %37, %38 : vector<16x32xf32>
    %40 = vector.extract_strided_slice %39 {offsets = [0, 0], sizes = [16, 16], strides = [1, 1]} : vector<16x32xf32> to vector<16x16xf32>
    %41 = arith.truncf %40 : vector<16x16xf32> to vector<16x16xbf16>
    %cst_38 = arith.constant dense<0.000000e+00> : vector<16x16xf32>
    %42 = tpu.matmul %4, %41, %cst_38 {dimension_numbers = #tpu.dot_dimension_numbers<[1], [0], [0], [1], [0, 0, 1, 1], [], []>} : vector<16x16xbf16>, vector<16x16xbf16>, vector<16x16xf32> -> vector<16x16xf32>
    %43 = vector.broadcast %5 : vector<16x1xf32> to vector<16x16xf32>
    %44 = arith.addf %42, %43 : vector<16x16xf32>
    %45 = vector.extract_strided_slice %39 {offsets = [0, 16], sizes = [16, 16], strides = [1, 1]} : vector<16x32xf32> to vector<16x16xf32>
    %46 = arith.truncf %45 : vector<16x16xf32> to vector<16x16xbf16>
    %cst_39 = arith.constant dense<0.000000e+00> : vector<16x16xf32>
    %47 = tpu.matmul %4, %46, %cst_39 {dimension_numbers = #tpu.dot_dimension_numbers<[1], [0], [0], [1], [0, 0, 1, 1], [], []>} : vector<16x16xbf16>, vector<16x16xbf16>, vector<16x16xf32> -> vector<16x16xf32>
    %48 = vector.broadcast %5 : vector<16x1xf32> to vector<16x16xf32>
    %49 = arith.addf %47, %48 : vector<16x16xf32>
    %c0_i32 = arith.constant 0 : i32
    %cst_40 = arith.constant 5.000000e-01 : f32
    %50 = vector.broadcast %cst_40 : f32 to vector<16x16xf32>
    %51 = arith.mulf %50, %44 : vector<16x16xf32>
    %52 = arith.mulf %44, %44 : vector<16x16xf32>
    %53 = arith.mulf %52, %44 : vector<16x16xf32>
    %cst_41 = arith.constant 4.471500e-02 : f32
    %54 = vector.broadcast %cst_41 : f32 to vector<16x16xf32>
    %55 = arith.mulf %54, %53 : vector<16x16xf32>
    %56 = arith.addf %44, %55 : vector<16x16xf32>
    %cst_42 = arith.constant 0.797884583 : f32
    %57 = vector.broadcast %cst_42 : f32 to vector<16x16xf32>
    %58 = arith.mulf %57, %56 : vector<16x16xf32>
    %59 = math.tanh %58 : vector<16x16xf32>
    %cst_43 = arith.constant 1.000000e+00 : f32
    %60 = vector.broadcast %cst_43 : f32 to vector<16x16xf32>
    %61 = arith.addf %60, %59 : vector<16x16xf32>
    %62 = arith.mulf %51, %61 : vector<16x16xf32>
    %63 = arith.truncf %62 : vector<16x16xf32> to vector<16x16xbf16>
    %cst_44 = arith.constant dense<0.000000e+00> : vector<16x16xf32>
    %64 = tpu.matmul %6, %63, %cst_44 {dimension_numbers = #tpu.dot_dimension_numbers<[1], [0], [0], [1], [0, 0, 1, 1], [], []>} : vector<16x16xbf16>, vector<16x16xbf16>, vector<16x16xf32> -> vector<16x16xf32>
    %65 = vector.broadcast %7 : vector<16x1xf32> to vector<16x16xf32>
    %66 = arith.addf %64, %65 : vector<16x16xf32>
    %cst_45 = arith.constant 5.000000e-01 : f32
    %67 = vector.broadcast %cst_45 : f32 to vector<16x16xf32>
    %68 = arith.mulf %67, %66 : vector<16x16xf32>
    %69 = arith.mulf %66, %66 : vector<16x16xf32>
    %70 = arith.mulf %69, %66 : vector<16x16xf32>
    %cst_46 = arith.constant 4.471500e-02 : f32
    %71 = vector.broadcast %cst_46 : f32 to vector<16x16xf32>
    %72 = arith.mulf %71, %70 : vector<16x16xf32>
    %73 = arith.addf %66, %72 : vector<16x16xf32>
    %cst_47 = arith.constant 0.797884583 : f32
    %74 = vector.broadcast %cst_47 : f32 to vector<16x16xf32>
    %75 = arith.mulf %74, %73 : vector<16x16xf32>
    %76 = math.tanh %75 : vector<16x16xf32>
    %cst_48 = arith.constant 1.000000e+00 : f32
    %77 = vector.broadcast %cst_48 : f32 to vector<16x16xf32>
    %78 = arith.addf %77, %76 : vector<16x16xf32>
    %79 = arith.mulf %68, %78 : vector<16x16xf32>
    %80 = arith.truncf %79 : vector<16x16xf32> to vector<16x16xbf16>
    %cst_49 = arith.constant dense<0.000000e+00> : vector<16x16xf32>
    %81 = tpu.matmul %8, %80, %cst_49 {dimension_numbers = #tpu.dot_dimension_numbers<[1], [0], [0], [1], [0, 0, 1, 1], [], []>} : vector<16x16xbf16>, vector<16x16xbf16>, vector<16x16xf32> -> vector<16x16xf32>
    %82 = vector.broadcast %9 : vector<16x1xf32> to vector<16x16xf32>
    %83 = arith.addf %81, %82 : vector<16x16xf32>
    %84 = arith.addf %83, %44 : vector<16x16xf32>
    %cst_50 = arith.constant 5.000000e-01 : f32
    %85 = vector.broadcast %cst_50 : f32 to vector<16x16xf32>
    %86 = arith.mulf %85, %49 : vector<16x16xf32>
    %87 = arith.mulf %49, %49 : vector<16x16xf32>
    %88 = arith.mulf %87, %49 : vector<16x16xf32>
    %cst_51 = arith.constant 4.471500e-02 : f32
    %89 = vector.broadcast %cst_51 : f32 to vector<16x16xf32>
    %90 = arith.mulf %89, %88 : vector<16x16xf32>
    %91 = arith.addf %49, %90 : vector<16x16xf32>
    %cst_52 = arith.constant 0.797884583 : f32
    %92 = vector.broadcast %cst_52 : f32 to vector<16x16xf32>
    %93 = arith.mulf %92, %91 : vector<16x16xf32>
    %94 = math.tanh %93 : vector<16x16xf32>
    %cst_53 = arith.constant 1.000000e+00 : f32
    %95 = vector.broadcast %cst_53 : f32 to vector<16x16xf32>
    %96 = arith.addf %95, %94 : vector<16x16xf32>
    %97 = arith.mulf %86, %96 : vector<16x16xf32>
    %98 = arith.truncf %97 : vector<16x16xf32> to vector<16x16xbf16>
    %cst_54 = arith.constant dense<0.000000e+00> : vector<16x16xf32>
    %99 = tpu.matmul %6, %98, %cst_54 {dimension_numbers = #tpu.dot_dimension_numbers<[1], [0], [0], [1], [0, 0, 1, 1], [], []>} : vector<16x16xbf16>, vector<16x16xbf16>, vector<16x16xf32> -> vector<16x16xf32>
    %100 = vector.broadcast %7 : vector<16x1xf32> to vector<16x16xf32>
    %101 = arith.addf %99, %100 : vector<16x16xf32>
    %cst_55 = arith.constant 5.000000e-01 : f32
    %102 = vector.broadcast %cst_55 : f32 to vector<16x16xf32>
    %103 = arith.mulf %102, %101 : vector<16x16xf32>
    %104 = arith.mulf %101, %101 : vector<16x16xf32>
    %105 = arith.mulf %104, %101 : vector<16x16xf32>
    %cst_56 = arith.constant 4.471500e-02 : f32
    %106 = vector.broadcast %cst_56 : f32 to vector<16x16xf32>
    %107 = arith.mulf %106, %105 : vector<16x16xf32>
    %108 = arith.addf %101, %107 : vector<16x16xf32>
    %cst_57 = arith.constant 0.797884583 : f32
    %109 = vector.broadcast %cst_57 : f32 to vector<16x16xf32>
    %110 = arith.mulf %109, %108 : vector<16x16xf32>
    %111 = math.tanh %110 : vector<16x16xf32>
    %cst_58 = arith.constant 1.000000e+00 : f32
    %112 = vector.broadcast %cst_58 : f32 to vector<16x16xf32>
    %113 = arith.addf %112, %111 : vector<16x16xf32>
    %114 = arith.mulf %103, %113 : vector<16x16xf32>
    %115 = arith.truncf %114 : vector<16x16xf32> to vector<16x16xbf16>
    %cst_59 = arith.constant dense<0.000000e+00> : vector<16x16xf32>
    %116 = tpu.matmul %8, %115, %cst_59 {dimension_numbers = #tpu.dot_dimension_numbers<[1], [0], [0], [1], [0, 0, 1, 1], [], []>} : vector<16x16xbf16>, vector<16x16xbf16>, vector<16x16xf32> -> vector<16x16xf32>
    %117 = vector.broadcast %9 : vector<16x1xf32> to vector<16x16xf32>
    %118 = arith.addf %116, %117 : vector<16x16xf32>
    %119 = arith.addf %118, %49 : vector<16x16xf32>
    %c1_i32 = arith.constant 1 : i32
    %cst_60 = arith.constant 5.000000e-01 : f32
    %120 = vector.broadcast %cst_60 : f32 to vector<16x16xf32>
    %121 = arith.mulf %120, %84 : vector<16x16xf32>
    %122 = arith.mulf %84, %84 : vector<16x16xf32>
    %123 = arith.mulf %122, %84 : vector<16x16xf32>
    %cst_61 = arith.constant 4.471500e-02 : f32
    %124 = vector.broadcast %cst_61 : f32 to vector<16x16xf32>
    %125 = arith.mulf %124, %123 : vector<16x16xf32>
    %126 = arith.addf %84, %125 : vector<16x16xf32>
    %cst_62 = arith.constant 0.797884583 : f32
    %127 = vector.broadcast %cst_62 : f32 to vector<16x16xf32>
    %128 = arith.mulf %127, %126 : vector<16x16xf32>
    %129 = math.tanh %128 : vector<16x16xf32>
    %cst_63 = arith.constant 1.000000e+00 : f32
    %130 = vector.broadcast %cst_63 : f32 to vector<16x16xf32>
    %131 = arith.addf %130, %129 : vector<16x16xf32>
    %132 = arith.mulf %121, %131 : vector<16x16xf32>
    %133 = arith.truncf %132 : vector<16x16xf32> to vector<16x16xbf16>
    %cst_64 = arith.constant dense<0.000000e+00> : vector<16x16xf32>
    %134 = tpu.matmul %6, %133, %cst_64 {dimension_numbers = #tpu.dot_dimension_numbers<[1], [0], [0], [1], [0, 0, 1, 1], [], []>} : vector<16x16xbf16>, vector<16x16xbf16>, vector<16x16xf32> -> vector<16x16xf32>
    %135 = vector.broadcast %7 : vector<16x1xf32> to vector<16x16xf32>
    %136 = arith.addf %134, %135 : vector<16x16xf32>
    %cst_65 = arith.constant 5.000000e-01 : f32
    %137 = vector.broadcast %cst_65 : f32 to vector<16x16xf32>
    %138 = arith.mulf %137, %136 : vector<16x16xf32>
    %139 = arith.mulf %136, %136 : vector<16x16xf32>
    %140 = arith.mulf %139, %136 : vector<16x16xf32>
    %cst_66 = arith.constant 4.471500e-02 : f32
    %141 = vector.broadcast %cst_66 : f32 to vector<16x16xf32>
    %142 = arith.mulf %141, %140 : vector<16x16xf32>
    %143 = arith.addf %136, %142 : vector<16x16xf32>
    %cst_67 = arith.constant 0.797884583 : f32
    %144 = vector.broadcast %cst_67 : f32 to vector<16x16xf32>
    %145 = arith.mulf %144, %143 : vector<16x16xf32>
    %146 = math.tanh %145 : vector<16x16xf32>
    %cst_68 = arith.constant 1.000000e+00 : f32
    %147 = vector.broadcast %cst_68 : f32 to vector<16x16xf32>
    %148 = arith.addf %147, %146 : vector<16x16xf32>
    %149 = arith.mulf %138, %148 : vector<16x16xf32>
    %150 = arith.truncf %149 : vector<16x16xf32> to vector<16x16xbf16>
    %cst_69 = arith.constant dense<0.000000e+00> : vector<16x16xf32>
    %151 = tpu.matmul %8, %150, %cst_69 {dimension_numbers = #tpu.dot_dimension_numbers<[1], [0], [0], [1], [0, 0, 1, 1], [], []>} : vector<16x16xbf16>, vector<16x16xbf16>, vector<16x16xf32> -> vector<16x16xf32>
    %152 = vector.broadcast %9 : vector<16x1xf32> to vector<16x16xf32>
    %153 = arith.addf %151, %152 : vector<16x16xf32>
    %154 = arith.addf %153, %44 : vector<16x16xf32>
    %cst_70 = arith.constant 5.000000e-01 : f32
    %155 = vector.broadcast %cst_70 : f32 to vector<16x16xf32>
    %156 = arith.mulf %155, %119 : vector<16x16xf32>
    %157 = arith.mulf %119, %119 : vector<16x16xf32>
    %158 = arith.mulf %157, %119 : vector<16x16xf32>
    %cst_71 = arith.constant 4.471500e-02 : f32
    %159 = vector.broadcast %cst_71 : f32 to vector<16x16xf32>
    %160 = arith.mulf %159, %158 : vector<16x16xf32>
    %161 = arith.addf %119, %160 : vector<16x16xf32>
    %cst_72 = arith.constant 0.797884583 : f32
    %162 = vector.broadcast %cst_72 : f32 to vector<16x16xf32>
    %163 = arith.mulf %162, %161 : vector<16x16xf32>
    %164 = math.tanh %163 : vector<16x16xf32>
    %cst_73 = arith.constant 1.000000e+00 : f32
    %165 = vector.broadcast %cst_73 : f32 to vector<16x16xf32>
    %166 = arith.addf %165, %164 : vector<16x16xf32>
    %167 = arith.mulf %156, %166 : vector<16x16xf32>
    %168 = arith.truncf %167 : vector<16x16xf32> to vector<16x16xbf16>
    %cst_74 = arith.constant dense<0.000000e+00> : vector<16x16xf32>
    %169 = tpu.matmul %6, %168, %cst_74 {dimension_numbers = #tpu.dot_dimension_numbers<[1], [0], [0], [1], [0, 0, 1, 1], [], []>} : vector<16x16xbf16>, vector<16x16xbf16>, vector<16x16xf32> -> vector<16x16xf32>
    %170 = vector.broadcast %7 : vector<16x1xf32> to vector<16x16xf32>
    %171 = arith.addf %169, %170 : vector<16x16xf32>
    %cst_75 = arith.constant 5.000000e-01 : f32
    %172 = vector.broadcast %cst_75 : f32 to vector<16x16xf32>
    %173 = arith.mulf %172, %171 : vector<16x16xf32>
    %174 = arith.mulf %171, %171 : vector<16x16xf32>
    %175 = arith.mulf %174, %171 : vector<16x16xf32>
    %cst_76 = arith.constant 4.471500e-02 : f32
    %176 = vector.broadcast %cst_76 : f32 to vector<16x16xf32>
    %177 = arith.mulf %176, %175 : vector<16x16xf32>
    %178 = arith.addf %171, %177 : vector<16x16xf32>
    %cst_77 = arith.constant 0.797884583 : f32
    %179 = vector.broadcast %cst_77 : f32 to vector<16x16xf32>
    %180 = arith.mulf %179, %178 : vector<16x16xf32>
    %181 = math.tanh %180 : vector<16x16xf32>
    %cst_78 = arith.constant 1.000000e+00 : f32
    %182 = vector.broadcast %cst_78 : f32 to vector<16x16xf32>
    %183 = arith.addf %182, %181 : vector<16x16xf32>
    %184 = arith.mulf %173, %183 : vector<16x16xf32>
    %185 = arith.truncf %184 : vector<16x16xf32> to vector<16x16xbf16>
    %cst_79 = arith.constant dense<0.000000e+00> : vector<16x16xf32>
    %186 = tpu.matmul %8, %185, %cst_79 {dimension_numbers = #tpu.dot_dimension_numbers<[1], [0], [0], [1], [0, 0, 1, 1], [], []>} : vector<16x16xbf16>, vector<16x16xbf16>, vector<16x16xf32> -> vector<16x16xf32>
    %187 = vector.broadcast %9 : vector<16x1xf32> to vector<16x16xf32>
    %188 = arith.addf %186, %187 : vector<16x16xf32>
    %189 = arith.addf %188, %49 : vector<16x16xf32>
    %c2_i32 = arith.constant 2 : i32
    %cst_80 = arith.constant 5.000000e-01 : f32
    %190 = vector.broadcast %cst_80 : f32 to vector<16x16xf32>
    %191 = arith.mulf %190, %154 : vector<16x16xf32>
    %192 = arith.mulf %154, %154 : vector<16x16xf32>
    %193 = arith.mulf %192, %154 : vector<16x16xf32>
    %cst_81 = arith.constant 4.471500e-02 : f32
    %194 = vector.broadcast %cst_81 : f32 to vector<16x16xf32>
    %195 = arith.mulf %194, %193 : vector<16x16xf32>
    %196 = arith.addf %154, %195 : vector<16x16xf32>
    %cst_82 = arith.constant 0.797884583 : f32
    %197 = vector.broadcast %cst_82 : f32 to vector<16x16xf32>
    %198 = arith.mulf %197, %196 : vector<16x16xf32>
    %199 = math.tanh %198 : vector<16x16xf32>
    %cst_83 = arith.constant 1.000000e+00 : f32
    %200 = vector.broadcast %cst_83 : f32 to vector<16x16xf32>
    %201 = arith.addf %200, %199 : vector<16x16xf32>
    %202 = arith.mulf %191, %201 : vector<16x16xf32>
    %203 = arith.truncf %202 : vector<16x16xf32> to vector<16x16xbf16>
    %cst_84 = arith.constant dense<0.000000e+00> : vector<16x16xf32>
    %204 = tpu.matmul %6, %203, %cst_84 {dimension_numbers = #tpu.dot_dimension_numbers<[1], [0], [0], [1], [0, 0, 1, 1], [], []>} : vector<16x16xbf16>, vector<16x16xbf16>, vector<16x16xf32> -> vector<16x16xf32>
    %205 = vector.broadcast %7 : vector<16x1xf32> to vector<16x16xf32>
    %206 = arith.addf %204, %205 : vector<16x16xf32>
    %cst_85 = arith.constant 5.000000e-01 : f32
    %207 = vector.broadcast %cst_85 : f32 to vector<16x16xf32>
    %208 = arith.mulf %207, %206 : vector<16x16xf32>
    %209 = arith.mulf %206, %206 : vector<16x16xf32>
    %210 = arith.mulf %209, %206 : vector<16x16xf32>
    %cst_86 = arith.constant 4.471500e-02 : f32
    %211 = vector.broadcast %cst_86 : f32 to vector<16x16xf32>
    %212 = arith.mulf %211, %210 : vector<16x16xf32>
    %213 = arith.addf %206, %212 : vector<16x16xf32>
    %cst_87 = arith.constant 0.797884583 : f32
    %214 = vector.broadcast %cst_87 : f32 to vector<16x16xf32>
    %215 = arith.mulf %214, %213 : vector<16x16xf32>
    %216 = math.tanh %215 : vector<16x16xf32>
    %cst_88 = arith.constant 1.000000e+00 : f32
    %217 = vector.broadcast %cst_88 : f32 to vector<16x16xf32>
    %218 = arith.addf %217, %216 : vector<16x16xf32>
    %219 = arith.mulf %208, %218 : vector<16x16xf32>
    %220 = arith.truncf %219 : vector<16x16xf32> to vector<16x16xbf16>
    %cst_89 = arith.constant dense<0.000000e+00> : vector<16x16xf32>
    %221 = tpu.matmul %8, %220, %cst_89 {dimension_numbers = #tpu.dot_dimension_numbers<[1], [0], [0], [1], [0, 0, 1, 1], [], []>} : vector<16x16xbf16>, vector<16x16xbf16>, vector<16x16xf32> -> vector<16x16xf32>
    %222 = vector.broadcast %9 : vector<16x1xf32> to vector<16x16xf32>
    %223 = arith.addf %221, %222 : vector<16x16xf32>
    %224 = arith.addf %223, %44 : vector<16x16xf32>
    %cst_90 = arith.constant 5.000000e-01 : f32
    %225 = vector.broadcast %cst_90 : f32 to vector<16x16xf32>
    %226 = arith.mulf %225, %189 : vector<16x16xf32>
    %227 = arith.mulf %189, %189 : vector<16x16xf32>
    %228 = arith.mulf %227, %189 : vector<16x16xf32>
    %cst_91 = arith.constant 4.471500e-02 : f32
    %229 = vector.broadcast %cst_91 : f32 to vector<16x16xf32>
    %230 = arith.mulf %229, %228 : vector<16x16xf32>
    %231 = arith.addf %189, %230 : vector<16x16xf32>
    %cst_92 = arith.constant 0.797884583 : f32
    %232 = vector.broadcast %cst_92 : f32 to vector<16x16xf32>
    %233 = arith.mulf %232, %231 : vector<16x16xf32>
    %234 = math.tanh %233 : vector<16x16xf32>
    %cst_93 = arith.constant 1.000000e+00 : f32
    %235 = vector.broadcast %cst_93 : f32 to vector<16x16xf32>
    %236 = arith.addf %235, %234 : vector<16x16xf32>
    %237 = arith.mulf %226, %236 : vector<16x16xf32>
    %238 = arith.truncf %237 : vector<16x16xf32> to vector<16x16xbf16>
    %cst_94 = arith.constant dense<0.000000e+00> : vector<16x16xf32>
    %239 = tpu.matmul %6, %238, %cst_94 {dimension_numbers = #tpu.dot_dimension_numbers<[1], [0], [0], [1], [0, 0, 1, 1], [], []>} : vector<16x16xbf16>, vector<16x16xbf16>, vector<16x16xf32> -> vector<16x16xf32>
    %240 = vector.broadcast %7 : vector<16x1xf32> to vector<16x16xf32>
    %241 = arith.addf %239, %240 : vector<16x16xf32>
    %cst_95 = arith.constant 5.000000e-01 : f32
    %242 = vector.broadcast %cst_95 : f32 to vector<16x16xf32>
    %243 = arith.mulf %242, %241 : vector<16x16xf32>
    %244 = arith.mulf %241, %241 : vector<16x16xf32>
    %245 = arith.mulf %244, %241 : vector<16x16xf32>
    %cst_96 = arith.constant 4.471500e-02 : f32
    %246 = vector.broadcast %cst_96 : f32 to vector<16x16xf32>
    %247 = arith.mulf %246, %245 : vector<16x16xf32>
    %248 = arith.addf %241, %247 : vector<16x16xf32>
    %cst_97 = arith.constant 0.797884583 : f32
    %249 = vector.broadcast %cst_97 : f32 to vector<16x16xf32>
    %250 = arith.mulf %249, %248 : vector<16x16xf32>
    %251 = math.tanh %250 : vector<16x16xf32>
    %cst_98 = arith.constant 1.000000e+00 : f32
    %252 = vector.broadcast %cst_98 : f32 to vector<16x16xf32>
    %253 = arith.addf %252, %251 : vector<16x16xf32>
    %254 = arith.mulf %243, %253 : vector<16x16xf32>
    %255 = arith.truncf %254 : vector<16x16xf32> to vector<16x16xbf16>
    %cst_99 = arith.constant dense<0.000000e+00> : vector<16x16xf32>
    %256 = tpu.matmul %8, %255, %cst_99 {dimension_numbers = #tpu.dot_dimension_numbers<[1], [0], [0], [1], [0, 0, 1, 1], [], []>} : vector<16x16xbf16>, vector<16x16xbf16>, vector<16x16xf32> -> vector<16x16xf32>
    %257 = vector.broadcast %9 : vector<16x1xf32> to vector<16x16xf32>
    %258 = arith.addf %256, %257 : vector<16x16xf32>
    %259 = arith.addf %258, %49 : vector<16x16xf32>
    %c3_i32 = arith.constant 3 : i32
    %cst_100 = arith.constant 5.000000e-01 : f32
    %260 = vector.broadcast %cst_100 : f32 to vector<16x16xf32>
    %261 = arith.mulf %260, %224 : vector<16x16xf32>
    %262 = arith.mulf %224, %224 : vector<16x16xf32>
    %263 = arith.mulf %262, %224 : vector<16x16xf32>
    %cst_101 = arith.constant 4.471500e-02 : f32
    %264 = vector.broadcast %cst_101 : f32 to vector<16x16xf32>
    %265 = arith.mulf %264, %263 : vector<16x16xf32>
    %266 = arith.addf %224, %265 : vector<16x16xf32>
    %cst_102 = arith.constant 0.797884583 : f32
    %267 = vector.broadcast %cst_102 : f32 to vector<16x16xf32>
    %268 = arith.mulf %267, %266 : vector<16x16xf32>
    %269 = math.tanh %268 : vector<16x16xf32>
    %cst_103 = arith.constant 1.000000e+00 : f32
    %270 = vector.broadcast %cst_103 : f32 to vector<16x16xf32>
    %271 = arith.addf %270, %269 : vector<16x16xf32>
    %272 = arith.mulf %261, %271 : vector<16x16xf32>
    %273 = arith.truncf %272 : vector<16x16xf32> to vector<16x16xbf16>
    %cst_104 = arith.constant dense<0.000000e+00> : vector<16x16xf32>
    %274 = tpu.matmul %6, %273, %cst_104 {dimension_numbers = #tpu.dot_dimension_numbers<[1], [0], [0], [1], [0, 0, 1, 1], [], []>} : vector<16x16xbf16>, vector<16x16xbf16>, vector<16x16xf32> -> vector<16x16xf32>
    %275 = vector.broadcast %7 : vector<16x1xf32> to vector<16x16xf32>
    %276 = arith.addf %274, %275 : vector<16x16xf32>
    %cst_105 = arith.constant 5.000000e-01 : f32
    %277 = vector.broadcast %cst_105 : f32 to vector<16x16xf32>
    %278 = arith.mulf %277, %276 : vector<16x16xf32>
    %279 = arith.mulf %276, %276 : vector<16x16xf32>
    %280 = arith.mulf %279, %276 : vector<16x16xf32>
    %cst_106 = arith.constant 4.471500e-02 : f32
    %281 = vector.broadcast %cst_106 : f32 to vector<16x16xf32>
    %282 = arith.mulf %281, %280 : vector<16x16xf32>
    %283 = arith.addf %276, %282 : vector<16x16xf32>
    %cst_107 = arith.constant 0.797884583 : f32
    %284 = vector.broadcast %cst_107 : f32 to vector<16x16xf32>
    %285 = arith.mulf %284, %283 : vector<16x16xf32>
    %286 = math.tanh %285 : vector<16x16xf32>
    %cst_108 = arith.constant 1.000000e+00 : f32
    %287 = vector.broadcast %cst_108 : f32 to vector<16x16xf32>
    %288 = arith.addf %287, %286 : vector<16x16xf32>
    %289 = arith.mulf %278, %288 : vector<16x16xf32>
    %290 = arith.truncf %289 : vector<16x16xf32> to vector<16x16xbf16>
    %cst_109 = arith.constant dense<0.000000e+00> : vector<16x16xf32>
    %291 = tpu.matmul %8, %290, %cst_109 {dimension_numbers = #tpu.dot_dimension_numbers<[1], [0], [0], [1], [0, 0, 1, 1], [], []>} : vector<16x16xbf16>, vector<16x16xbf16>, vector<16x16xf32> -> vector<16x16xf32>
    %292 = vector.broadcast %9 : vector<16x1xf32> to vector<16x16xf32>
    %293 = arith.addf %291, %292 : vector<16x16xf32>
    %294 = arith.addf %293, %44 : vector<16x16xf32>
    %cst_110 = arith.constant 5.000000e-01 : f32
    %295 = vector.broadcast %cst_110 : f32 to vector<16x16xf32>
    %296 = arith.mulf %295, %259 : vector<16x16xf32>
    %297 = arith.mulf %259, %259 : vector<16x16xf32>
    %298 = arith.mulf %297, %259 : vector<16x16xf32>
    %cst_111 = arith.constant 4.471500e-02 : f32
    %299 = vector.broadcast %cst_111 : f32 to vector<16x16xf32>
    %300 = arith.mulf %299, %298 : vector<16x16xf32>
    %301 = arith.addf %259, %300 : vector<16x16xf32>
    %cst_112 = arith.constant 0.797884583 : f32
    %302 = vector.broadcast %cst_112 : f32 to vector<16x16xf32>
    %303 = arith.mulf %302, %301 : vector<16x16xf32>
    %304 = math.tanh %303 : vector<16x16xf32>
    %cst_113 = arith.constant 1.000000e+00 : f32
    %305 = vector.broadcast %cst_113 : f32 to vector<16x16xf32>
    %306 = arith.addf %305, %304 : vector<16x16xf32>
    %307 = arith.mulf %296, %306 : vector<16x16xf32>
    %308 = arith.truncf %307 : vector<16x16xf32> to vector<16x16xbf16>
    %cst_114 = arith.constant dense<0.000000e+00> : vector<16x16xf32>
    %309 = tpu.matmul %6, %308, %cst_114 {dimension_numbers = #tpu.dot_dimension_numbers<[1], [0], [0], [1], [0, 0, 1, 1], [], []>} : vector<16x16xbf16>, vector<16x16xbf16>, vector<16x16xf32> -> vector<16x16xf32>
    %310 = vector.broadcast %7 : vector<16x1xf32> to vector<16x16xf32>
    %311 = arith.addf %309, %310 : vector<16x16xf32>
    %cst_115 = arith.constant 5.000000e-01 : f32
    %312 = vector.broadcast %cst_115 : f32 to vector<16x16xf32>
    %313 = arith.mulf %312, %311 : vector<16x16xf32>
    %314 = arith.mulf %311, %311 : vector<16x16xf32>
    %315 = arith.mulf %314, %311 : vector<16x16xf32>
    %cst_116 = arith.constant 4.471500e-02 : f32
    %316 = vector.broadcast %cst_116 : f32 to vector<16x16xf32>
    %317 = arith.mulf %316, %315 : vector<16x16xf32>
    %318 = arith.addf %311, %317 : vector<16x16xf32>
    %cst_117 = arith.constant 0.797884583 : f32
    %319 = vector.broadcast %cst_117 : f32 to vector<16x16xf32>
    %320 = arith.mulf %319, %318 : vector<16x16xf32>
    %321 = math.tanh %320 : vector<16x16xf32>
    %cst_118 = arith.constant 1.000000e+00 : f32
    %322 = vector.broadcast %cst_118 : f32 to vector<16x16xf32>
    %323 = arith.addf %322, %321 : vector<16x16xf32>
    %324 = arith.mulf %313, %323 : vector<16x16xf32>
    %325 = arith.truncf %324 : vector<16x16xf32> to vector<16x16xbf16>
    %cst_119 = arith.constant dense<0.000000e+00> : vector<16x16xf32>
    %326 = tpu.matmul %8, %325, %cst_119 {dimension_numbers = #tpu.dot_dimension_numbers<[1], [0], [0], [1], [0, 0, 1, 1], [], []>} : vector<16x16xbf16>, vector<16x16xbf16>, vector<16x16xf32> -> vector<16x16xf32>
    %327 = vector.broadcast %9 : vector<16x1xf32> to vector<16x16xf32>
    %328 = arith.addf %326, %327 : vector<16x16xf32>
    %329 = arith.addf %328, %49 : vector<16x16xf32>
    %cst_120 = arith.constant 5.000000e-01 : f32
    %330 = vector.broadcast %cst_120 : f32 to vector<16x16xf32>
    %331 = arith.mulf %330, %294 : vector<16x16xf32>
    %332 = arith.mulf %294, %294 : vector<16x16xf32>
    %333 = arith.mulf %332, %294 : vector<16x16xf32>
    %cst_121 = arith.constant 4.471500e-02 : f32
    %334 = vector.broadcast %cst_121 : f32 to vector<16x16xf32>
    %335 = arith.mulf %334, %333 : vector<16x16xf32>
    %336 = arith.addf %294, %335 : vector<16x16xf32>
    %cst_122 = arith.constant 0.797884583 : f32
    %337 = vector.broadcast %cst_122 : f32 to vector<16x16xf32>
    %338 = arith.mulf %337, %336 : vector<16x16xf32>
    %339 = math.tanh %338 : vector<16x16xf32>
    %cst_123 = arith.constant 1.000000e+00 : f32
    %340 = vector.broadcast %cst_123 : f32 to vector<16x16xf32>
    %341 = arith.addf %340, %339 : vector<16x16xf32>
    %342 = arith.mulf %331, %341 : vector<16x16xf32>
    %343 = arith.truncf %342 : vector<16x16xf32> to vector<16x16xbf16>
    %cst_124 = arith.constant dense<0.000000e+00> : vector<16x16xf32>
    %344 = tpu.matmul %10, %343, %cst_124 {dimension_numbers = #tpu.dot_dimension_numbers<[1], [0], [0], [1], [0, 0, 1, 1], [], []>} : vector<16x16xbf16>, vector<16x16xbf16>, vector<16x16xf32> -> vector<16x16xf32>
    %345 = vector.extract_strided_slice %17 {offsets = [0, 0], sizes = [16, 16], strides = [1, 1]} : vector<16x32xf32> to vector<16x16xf32>
    %346 = arith.addf %345, %344 : vector<16x16xf32>
    %347 = vector.broadcast %11 : vector<16x1xf32> to vector<16x16xf32>
    %348 = arith.addf %346, %347 : vector<16x16xf32>
    %c0_125 = arith.constant 0 : index
    %c0_126 = arith.constant 0 : index
    %c0_127 = arith.constant 0 : index
    %349 = vector.load %arg18[%c0_125, %c0_126, %c0_127] : memref<2x16x32xf32, #tpu.memory_space<vmem>>, vector<1x16x16xf32>
    %350 = vector.shape_cast %349 : vector<1x16x16xf32> to vector<16x16xf32>
    %351 = vector.shape_cast %348 : vector<16x16xf32> to vector<1x16x16xf32>
    tpu.vector_store %arg18[%c0_125, %c0_126, %c0_127], %351 {strides = array<i32>} : memref<2x16x32xf32, #tpu.memory_space<vmem>>, vector<1x16x16xf32>,
    %cst_128 = arith.constant 5.000000e-01 : f32
    %352 = vector.broadcast %cst_128 : f32 to vector<16x16xf32>
    %353 = arith.mulf %352, %329 : vector<16x16xf32>
    %354 = arith.mulf %329, %329 : vector<16x16xf32>
    %355 = arith.mulf %354, %329 : vector<16x16xf32>
    %cst_129 = arith.constant 4.471500e-02 : f32
    %356 = vector.broadcast %cst_129 : f32 to vector<16x16xf32>
    %357 = arith.mulf %356, %355 : vector<16x16xf32>
    %358 = arith.addf %329, %357 : vector<16x16xf32>
    %cst_130 = arith.constant 0.797884583 : f32
    %359 = vector.broadcast %cst_130 : f32 to vector<16x16xf32>
    %360 = arith.mulf %359, %358 : vector<16x16xf32>
    %361 = math.tanh %360 : vector<16x16xf32>
    %cst_131 = arith.constant 1.000000e+00 : f32
    %362 = vector.broadcast %cst_131 : f32 to vector<16x16xf32>
    %363 = arith.addf %362, %361 : vector<16x16xf32>
    %364 = arith.mulf %353, %363 : vector<16x16xf32>
    %365 = arith.truncf %364 : vector<16x16xf32> to vector<16x16xbf16>
    %cst_132 = arith.constant dense<0.000000e+00> : vector<16x16xf32>
    %366 = tpu.matmul %10, %365, %cst_132 {dimension_numbers = #tpu.dot_dimension_numbers<[1], [0], [0], [1], [0, 0, 1, 1], [], []>} : vector<16x16xbf16>, vector<16x16xbf16>, vector<16x16xf32> -> vector<16x16xf32>
    %367 = vector.extract_strided_slice %17 {offsets = [0, 16], sizes = [16, 16], strides = [1, 1]} : vector<16x32xf32> to vector<16x16xf32>
    %368 = arith.addf %367, %366 : vector<16x16xf32>
    %369 = vector.broadcast %11 : vector<16x1xf32> to vector<16x16xf32>
    %370 = arith.addf %368, %369 : vector<16x16xf32>
    %c0_133 = arith.constant 0 : index
    %c0_134 = arith.constant 0 : index
    %c16 = arith.constant 16 : index
    %371 = vector.load %arg18[%c0_133, %c0_134, %c16] : memref<2x16x32xf32, #tpu.memory_space<vmem>>, vector<1x16x16xf32>
    %372 = vector.shape_cast %371 : vector<1x16x16xf32> to vector<16x16xf32>
    %373 = vector.shape_cast %370 : vector<16x16xf32> to vector<1x16x16xf32>
    tpu.vector_store %arg18[%c0_133, %c0_134, %c16], %373 {strides = array<i32>} : memref<2x16x32xf32, #tpu.memory_space<vmem>>, vector<1x16x16xf32>,
    %c0_i32_135 = arith.constant 0 : i32
    %c2_i32_136 = arith.constant 2 : i32
    %374 = arith.addi %c0_i32_135, %c2_i32_136 : i32
    %c1_i32_137 = arith.constant 1 : i32
    scf.for %arg19 = %c0_i32_135 to %374 step %c1_i32_137  : i32 {
      %c1_i32_252 = arith.constant 1 : i32
      %734 = arith.muli %arg19, %c1_i32_252 : i32
      %c0_i32_253 = arith.constant 0 : i32
      %735 = arith.addi %c0_i32_253, %734 : i32
      %c8_i32 = arith.constant 8 : i32
      %736 = arith.muli %735, %c8_i32 : i32
      %737 = tpu.assume_multiple %736, 8 : i32
      %c0_254 = arith.constant 0 : index
      %738 = arith.index_cast %737 : i32 to index
      %c0_255 = arith.constant 0 : index
      %739 = vector.load %arg18[%c0_254, %738, %c0_255] : memref<2x16x32xf32, #tpu.memory_space<vmem>>, vector<1x8x32xf32>
      %740 = vector.shape_cast %739 : vector<1x8x32xf32> to vector<8x32xf32>
      %cst_256 = arith.constant dense<0.000000e+00> : vector<8xf32>
      %741 = vector.multi_reduction <add>, %740, %cst_256 [1] : vector<8x32xf32> to vector<8xf32>
      %742 = vector.shape_cast %741 : vector<8xf32> to vector<8x1xf32>
      %cst_257 = arith.constant 3.200000e+01 : f32
      %743 = vector.broadcast %cst_257 : f32 to vector<8x1xf32>
      %744 = arith.divf %742, %743 : vector<8x1xf32>
      %745 = vector.broadcast %744 : vector<8x1xf32> to vector<8x32xf32>
      %746 = arith.subf %740, %745 : vector<8x32xf32>
      %747 = arith.mulf %746, %746 : vector<8x32xf32>
      %cst_258 = arith.constant dense<0.000000e+00> : vector<8xf32>
      %748 = vector.multi_reduction <add>, %747, %cst_258 [1] : vector<8x32xf32> to vector<8xf32>
      %749 = vector.shape_cast %748 : vector<8xf32> to vector<8x1xf32>
      %cst_259 = arith.constant 3.200000e+01 : f32
      %750 = vector.broadcast %cst_259 : f32 to vector<8x1xf32>
      %751 = arith.divf %749, %750 : vector<8x1xf32>
      %752 = vector.broadcast %744 : vector<8x1xf32> to vector<8x32xf32>
      %753 = arith.subf %740, %752 : vector<8x32xf32>
      %cst_260 = arith.constant 9.99999997E-7 : f32
      %754 = vector.broadcast %cst_260 : f32 to vector<8x1xf32>
      %755 = arith.addf %751, %754 : vector<8x1xf32>
      %756 = math.rsqrt %755 : vector<8x1xf32>
      %757 = vector.broadcast %756 : vector<8x1xf32> to vector<8x32xf32>
      %758 = arith.mulf %753, %757 : vector<8x32xf32>
      %759 = vector.broadcast %2 : vector<1x32xf32> to vector<8x32xf32>
      %760 = arith.mulf %758, %759 : vector<8x32xf32>
      %761 = vector.broadcast %3 : vector<1x32xf32> to vector<8x32xf32>
      %762 = arith.addf %760, %761 : vector<8x32xf32>
      %763 = arith.truncf %762 : vector<8x32xf32> to vector<8x32xbf16>
      %cst_261 = arith.constant dense<0.000000e+00> : vector<8x128xf32>
      %764 = tpu.matmul %763, %12, %cst_261 {dimension_numbers = #tpu.dot_dimension_numbers<[1], [0], [0], [1], [0, 0, 1, 1], [], []>} : vector<8x32xbf16>, vector<32x128xbf16>, vector<8x128xf32> -> vector<8x128xf32>
      %765 = vector.broadcast %13 : vector<1x128xf32> to vector<8x128xf32>
      %766 = arith.addf %764, %765 : vector<8x128xf32>
      %cst_262 = arith.constant 5.000000e-01 : f32
      %767 = vector.broadcast %cst_262 : f32 to vector<8x128xf32>
      %768 = arith.mulf %767, %766 : vector<8x128xf32>
      %769 = arith.mulf %766, %766 : vector<8x128xf32>
      %770 = arith.mulf %769, %766 : vector<8x128xf32>
      %cst_263 = arith.constant 4.471500e-02 : f32
      %771 = vector.broadcast %cst_263 : f32 to vector<8x128xf32>
      %772 = arith.mulf %771, %770 : vector<8x128xf32>
      %773 = arith.addf %766, %772 : vector<8x128xf32>
      %cst_264 = arith.constant 0.797884583 : f32
      %774 = vector.broadcast %cst_264 : f32 to vector<8x128xf32>
      %775 = arith.mulf %774, %773 : vector<8x128xf32>
      %776 = math.tanh %775 : vector<8x128xf32>
      %cst_265 = arith.constant 1.000000e+00 : f32
      %777 = vector.broadcast %cst_265 : f32 to vector<8x128xf32>
      %778 = arith.addf %777, %776 : vector<8x128xf32>
      %779 = arith.mulf %768, %778 : vector<8x128xf32>
      %780 = arith.truncf %779 : vector<8x128xf32> to vector<8x128xbf16>
      %cst_266 = arith.constant dense<0.000000e+00> : vector<8x32xf32>
      %781 = tpu.matmul %780, %14, %cst_266 {dimension_numbers = #tpu.dot_dimension_numbers<[1], [0], [0], [1], [0, 0, 1, 1], [], []>} : vector<8x128xbf16>, vector<128x32xbf16>, vector<8x32xf32> -> vector<8x32xf32>
      %782 = vector.broadcast %15 : vector<1x32xf32> to vector<8x32xf32>
      %783 = arith.addf %781, %782 : vector<8x32xf32>
      %784 = arith.addf %740, %783 : vector<8x32xf32>
      %c0_267 = arith.constant 0 : index
      %785 = arith.index_cast %737 : i32 to index
      %c0_268 = arith.constant 0 : index
      %786 = vector.load %arg18[%c0_267, %785, %c0_268] : memref<2x16x32xf32, #tpu.memory_space<vmem>>, vector<1x8x32xf32>
      %787 = vector.shape_cast %786 : vector<1x8x32xf32> to vector<8x32xf32>
      %788 = vector.shape_cast %784 : vector<8x32xf32> to vector<1x8x32xf32>
      tpu.vector_store %arg18[%c0_267, %785, %c0_268], %788 {strides = array<i32>} : memref<2x16x32xf32, #tpu.memory_space<vmem>>, vector<1x8x32xf32>,
    }
    %c2_i32_138 = arith.constant 2 : i32
    %c1 = arith.constant 1 : index
    %c0_139 = arith.constant 0 : index
    %c0_140 = arith.constant 0 : index
    %375 = vector.load %arg1[%c1, %c0_139, %c0_140] : memref<2x16x32xf32, #tpu.memory_space<vmem>>, vector<1x16x32xf32>
    %376 = vector.shape_cast %375 : vector<1x16x32xf32> to vector<16x32xf32>
    %cst_141 = arith.constant dense<0.000000e+00> : vector<16xf32>
    %377 = vector.multi_reduction <add>, %376, %cst_141 [1] : vector<16x32xf32> to vector<16xf32>
    %378 = vector.shape_cast %377 : vector<16xf32> to vector<16x1xf32>
    %cst_142 = arith.constant 3.200000e+01 : f32
    %379 = vector.broadcast %cst_142 : f32 to vector<16x1xf32>
    %380 = arith.divf %378, %379 : vector<16x1xf32>
    %381 = vector.broadcast %380 : vector<16x1xf32> to vector<16x32xf32>
    %382 = arith.subf %376, %381 : vector<16x32xf32>
    %383 = arith.mulf %382, %382 : vector<16x32xf32>
    %cst_143 = arith.constant dense<0.000000e+00> : vector<16xf32>
    %384 = vector.multi_reduction <add>, %383, %cst_143 [1] : vector<16x32xf32> to vector<16xf32>
    %385 = vector.shape_cast %384 : vector<16xf32> to vector<16x1xf32>
    %cst_144 = arith.constant 3.200000e+01 : f32
    %386 = vector.broadcast %cst_144 : f32 to vector<16x1xf32>
    %387 = arith.divf %385, %386 : vector<16x1xf32>
    %388 = vector.broadcast %380 : vector<16x1xf32> to vector<16x32xf32>
    %389 = arith.subf %376, %388 : vector<16x32xf32>
    %cst_145 = arith.constant 9.99999997E-7 : f32
    %390 = vector.broadcast %cst_145 : f32 to vector<16x1xf32>
    %391 = arith.addf %387, %390 : vector<16x1xf32>
    %392 = math.rsqrt %391 : vector<16x1xf32>
    %393 = vector.broadcast %392 : vector<16x1xf32> to vector<16x32xf32>
    %394 = arith.mulf %389, %393 : vector<16x32xf32>
    %395 = vector.broadcast %0 : vector<1x32xf32> to vector<16x32xf32>
    %396 = arith.mulf %394, %395 : vector<16x32xf32>
    %397 = vector.broadcast %1 : vector<1x32xf32> to vector<16x32xf32>
    %398 = arith.addf %396, %397 : vector<16x32xf32>
    %399 = vector.extract_strided_slice %398 {offsets = [0, 0], sizes = [16, 16], strides = [1, 1]} : vector<16x32xf32> to vector<16x16xf32>
    %400 = arith.truncf %399 : vector<16x16xf32> to vector<16x16xbf16>
    %cst_146 = arith.constant dense<0.000000e+00> : vector<16x16xf32>
    %401 = tpu.matmul %4, %400, %cst_146 {dimension_numbers = #tpu.dot_dimension_numbers<[1], [0], [0], [1], [0, 0, 1, 1], [], []>} : vector<16x16xbf16>, vector<16x16xbf16>, vector<16x16xf32> -> vector<16x16xf32>
    %402 = vector.broadcast %5 : vector<16x1xf32> to vector<16x16xf32>
    %403 = arith.addf %401, %402 : vector<16x16xf32>
    %404 = vector.extract_strided_slice %398 {offsets = [0, 16], sizes = [16, 16], strides = [1, 1]} : vector<16x32xf32> to vector<16x16xf32>
    %405 = arith.truncf %404 : vector<16x16xf32> to vector<16x16xbf16>
    %cst_147 = arith.constant dense<0.000000e+00> : vector<16x16xf32>
    %406 = tpu.matmul %4, %405, %cst_147 {dimension_numbers = #tpu.dot_dimension_numbers<[1], [0], [0], [1], [0, 0, 1, 1], [], []>} : vector<16x16xbf16>, vector<16x16xbf16>, vector<16x16xf32> -> vector<16x16xf32>
    %407 = vector.broadcast %5 : vector<16x1xf32> to vector<16x16xf32>
    %408 = arith.addf %406, %407 : vector<16x16xf32>
    %c0_i32_148 = arith.constant 0 : i32
    %cst_149 = arith.constant 5.000000e-01 : f32
    %409 = vector.broadcast %cst_149 : f32 to vector<16x16xf32>
    %410 = arith.mulf %409, %403 : vector<16x16xf32>
    %411 = arith.mulf %403, %403 : vector<16x16xf32>
    %412 = arith.mulf %411, %403 : vector<16x16xf32>
    %cst_150 = arith.constant 4.471500e-02 : f32
    %413 = vector.broadcast %cst_150 : f32 to vector<16x16xf32>
    %414 = arith.mulf %413, %412 : vector<16x16xf32>
    %415 = arith.addf %403, %414 : vector<16x16xf32>
    %cst_151 = arith.constant 0.797884583 : f32
    %416 = vector.broadcast %cst_151 : f32 to vector<16x16xf32>
    %417 = arith.mulf %416, %415 : vector<16x16xf32>
    %418 = math.tanh %417 : vector<16x16xf32>
    %cst_152 = arith.constant 1.000000e+00 : f32
    %419 = vector.broadcast %cst_152 : f32 to vector<16x16xf32>
    %420 = arith.addf %419, %418 : vector<16x16xf32>
    %421 = arith.mulf %410, %420 : vector<16x16xf32>
    %422 = arith.truncf %421 : vector<16x16xf32> to vector<16x16xbf16>
    %cst_153 = arith.constant dense<0.000000e+00> : vector<16x16xf32>
    %423 = tpu.matmul %6, %422, %cst_153 {dimension_numbers = #tpu.dot_dimension_numbers<[1], [0], [0], [1], [0, 0, 1, 1], [], []>} : vector<16x16xbf16>, vector<16x16xbf16>, vector<16x16xf32> -> vector<16x16xf32>
    %424 = vector.broadcast %7 : vector<16x1xf32> to vector<16x16xf32>
    %425 = arith.addf %423, %424 : vector<16x16xf32>
    %cst_154 = arith.constant 5.000000e-01 : f32
    %426 = vector.broadcast %cst_154 : f32 to vector<16x16xf32>
    %427 = arith.mulf %426, %425 : vector<16x16xf32>
    %428 = arith.mulf %425, %425 : vector<16x16xf32>
    %429 = arith.mulf %428, %425 : vector<16x16xf32>
    %cst_155 = arith.constant 4.471500e-02 : f32
    %430 = vector.broadcast %cst_155 : f32 to vector<16x16xf32>
    %431 = arith.mulf %430, %429 : vector<16x16xf32>
    %432 = arith.addf %425, %431 : vector<16x16xf32>
    %cst_156 = arith.constant 0.797884583 : f32
    %433 = vector.broadcast %cst_156 : f32 to vector<16x16xf32>
    %434 = arith.mulf %433, %432 : vector<16x16xf32>
    %435 = math.tanh %434 : vector<16x16xf32>
    %cst_157 = arith.constant 1.000000e+00 : f32
    %436 = vector.broadcast %cst_157 : f32 to vector<16x16xf32>
    %437 = arith.addf %436, %435 : vector<16x16xf32>
    %438 = arith.mulf %427, %437 : vector<16x16xf32>
    %439 = arith.truncf %438 : vector<16x16xf32> to vector<16x16xbf16>
    %cst_158 = arith.constant dense<0.000000e+00> : vector<16x16xf32>
    %440 = tpu.matmul %8, %439, %cst_158 {dimension_numbers = #tpu.dot_dimension_numbers<[1], [0], [0], [1], [0, 0, 1, 1], [], []>} : vector<16x16xbf16>, vector<16x16xbf16>, vector<16x16xf32> -> vector<16x16xf32>
    %441 = vector.broadcast %9 : vector<16x1xf32> to vector<16x16xf32>
    %442 = arith.addf %440, %441 : vector<16x16xf32>
    %443 = arith.addf %442, %403 : vector<16x16xf32>
    %cst_159 = arith.constant 5.000000e-01 : f32
    %444 = vector.broadcast %cst_159 : f32 to vector<16x16xf32>
    %445 = arith.mulf %444, %408 : vector<16x16xf32>
    %446 = arith.mulf %408, %408 : vector<16x16xf32>
    %447 = arith.mulf %446, %408 : vector<16x16xf32>
    %cst_160 = arith.constant 4.471500e-02 : f32
    %448 = vector.broadcast %cst_160 : f32 to vector<16x16xf32>
    %449 = arith.mulf %448, %447 : vector<16x16xf32>
    %450 = arith.addf %408, %449 : vector<16x16xf32>
    %cst_161 = arith.constant 0.797884583 : f32
    %451 = vector.broadcast %cst_161 : f32 to vector<16x16xf32>
    %452 = arith.mulf %451, %450 : vector<16x16xf32>
    %453 = math.tanh %452 : vector<16x16xf32>
    %cst_162 = arith.constant 1.000000e+00 : f32
    %454 = vector.broadcast %cst_162 : f32 to vector<16x16xf32>
    %455 = arith.addf %454, %453 : vector<16x16xf32>
    %456 = arith.mulf %445, %455 : vector<16x16xf32>
    %457 = arith.truncf %456 : vector<16x16xf32> to vector<16x16xbf16>
    %cst_163 = arith.constant dense<0.000000e+00> : vector<16x16xf32>
    %458 = tpu.matmul %6, %457, %cst_163 {dimension_numbers = #tpu.dot_dimension_numbers<[1], [0], [0], [1], [0, 0, 1, 1], [], []>} : vector<16x16xbf16>, vector<16x16xbf16>, vector<16x16xf32> -> vector<16x16xf32>
    %459 = vector.broadcast %7 : vector<16x1xf32> to vector<16x16xf32>
    %460 = arith.addf %458, %459 : vector<16x16xf32>
    %cst_164 = arith.constant 5.000000e-01 : f32
    %461 = vector.broadcast %cst_164 : f32 to vector<16x16xf32>
    %462 = arith.mulf %461, %460 : vector<16x16xf32>
    %463 = arith.mulf %460, %460 : vector<16x16xf32>
    %464 = arith.mulf %463, %460 : vector<16x16xf32>
    %cst_165 = arith.constant 4.471500e-02 : f32
    %465 = vector.broadcast %cst_165 : f32 to vector<16x16xf32>
    %466 = arith.mulf %465, %464 : vector<16x16xf32>
    %467 = arith.addf %460, %466 : vector<16x16xf32>
    %cst_166 = arith.constant 0.797884583 : f32
    %468 = vector.broadcast %cst_166 : f32 to vector<16x16xf32>
    %469 = arith.mulf %468, %467 : vector<16x16xf32>
    %470 = math.tanh %469 : vector<16x16xf32>
    %cst_167 = arith.constant 1.000000e+00 : f32
    %471 = vector.broadcast %cst_167 : f32 to vector<16x16xf32>
    %472 = arith.addf %471, %470 : vector<16x16xf32>
    %473 = arith.mulf %462, %472 : vector<16x16xf32>
    %474 = arith.truncf %473 : vector<16x16xf32> to vector<16x16xbf16>
    %cst_168 = arith.constant dense<0.000000e+00> : vector<16x16xf32>
    %475 = tpu.matmul %8, %474, %cst_168 {dimension_numbers = #tpu.dot_dimension_numbers<[1], [0], [0], [1], [0, 0, 1, 1], [], []>} : vector<16x16xbf16>, vector<16x16xbf16>, vector<16x16xf32> -> vector<16x16xf32>
    %476 = vector.broadcast %9 : vector<16x1xf32> to vector<16x16xf32>
    %477 = arith.addf %475, %476 : vector<16x16xf32>
    %478 = arith.addf %477, %408 : vector<16x16xf32>
    %c1_i32_169 = arith.constant 1 : i32
    %cst_170 = arith.constant 5.000000e-01 : f32
    %479 = vector.broadcast %cst_170 : f32 to vector<16x16xf32>
    %480 = arith.mulf %479, %443 : vector<16x16xf32>
    %481 = arith.mulf %443, %443 : vector<16x16xf32>
    %482 = arith.mulf %481, %443 : vector<16x16xf32>
    %cst_171 = arith.constant 4.471500e-02 : f32
    %483 = vector.broadcast %cst_171 : f32 to vector<16x16xf32>
    %484 = arith.mulf %483, %482 : vector<16x16xf32>
    %485 = arith.addf %443, %484 : vector<16x16xf32>
    %cst_172 = arith.constant 0.797884583 : f32
    %486 = vector.broadcast %cst_172 : f32 to vector<16x16xf32>
    %487 = arith.mulf %486, %485 : vector<16x16xf32>
    %488 = math.tanh %487 : vector<16x16xf32>
    %cst_173 = arith.constant 1.000000e+00 : f32
    %489 = vector.broadcast %cst_173 : f32 to vector<16x16xf32>
    %490 = arith.addf %489, %488 : vector<16x16xf32>
    %491 = arith.mulf %480, %490 : vector<16x16xf32>
    %492 = arith.truncf %491 : vector<16x16xf32> to vector<16x16xbf16>
    %cst_174 = arith.constant dense<0.000000e+00> : vector<16x16xf32>
    %493 = tpu.matmul %6, %492, %cst_174 {dimension_numbers = #tpu.dot_dimension_numbers<[1], [0], [0], [1], [0, 0, 1, 1], [], []>} : vector<16x16xbf16>, vector<16x16xbf16>, vector<16x16xf32> -> vector<16x16xf32>
    %494 = vector.broadcast %7 : vector<16x1xf32> to vector<16x16xf32>
    %495 = arith.addf %493, %494 : vector<16x16xf32>
    %cst_175 = arith.constant 5.000000e-01 : f32
    %496 = vector.broadcast %cst_175 : f32 to vector<16x16xf32>
    %497 = arith.mulf %496, %495 : vector<16x16xf32>
    %498 = arith.mulf %495, %495 : vector<16x16xf32>
    %499 = arith.mulf %498, %495 : vector<16x16xf32>
    %cst_176 = arith.constant 4.471500e-02 : f32
    %500 = vector.broadcast %cst_176 : f32 to vector<16x16xf32>
    %501 = arith.mulf %500, %499 : vector<16x16xf32>
    %502 = arith.addf %495, %501 : vector<16x16xf32>
    %cst_177 = arith.constant 0.797884583 : f32
    %503 = vector.broadcast %cst_177 : f32 to vector<16x16xf32>
    %504 = arith.mulf %503, %502 : vector<16x16xf32>
    %505 = math.tanh %504 : vector<16x16xf32>
    %cst_178 = arith.constant 1.000000e+00 : f32
    %506 = vector.broadcast %cst_178 : f32 to vector<16x16xf32>
    %507 = arith.addf %506, %505 : vector<16x16xf32>
    %508 = arith.mulf %497, %507 : vector<16x16xf32>
    %509 = arith.truncf %508 : vector<16x16xf32> to vector<16x16xbf16>
    %cst_179 = arith.constant dense<0.000000e+00> : vector<16x16xf32>
    %510 = tpu.matmul %8, %509, %cst_179 {dimension_numbers = #tpu.dot_dimension_numbers<[1], [0], [0], [1], [0, 0, 1, 1], [], []>} : vector<16x16xbf16>, vector<16x16xbf16>, vector<16x16xf32> -> vector<16x16xf32>
    %511 = vector.broadcast %9 : vector<16x1xf32> to vector<16x16xf32>
    %512 = arith.addf %510, %511 : vector<16x16xf32>
    %513 = arith.addf %512, %403 : vector<16x16xf32>
    %cst_180 = arith.constant 5.000000e-01 : f32
    %514 = vector.broadcast %cst_180 : f32 to vector<16x16xf32>
    %515 = arith.mulf %514, %478 : vector<16x16xf32>
    %516 = arith.mulf %478, %478 : vector<16x16xf32>
    %517 = arith.mulf %516, %478 : vector<16x16xf32>
    %cst_181 = arith.constant 4.471500e-02 : f32
    %518 = vector.broadcast %cst_181 : f32 to vector<16x16xf32>
    %519 = arith.mulf %518, %517 : vector<16x16xf32>
    %520 = arith.addf %478, %519 : vector<16x16xf32>
    %cst_182 = arith.constant 0.797884583 : f32
    %521 = vector.broadcast %cst_182 : f32 to vector<16x16xf32>
    %522 = arith.mulf %521, %520 : vector<16x16xf32>
    %523 = math.tanh %522 : vector<16x16xf32>
    %cst_183 = arith.constant 1.000000e+00 : f32
    %524 = vector.broadcast %cst_183 : f32 to vector<16x16xf32>
    %525 = arith.addf %524, %523 : vector<16x16xf32>
    %526 = arith.mulf %515, %525 : vector<16x16xf32>
    %527 = arith.truncf %526 : vector<16x16xf32> to vector<16x16xbf16>
    %cst_184 = arith.constant dense<0.000000e+00> : vector<16x16xf32>
    %528 = tpu.matmul %6, %527, %cst_184 {dimension_numbers = #tpu.dot_dimension_numbers<[1], [0], [0], [1], [0, 0, 1, 1], [], []>} : vector<16x16xbf16>, vector<16x16xbf16>, vector<16x16xf32> -> vector<16x16xf32>
    %529 = vector.broadcast %7 : vector<16x1xf32> to vector<16x16xf32>
    %530 = arith.addf %528, %529 : vector<16x16xf32>
    %cst_185 = arith.constant 5.000000e-01 : f32
    %531 = vector.broadcast %cst_185 : f32 to vector<16x16xf32>
    %532 = arith.mulf %531, %530 : vector<16x16xf32>
    %533 = arith.mulf %530, %530 : vector<16x16xf32>
    %534 = arith.mulf %533, %530 : vector<16x16xf32>
    %cst_186 = arith.constant 4.471500e-02 : f32
    %535 = vector.broadcast %cst_186 : f32 to vector<16x16xf32>
    %536 = arith.mulf %535, %534 : vector<16x16xf32>
    %537 = arith.addf %530, %536 : vector<16x16xf32>
    %cst_187 = arith.constant 0.797884583 : f32
    %538 = vector.broadcast %cst_187 : f32 to vector<16x16xf32>
    %539 = arith.mulf %538, %537 : vector<16x16xf32>
    %540 = math.tanh %539 : vector<16x16xf32>
    %cst_188 = arith.constant 1.000000e+00 : f32
    %541 = vector.broadcast %cst_188 : f32 to vector<16x16xf32>
    %542 = arith.addf %541, %540 : vector<16x16xf32>
    %543 = arith.mulf %532, %542 : vector<16x16xf32>
    %544 = arith.truncf %543 : vector<16x16xf32> to vector<16x16xbf16>
    %cst_189 = arith.constant dense<0.000000e+00> : vector<16x16xf32>
    %545 = tpu.matmul %8, %544, %cst_189 {dimension_numbers = #tpu.dot_dimension_numbers<[1], [0], [0], [1], [0, 0, 1, 1], [], []>} : vector<16x16xbf16>, vector<16x16xbf16>, vector<16x16xf32> -> vector<16x16xf32>
    %546 = vector.broadcast %9 : vector<16x1xf32> to vector<16x16xf32>
    %547 = arith.addf %545, %546 : vector<16x16xf32>
    %548 = arith.addf %547, %408 : vector<16x16xf32>
    %c2_i32_190 = arith.constant 2 : i32
    %cst_191 = arith.constant 5.000000e-01 : f32
    %549 = vector.broadcast %cst_191 : f32 to vector<16x16xf32>
    %550 = arith.mulf %549, %513 : vector<16x16xf32>
    %551 = arith.mulf %513, %513 : vector<16x16xf32>
    %552 = arith.mulf %551, %513 : vector<16x16xf32>
    %cst_192 = arith.constant 4.471500e-02 : f32
    %553 = vector.broadcast %cst_192 : f32 to vector<16x16xf32>
    %554 = arith.mulf %553, %552 : vector<16x16xf32>
    %555 = arith.addf %513, %554 : vector<16x16xf32>
    %cst_193 = arith.constant 0.797884583 : f32
    %556 = vector.broadcast %cst_193 : f32 to vector<16x16xf32>
    %557 = arith.mulf %556, %555 : vector<16x16xf32>
    %558 = math.tanh %557 : vector<16x16xf32>
    %cst_194 = arith.constant 1.000000e+00 : f32
    %559 = vector.broadcast %cst_194 : f32 to vector<16x16xf32>
    %560 = arith.addf %559, %558 : vector<16x16xf32>
    %561 = arith.mulf %550, %560 : vector<16x16xf32>
    %562 = arith.truncf %561 : vector<16x16xf32> to vector<16x16xbf16>
    %cst_195 = arith.constant dense<0.000000e+00> : vector<16x16xf32>
    %563 = tpu.matmul %6, %562, %cst_195 {dimension_numbers = #tpu.dot_dimension_numbers<[1], [0], [0], [1], [0, 0, 1, 1], [], []>} : vector<16x16xbf16>, vector<16x16xbf16>, vector<16x16xf32> -> vector<16x16xf32>
    %564 = vector.broadcast %7 : vector<16x1xf32> to vector<16x16xf32>
    %565 = arith.addf %563, %564 : vector<16x16xf32>
    %cst_196 = arith.constant 5.000000e-01 : f32
    %566 = vector.broadcast %cst_196 : f32 to vector<16x16xf32>
    %567 = arith.mulf %566, %565 : vector<16x16xf32>
    %568 = arith.mulf %565, %565 : vector<16x16xf32>
    %569 = arith.mulf %568, %565 : vector<16x16xf32>
    %cst_197 = arith.constant 4.471500e-02 : f32
    %570 = vector.broadcast %cst_197 : f32 to vector<16x16xf32>
    %571 = arith.mulf %570, %569 : vector<16x16xf32>
    %572 = arith.addf %565, %571 : vector<16x16xf32>
    %cst_198 = arith.constant 0.797884583 : f32
    %573 = vector.broadcast %cst_198 : f32 to vector<16x16xf32>
    %574 = arith.mulf %573, %572 : vector<16x16xf32>
    %575 = math.tanh %574 : vector<16x16xf32>
    %cst_199 = arith.constant 1.000000e+00 : f32
    %576 = vector.broadcast %cst_199 : f32 to vector<16x16xf32>
    %577 = arith.addf %576, %575 : vector<16x16xf32>
    %578 = arith.mulf %567, %577 : vector<16x16xf32>
    %579 = arith.truncf %578 : vector<16x16xf32> to vector<16x16xbf16>
    %cst_200 = arith.constant dense<0.000000e+00> : vector<16x16xf32>
    %580 = tpu.matmul %8, %579, %cst_200 {dimension_numbers = #tpu.dot_dimension_numbers<[1], [0], [0], [1], [0, 0, 1, 1], [], []>} : vector<16x16xbf16>, vector<16x16xbf16>, vector<16x16xf32> -> vector<16x16xf32>
    %581 = vector.broadcast %9 : vector<16x1xf32> to vector<16x16xf32>
    %582 = arith.addf %580, %581 : vector<16x16xf32>
    %583 = arith.addf %582, %403 : vector<16x16xf32>
    %cst_201 = arith.constant 5.000000e-01 : f32
    %584 = vector.broadcast %cst_201 : f32 to vector<16x16xf32>
    %585 = arith.mulf %584, %548 : vector<16x16xf32>
    %586 = arith.mulf %548, %548 : vector<16x16xf32>
    %587 = arith.mulf %586, %548 : vector<16x16xf32>
    %cst_202 = arith.constant 4.471500e-02 : f32
    %588 = vector.broadcast %cst_202 : f32 to vector<16x16xf32>
    %589 = arith.mulf %588, %587 : vector<16x16xf32>
    %590 = arith.addf %548, %589 : vector<16x16xf32>
    %cst_203 = arith.constant 0.797884583 : f32
    %591 = vector.broadcast %cst_203 : f32 to vector<16x16xf32>
    %592 = arith.mulf %591, %590 : vector<16x16xf32>
    %593 = math.tanh %592 : vector<16x16xf32>
    %cst_204 = arith.constant 1.000000e+00 : f32
    %594 = vector.broadcast %cst_204 : f32 to vector<16x16xf32>
    %595 = arith.addf %594, %593 : vector<16x16xf32>
    %596 = arith.mulf %585, %595 : vector<16x16xf32>
    %597 = arith.truncf %596 : vector<16x16xf32> to vector<16x16xbf16>
    %cst_205 = arith.constant dense<0.000000e+00> : vector<16x16xf32>
    %598 = tpu.matmul %6, %597, %cst_205 {dimension_numbers = #tpu.dot_dimension_numbers<[1], [0], [0], [1], [0, 0, 1, 1], [], []>} : vector<16x16xbf16>, vector<16x16xbf16>, vector<16x16xf32> -> vector<16x16xf32>
    %599 = vector.broadcast %7 : vector<16x1xf32> to vector<16x16xf32>
    %600 = arith.addf %598, %599 : vector<16x16xf32>
    %cst_206 = arith.constant 5.000000e-01 : f32
    %601 = vector.broadcast %cst_206 : f32 to vector<16x16xf32>
    %602 = arith.mulf %601, %600 : vector<16x16xf32>
    %603 = arith.mulf %600, %600 : vector<16x16xf32>
    %604 = arith.mulf %603, %600 : vector<16x16xf32>
    %cst_207 = arith.constant 4.471500e-02 : f32
    %605 = vector.broadcast %cst_207 : f32 to vector<16x16xf32>
    %606 = arith.mulf %605, %604 : vector<16x16xf32>
    %607 = arith.addf %600, %606 : vector<16x16xf32>
    %cst_208 = arith.constant 0.797884583 : f32
    %608 = vector.broadcast %cst_208 : f32 to vector<16x16xf32>
    %609 = arith.mulf %608, %607 : vector<16x16xf32>
    %610 = math.tanh %609 : vector<16x16xf32>
    %cst_209 = arith.constant 1.000000e+00 : f32
    %611 = vector.broadcast %cst_209 : f32 to vector<16x16xf32>
    %612 = arith.addf %611, %610 : vector<16x16xf32>
    %613 = arith.mulf %602, %612 : vector<16x16xf32>
    %614 = arith.truncf %613 : vector<16x16xf32> to vector<16x16xbf16>
    %cst_210 = arith.constant dense<0.000000e+00> : vector<16x16xf32>
    %615 = tpu.matmul %8, %614, %cst_210 {dimension_numbers = #tpu.dot_dimension_numbers<[1], [0], [0], [1], [0, 0, 1, 1], [], []>} : vector<16x16xbf16>, vector<16x16xbf16>, vector<16x16xf32> -> vector<16x16xf32>
    %616 = vector.broadcast %9 : vector<16x1xf32> to vector<16x16xf32>
    %617 = arith.addf %615, %616 : vector<16x16xf32>
    %618 = arith.addf %617, %408 : vector<16x16xf32>
    %c3_i32_211 = arith.constant 3 : i32
    %cst_212 = arith.constant 5.000000e-01 : f32
    %619 = vector.broadcast %cst_212 : f32 to vector<16x16xf32>
    %620 = arith.mulf %619, %583 : vector<16x16xf32>
    %621 = arith.mulf %583, %583 : vector<16x16xf32>
    %622 = arith.mulf %621, %583 : vector<16x16xf32>
    %cst_213 = arith.constant 4.471500e-02 : f32
    %623 = vector.broadcast %cst_213 : f32 to vector<16x16xf32>
    %624 = arith.mulf %623, %622 : vector<16x16xf32>
    %625 = arith.addf %583, %624 : vector<16x16xf32>
    %cst_214 = arith.constant 0.797884583 : f32
    %626 = vector.broadcast %cst_214 : f32 to vector<16x16xf32>
    %627 = arith.mulf %626, %625 : vector<16x16xf32>
    %628 = math.tanh %627 : vector<16x16xf32>
    %cst_215 = arith.constant 1.000000e+00 : f32
    %629 = vector.broadcast %cst_215 : f32 to vector<16x16xf32>
    %630 = arith.addf %629, %628 : vector<16x16xf32>
    %631 = arith.mulf %620, %630 : vector<16x16xf32>
    %632 = arith.truncf %631 : vector<16x16xf32> to vector<16x16xbf16>
    %cst_216 = arith.constant dense<0.000000e+00> : vector<16x16xf32>
    %633 = tpu.matmul %6, %632, %cst_216 {dimension_numbers = #tpu.dot_dimension_numbers<[1], [0], [0], [1], [0, 0, 1, 1], [], []>} : vector<16x16xbf16>, vector<16x16xbf16>, vector<16x16xf32> -> vector<16x16xf32>
    %634 = vector.broadcast %7 : vector<16x1xf32> to vector<16x16xf32>
    %635 = arith.addf %633, %634 : vector<16x16xf32>
    %cst_217 = arith.constant 5.000000e-01 : f32
    %636 = vector.broadcast %cst_217 : f32 to vector<16x16xf32>
    %637 = arith.mulf %636, %635 : vector<16x16xf32>
    %638 = arith.mulf %635, %635 : vector<16x16xf32>
    %639 = arith.mulf %638, %635 : vector<16x16xf32>
    %cst_218 = arith.constant 4.471500e-02 : f32
    %640 = vector.broadcast %cst_218 : f32 to vector<16x16xf32>
    %641 = arith.mulf %640, %639 : vector<16x16xf32>
    %642 = arith.addf %635, %641 : vector<16x16xf32>
    %cst_219 = arith.constant 0.797884583 : f32
    %643 = vector.broadcast %cst_219 : f32 to vector<16x16xf32>
    %644 = arith.mulf %643, %642 : vector<16x16xf32>
    %645 = math.tanh %644 : vector<16x16xf32>
    %cst_220 = arith.constant 1.000000e+00 : f32
    %646 = vector.broadcast %cst_220 : f32 to vector<16x16xf32>
    %647 = arith.addf %646, %645 : vector<16x16xf32>
    %648 = arith.mulf %637, %647 : vector<16x16xf32>
    %649 = arith.truncf %648 : vector<16x16xf32> to vector<16x16xbf16>
    %cst_221 = arith.constant dense<0.000000e+00> : vector<16x16xf32>
    %650 = tpu.matmul %8, %649, %cst_221 {dimension_numbers = #tpu.dot_dimension_numbers<[1], [0], [0], [1], [0, 0, 1, 1], [], []>} : vector<16x16xbf16>, vector<16x16xbf16>, vector<16x16xf32> -> vector<16x16xf32>
    %651 = vector.broadcast %9 : vector<16x1xf32> to vector<16x16xf32>
    %652 = arith.addf %650, %651 : vector<16x16xf32>
    %653 = arith.addf %652, %403 : vector<16x16xf32>
    %cst_222 = arith.constant 5.000000e-01 : f32
    %654 = vector.broadcast %cst_222 : f32 to vector<16x16xf32>
    %655 = arith.mulf %654, %618 : vector<16x16xf32>
    %656 = arith.mulf %618, %618 : vector<16x16xf32>
    %657 = arith.mulf %656, %618 : vector<16x16xf32>
    %cst_223 = arith.constant 4.471500e-02 : f32
    %658 = vector.broadcast %cst_223 : f32 to vector<16x16xf32>
    %659 = arith.mulf %658, %657 : vector<16x16xf32>
    %660 = arith.addf %618, %659 : vector<16x16xf32>
    %cst_224 = arith.constant 0.797884583 : f32
    %661 = vector.broadcast %cst_224 : f32 to vector<16x16xf32>
    %662 = arith.mulf %661, %660 : vector<16x16xf32>
    %663 = math.tanh %662 : vector<16x16xf32>
    %cst_225 = arith.constant 1.000000e+00 : f32
    %664 = vector.broadcast %cst_225 : f32 to vector<16x16xf32>
    %665 = arith.addf %664, %663 : vector<16x16xf32>
    %666 = arith.mulf %655, %665 : vector<16x16xf32>
    %667 = arith.truncf %666 : vector<16x16xf32> to vector<16x16xbf16>
    %cst_226 = arith.constant dense<0.000000e+00> : vector<16x16xf32>
    %668 = tpu.matmul %6, %667, %cst_226 {dimension_numbers = #tpu.dot_dimension_numbers<[1], [0], [0], [1], [0, 0, 1, 1], [], []>} : vector<16x16xbf16>, vector<16x16xbf16>, vector<16x16xf32> -> vector<16x16xf32>
    %669 = vector.broadcast %7 : vector<16x1xf32> to vector<16x16xf32>
    %670 = arith.addf %668, %669 : vector<16x16xf32>
    %cst_227 = arith.constant 5.000000e-01 : f32
    %671 = vector.broadcast %cst_227 : f32 to vector<16x16xf32>
    %672 = arith.mulf %671, %670 : vector<16x16xf32>
    %673 = arith.mulf %670, %670 : vector<16x16xf32>
    %674 = arith.mulf %673, %670 : vector<16x16xf32>
    %cst_228 = arith.constant 4.471500e-02 : f32
    %675 = vector.broadcast %cst_228 : f32 to vector<16x16xf32>
    %676 = arith.mulf %675, %674 : vector<16x16xf32>
    %677 = arith.addf %670, %676 : vector<16x16xf32>
    %cst_229 = arith.constant 0.797884583 : f32
    %678 = vector.broadcast %cst_229 : f32 to vector<16x16xf32>
    %679 = arith.mulf %678, %677 : vector<16x16xf32>
    %680 = math.tanh %679 : vector<16x16xf32>
    %cst_230 = arith.constant 1.000000e+00 : f32
    %681 = vector.broadcast %cst_230 : f32 to vector<16x16xf32>
    %682 = arith.addf %681, %680 : vector<16x16xf32>
    %683 = arith.mulf %672, %682 : vector<16x16xf32>
    %684 = arith.truncf %683 : vector<16x16xf32> to vector<16x16xbf16>
    %cst_231 = arith.constant dense<0.000000e+00> : vector<16x16xf32>
    %685 = tpu.matmul %8, %684, %cst_231 {dimension_numbers = #tpu.dot_dimension_numbers<[1], [0], [0], [1], [0, 0, 1, 1], [], []>} : vector<16x16xbf16>, vector<16x16xbf16>, vector<16x16xf32> -> vector<16x16xf32>
    %686 = vector.broadcast %9 : vector<16x1xf32> to vector<16x16xf32>
    %687 = arith.addf %685, %686 : vector<16x16xf32>
    %688 = arith.addf %687, %408 : vector<16x16xf32>
    %cst_232 = arith.constant 5.000000e-01 : f32
    %689 = vector.broadcast %cst_232 : f32 to vector<16x16xf32>
    %690 = arith.mulf %689, %653 : vector<16x16xf32>
    %691 = arith.mulf %653, %653 : vector<16x16xf32>
    %692 = arith.mulf %691, %653 : vector<16x16xf32>
    %cst_233 = arith.constant 4.471500e-02 : f32
    %693 = vector.broadcast %cst_233 : f32 to vector<16x16xf32>
    %694 = arith.mulf %693, %692 : vector<16x16xf32>
    %695 = arith.addf %653, %694 : vector<16x16xf32>
    %cst_234 = arith.constant 0.797884583 : f32
    %696 = vector.broadcast %cst_234 : f32 to vector<16x16xf32>
    %697 = arith.mulf %696, %695 : vector<16x16xf32>
    %698 = math.tanh %697 : vector<16x16xf32>
    %cst_235 = arith.constant 1.000000e+00 : f32
    %699 = vector.broadcast %cst_235 : f32 to vector<16x16xf32>
    %700 = arith.addf %699, %698 : vector<16x16xf32>
    %701 = arith.mulf %690, %700 : vector<16x16xf32>
    %702 = arith.truncf %701 : vector<16x16xf32> to vector<16x16xbf16>
    %cst_236 = arith.constant dense<0.000000e+00> : vector<16x16xf32>
    %703 = tpu.matmul %10, %702, %cst_236 {dimension_numbers = #tpu.dot_dimension_numbers<[1], [0], [0], [1], [0, 0, 1, 1], [], []>} : vector<16x16xbf16>, vector<16x16xbf16>, vector<16x16xf32> -> vector<16x16xf32>
    %704 = vector.extract_strided_slice %376 {offsets = [0, 0], sizes = [16, 16], strides = [1, 1]} : vector<16x32xf32> to vector<16x16xf32>
    %705 = arith.addf %704, %703 : vector<16x16xf32>
    %706 = vector.broadcast %11 : vector<16x1xf32> to vector<16x16xf32>
    %707 = arith.addf %705, %706 : vector<16x16xf32>
    %c1_237 = arith.constant 1 : index
    %c0_238 = arith.constant 0 : index
    %c0_239 = arith.constant 0 : index
    %708 = vector.load %arg18[%c1_237, %c0_238, %c0_239] : memref<2x16x32xf32, #tpu.memory_space<vmem>>, vector<1x16x16xf32>
    %709 = vector.shape_cast %708 : vector<1x16x16xf32> to vector<16x16xf32>
    %710 = vector.shape_cast %707 : vector<16x16xf32> to vector<1x16x16xf32>
    tpu.vector_store %arg18[%c1_237, %c0_238, %c0_239], %710 {strides = array<i32>} : memref<2x16x32xf32, #tpu.memory_space<vmem>>, vector<1x16x16xf32>,
    %cst_240 = arith.constant 5.000000e-01 : f32
    %711 = vector.broadcast %cst_240 : f32 to vector<16x16xf32>
    %712 = arith.mulf %711, %688 : vector<16x16xf32>
    %713 = arith.mulf %688, %688 : vector<16x16xf32>
    %714 = arith.mulf %713, %688 : vector<16x16xf32>
    %cst_241 = arith.constant 4.471500e-02 : f32
    %715 = vector.broadcast %cst_241 : f32 to vector<16x16xf32>
    %716 = arith.mulf %715, %714 : vector<16x16xf32>
    %717 = arith.addf %688, %716 : vector<16x16xf32>
    %cst_242 = arith.constant 0.797884583 : f32
    %718 = vector.broadcast %cst_242 : f32 to vector<16x16xf32>
    %719 = arith.mulf %718, %717 : vector<16x16xf32>
    %720 = math.tanh %719 : vector<16x16xf32>
    %cst_243 = arith.constant 1.000000e+00 : f32
    %721 = vector.broadcast %cst_243 : f32 to vector<16x16xf32>
    %722 = arith.addf %721, %720 : vector<16x16xf32>
    %723 = arith.mulf %712, %722 : vector<16x16xf32>
    %724 = arith.truncf %723 : vector<16x16xf32> to vector<16x16xbf16>
    %cst_244 = arith.constant dense<0.000000e+00> : vector<16x16xf32>
    %725 = tpu.matmul %10, %724, %cst_244 {dimension_numbers = #tpu.dot_dimension_numbers<[1], [0], [0], [1], [0, 0, 1, 1], [], []>} : vector<16x16xbf16>, vector<16x16xbf16>, vector<16x16xf32> -> vector<16x16xf32>
    %726 = vector.extract_strided_slice %376 {offsets = [0, 16], sizes = [16, 16], strides = [1, 1]} : vector<16x32xf32> to vector<16x16xf32>
    %727 = arith.addf %726, %725 : vector<16x16xf32>
    %728 = vector.broadcast %11 : vector<16x1xf32> to vector<16x16xf32>
    %729 = arith.addf %727, %728 : vector<16x16xf32>
    %c1_245 = arith.constant 1 : index
    %c0_246 = arith.constant 0 : index
    %c16_247 = arith.constant 16 : index
    %730 = vector.load %arg18[%c1_245, %c0_246, %c16_247] : memref<2x16x32xf32, #tpu.memory_space<vmem>>, vector<1x16x16xf32>
    %731 = vector.shape_cast %730 : vector<1x16x16xf32> to vector<16x16xf32>
    %732 = vector.shape_cast %729 : vector<16x16xf32> to vector<1x16x16xf32>
    tpu.vector_store %arg18[%c1_245, %c0_246, %c16_247], %732 {strides = array<i32>} : memref<2x16x32xf32, #tpu.memory_space<vmem>>, vector<1x16x16xf32>,
    %c0_i32_248 = arith.constant 0 : i32
    %c2_i32_249 = arith.constant 2 : i32
    %733 = arith.addi %c0_i32_248, %c2_i32_249 : i32
    %c1_i32_250 = arith.constant 1 : i32
    scf.for %arg19 = %c0_i32_248 to %733 step %c1_i32_250  : i32 {
      %c1_i32_252 = arith.constant 1 : i32
      %734 = arith.muli %arg19, %c1_i32_252 : i32
      %c0_i32_253 = arith.constant 0 : i32
      %735 = arith.addi %c0_i32_253, %734 : i32
      %c8_i32 = arith.constant 8 : i32
      %736 = arith.muli %735, %c8_i32 : i32
      %737 = tpu.assume_multiple %736, 8 : i32
      %c1_254 = arith.constant 1 : index
      %738 = arith.index_cast %737 : i32 to index
      %c0_255 = arith.constant 0 : index
      %739 = vector.load %arg18[%c1_254, %738, %c0_255] : memref<2x16x32xf32, #tpu.memory_space<vmem>>, vector<1x8x32xf32>
      %740 = vector.shape_cast %739 : vector<1x8x32xf32> to vector<8x32xf32>
      %cst_256 = arith.constant dense<0.000000e+00> : vector<8xf32>
      %741 = vector.multi_reduction <add>, %740, %cst_256 [1] : vector<8x32xf32> to vector<8xf32>
      %742 = vector.shape_cast %741 : vector<8xf32> to vector<8x1xf32>
      %cst_257 = arith.constant 3.200000e+01 : f32
      %743 = vector.broadcast %cst_257 : f32 to vector<8x1xf32>
      %744 = arith.divf %742, %743 : vector<8x1xf32>
      %745 = vector.broadcast %744 : vector<8x1xf32> to vector<8x32xf32>
      %746 = arith.subf %740, %745 : vector<8x32xf32>
      %747 = arith.mulf %746, %746 : vector<8x32xf32>
      %cst_258 = arith.constant dense<0.000000e+00> : vector<8xf32>
      %748 = vector.multi_reduction <add>, %747, %cst_258 [1] : vector<8x32xf32> to vector<8xf32>
      %749 = vector.shape_cast %748 : vector<8xf32> to vector<8x1xf32>
      %cst_259 = arith.constant 3.200000e+01 : f32
      %750 = vector.broadcast %cst_259 : f32 to vector<8x1xf32>
      %751 = arith.divf %749, %750 : vector<8x1xf32>
      %752 = vector.broadcast %744 : vector<8x1xf32> to vector<8x32xf32>
      %753 = arith.subf %740, %752 : vector<8x32xf32>
      %cst_260 = arith.constant 9.99999997E-7 : f32
      %754 = vector.broadcast %cst_260 : f32 to vector<8x1xf32>
      %755 = arith.addf %751, %754 : vector<8x1xf32>
      %756 = math.rsqrt %755 : vector<8x1xf32>
      %757 = vector.broadcast %756 : vector<8x1xf32> to vector<8x32xf32>
      %758 = arith.mulf %753, %757 : vector<8x32xf32>
      %759 = vector.broadcast %2 : vector<1x32xf32> to vector<8x32xf32>
      %760 = arith.mulf %758, %759 : vector<8x32xf32>
      %761 = vector.broadcast %3 : vector<1x32xf32> to vector<8x32xf32>
      %762 = arith.addf %760, %761 : vector<8x32xf32>
      %763 = arith.truncf %762 : vector<8x32xf32> to vector<8x32xbf16>
      %cst_261 = arith.constant dense<0.000000e+00> : vector<8x128xf32>
      %764 = tpu.matmul %763, %12, %cst_261 {dimension_numbers = #tpu.dot_dimension_numbers<[1], [0], [0], [1], [0, 0, 1, 1], [], []>} : vector<8x32xbf16>, vector<32x128xbf16>, vector<8x128xf32> -> vector<8x128xf32>
      %765 = vector.broadcast %13 : vector<1x128xf32> to vector<8x128xf32>
      %766 = arith.addf %764, %765 : vector<8x128xf32>
      %cst_262 = arith.constant 5.000000e-01 : f32
      %767 = vector.broadcast %cst_262 : f32 to vector<8x128xf32>
      %768 = arith.mulf %767, %766 : vector<8x128xf32>
      %769 = arith.mulf %766, %766 : vector<8x128xf32>
      %770 = arith.mulf %769, %766 : vector<8x128xf32>
      %cst_263 = arith.constant 4.471500e-02 : f32
      %771 = vector.broadcast %cst_263 : f32 to vector<8x128xf32>
      %772 = arith.mulf %771, %770 : vector<8x128xf32>
      %773 = arith.addf %766, %772 : vector<8x128xf32>
      %cst_264 = arith.constant 0.797884583 : f32
      %774 = vector.broadcast %cst_264 : f32 to vector<8x128xf32>
      %775 = arith.mulf %774, %773 : vector<8x128xf32>
      %776 = math.tanh %775 : vector<8x128xf32>
      %cst_265 = arith.constant 1.000000e+00 : f32
      %777 = vector.broadcast %cst_265 : f32 to vector<8x128xf32>
      %778 = arith.addf %777, %776 : vector<8x128xf32>
      %779 = arith.mulf %768, %778 : vector<8x128xf32>
      %780 = arith.truncf %779 : vector<8x128xf32> to vector<8x128xbf16>
      %cst_266 = arith.constant dense<0.000000e+00> : vector<8x32xf32>
      %781 = tpu.matmul %780, %14, %cst_266 {dimension_numbers = #tpu.dot_dimension_numbers<[1], [0], [0], [1], [0, 0, 1, 1], [], []>} : vector<8x128xbf16>, vector<128x32xbf16>, vector<8x32xf32> -> vector<8x32xf32>
      %782 = vector.broadcast %15 : vector<1x32xf32> to vector<8x32xf32>
      %783 = arith.addf %781, %782 : vector<8x32xf32>
      %784 = arith.addf %740, %783 : vector<8x32xf32>
      %c1_267 = arith.constant 1 : index
      %785 = arith.index_cast %737 : i32 to index
      %c0_268 = arith.constant 0 : index
      %786 = vector.load %arg18[%c1_267, %785, %c0_268] : memref<2x16x32xf32, #tpu.memory_space<vmem>>, vector<1x8x32xf32>
      %787 = vector.shape_cast %786 : vector<1x8x32xf32> to vector<8x32xf32>
      %788 = vector.shape_cast %784 : vector<8x32xf32> to vector<1x8x32xf32>
      tpu.vector_store %arg18[%c1_267, %785, %c0_268], %788 {strides = array<i32>} : memref<2x16x32xf32, #tpu.memory_space<vmem>>, vector<1x8x32xf32>,
    }
    %c2_i32_251 = arith.constant 2 : i32
    return
  }
  func.func @transform_0(%arg0: i32) -> (i32, i32, i32) {
    %c0_i32 = arith.constant 0 : i32
    %c0_i32_0 = arith.constant 0 : i32
    %c0_i32_1 = arith.constant 0 : i32
    return %arg0, %c0_i32, %c0_i32_0 : i32, i32, i32
  }
  func.func @transform_1(%arg0: i32) -> (i32, i32) {
    %c0_i32 = arith.constant 0 : i32
    %c0_i32_0 = arith.constant 0 : i32
    %c0_i32_1 = arith.constant 0 : i32
    return %c0_i32, %c0_i32_0 : i32, i32
  }
  func.func @transform_2(%arg0: i32) -> (i32, i32) {
    %c0_i32 = arith.constant 0 : i32
    %c0_i32_0 = arith.constant 0 : i32
    %c0_i32_1 = arith.constant 0 : i32
    return %c0_i32, %c0_i32_0 : i32, i32
  }
  func.func @transform_3(%arg0: i32) -> (i32, i32) {
    %c0_i32 = arith.constant 0 : i32
    %c0_i32_0 = arith.constant 0 : i32
    %c0_i32_1 = arith.constant 0 : i32
    return %c0_i32, %c0_i32_0 : i32, i32
  }
  func.func @transform_4(%arg0: i32) -> (i32, i32) {
    %c0_i32 = arith.constant 0 : i32
    %c0_i32_0 = arith.constant 0 : i32
    %c0_i32_1 = arith.constant 0 : i32
    return %c0_i32, %c0_i32_0 : i32, i32
  }
  func.func @transform_5(%arg0: i32) -> (i32, i32) {
    %c0_i32 = arith.constant 0 : i32
    %c0_i32_0 = arith.constant 0 : i32
    %c0_i32_1 = arith.constant 0 : i32
    return %c0_i32, %c0_i32_0 : i32, i32
  }
  func.func @transform_6(%arg0: i32) -> (i32, i32) {
    %c0_i32 = arith.constant 0 : i32
    %c0_i32_0 = arith.constant 0 : i32
    %c0_i32_1 = arith.constant 0 : i32
    return %c0_i32, %c0_i32_0 : i32, i32
  }
  func.func @transform_7(%arg0: i32) -> (i32, i32) {
    %c0_i32 = arith.constant 0 : i32
    %c0_i32_0 = arith.constant 0 : i32
    %c0_i32_1 = arith.constant 0 : i32
    return %c0_i32, %c0_i32_0 : i32, i32
  }
  func.func @transform_8(%arg0: i32) -> (i32, i32) {
    %c0_i32 = arith.constant 0 : i32
    %c0_i32_0 = arith.constant 0 : i32
    %c0_i32_1 = arith.constant 0 : i32
    return %c0_i32, %c0_i32_0 : i32, i32
  }
  func.func @transform_9(%arg0: i32) -> (i32, i32) {
    %c0_i32 = arith.constant 0 : i32
    %c0_i32_0 = arith.constant 0 : i32
    %c0_i32_1 = arith.constant 0 : i32
    return %c0_i32, %c0_i32_0 : i32, i32
  }
  func.func @transform_10(%arg0: i32) -> (i32, i32) {
    %c0_i32 = arith.constant 0 : i32
    %c0_i32_0 = arith.constant 0 : i32
    %c0_i32_1 = arith.constant 0 : i32
    return %c0_i32, %c0_i32_0 : i32, i32
  }
  func.func @transform_11(%arg0: i32) -> (i32, i32) {
    %c0_i32 = arith.constant 0 : i32
    %c0_i32_0 = arith.constant 0 : i32
    %c0_i32_1 = arith.constant 0 : i32
    return %c0_i32, %c0_i32_0 : i32, i32
  }
  func.func @transform_12(%arg0: i32) -> (i32, i32) {
    %c0_i32 = arith.constant 0 : i32
    %c0_i32_0 = arith.constant 0 : i32
    %c0_i32_1 = arith.constant 0 : i32
    return %c0_i32, %c0_i32_0 : i32, i32
  }
  func.func @transform_13(%arg0: i32) -> (i32, i32) {
    %c0_i32 = arith.constant 0 : i32
    %c0_i32_0 = arith.constant 0 : i32
    %c0_i32_1 = arith.constant 0 : i32
    return %c0_i32, %c0_i32_0 : i32, i32
  }
  func.func @transform_14(%arg0: i32) -> (i32, i32) {
    %c0_i32 = arith.constant 0 : i32
    %c0_i32_0 = arith.constant 0 : i32
    %c0_i32_1 = arith.constant 0 : i32
    return %c0_i32, %c0_i32_0 : i32, i32
  }
  func.func @transform_15(%arg0: i32) -> (i32, i32) {
    %c0_i32 = arith.constant 0 : i32
    %c0_i32_0 = arith.constant 0 : i32
    %c0_i32_1 = arith.constant 0 : i32
    return %c0_i32, %c0_i32_0 : i32, i32
  }
  func.func @transform_16(%arg0: i32) -> (i32, i32) {
    %c0_i32 = arith.constant 0 : i32
    %c0_i32_0 = arith.constant 0 : i32
    %c0_i32_1 = arith.constant 0 : i32
    return %c0_i32, %c0_i32_0 : i32, i32
  }
  func.func @transform_17(%arg0: i32) -> (i32, i32, i32) {
    %c0_i32 = arith.constant 0 : i32
    %c0_i32_0 = arith.constant 0 : i32
    %c0_i32_1 = arith.constant 0 : i32
    return %arg0, %c0_i32, %c0_i32_0 : i32, i32, i32
  }
}

</mosaic_0001>

<bundles_post_ra>
// kernel: tpu_custom_call.1
= control target key start
LH: loop header
LB: loop body
LE: loop exit
PB: predicated region body
PF: predicated region fallthrough
CT: control target
= control target key end

     0   :  { %s5403_s0 = inlined_call_operand.vmem [shape: f32[4,16,32], index: 0, kind: input, shape index: {}]   ;;  %s5404_s1 = inlined_call_operand.vmem [shape: f32[1,32], index: 1, kind: input, shape index: {}]   ;;  %s5405_s2 = inlined_call_operand.vmem [shape: f32[1,32], index: 2, kind: input, shape index: {}]   ;;  %s5406_s3 = inlined_call_operand.vmem [shape: f32[1,32], index: 3, kind: input, shape index: {}]   ;;  %s5407_s4 = inlined_call_operand.vmem [shape: f32[1,32], index: 4, kind: input, shape index: {}]   ;;  %s5408_s5 = inlined_call_operand.vmem [shape: bf16[16,16], index: 5, kind: input, shape index: {}]   ;;  %s5409_s6 = inlined_call_operand.vmem [shape: f32[16,1], index: 6, kind: input, shape index: {}]   ;;  %s5410_s7 = inlined_call_operand.vmem [shape: bf16[16,16], index: 7, kind: input, shape index: {}]   ;;  %s5411_s8 = inlined_call_operand.vmem [shape: f32[16,1], index: 8, kind: input, shape index: {}]   ;;  %s5412_s9 = inlined_call_operand.vmem [shape: bf16[16,16], index: 9, kind: input, shape index: {}]   ;;  %s5413_s10 = inlined_call_operand.vmem [shape: f32[16,1], index: 10, kind: input, shape index: {}]   ;;  %s5414_s11 = inlined_call_operand.vmem [shape: bf16[16,16], index: 11, kind: input, shape index: {}]   ;;  %s5415_s12 = inlined_call_operand.vmem [shape: f32[16,1], index: 12, kind: input, shape index: {}]   ;;  %s5416_s13 = inlined_call_operand.vmem [shape: bf16[32,128], index: 13, kind: input, shape index: {}]   ;;  %s5417_s14 = inlined_call_operand.vmem [shape: f32[1,128], index: 14, kind: input, shape index: {}]   ;;  %s5418_s15 = inlined_call_operand.vmem [shape: bf16[128,32], index: 15, kind: input, shape index: {}]   ;;  %s5419_s16 = inlined_call_operand.vmem [shape: f32[1,32], index: 16, kind: input, shape index: {}]   ;;  %s5420_s17 = inlined_call_operand.hbm [shape: f32[4,16,32], index: 17, kind: output, shape index: {}]  }
   0x1   :  { %5428 = sst [smem:[#allocation12_spill]] %s5403_s0 }
   0x2   :  { %5429 = sst [smem:[#allocation13_spill]] %s5404_s1 }
   0x3   :  { %22 = vsyncpa [#allocation3], 0 }
   0x4   :  { %24 = vsyncpa [#allocation3 + $0x1], 0  ;;  %s4574_s24 = smov 0   ;;  %s4576_s25 = smov 0  }
   0x5   :  { %s4578_s26 = smov 0   ;;  %s4580_s27 = smov 0  }
   0x6 LB: > { %5430 = sst [smem:[#allocation5_spill]] %s4450_s24  ;;  %s4595_s28 = sadd.s32 4294967295, %s4462_s27   ;;  %s4462_s27 = sphi %s4580_s27, %s5446_s27   ;;  %s4458_s26 = sphi %s4578_s26, %s5448_s26   ;;  %s4454_s25 = sphi %s4576_s25, %s5450_s25   ;;  %s4450_s24 = sphi %s4574_s24, %s5449_s24  }
   0x7   : > { %5431 = sst [smem:[#allocation6_spill]] %s4458_s26  ;;  %s3657_s29 = sadd.s32 4294967294, %s4462_s27  }
   0x8   : > { %s4599_s0 = sadd.s32 1, %s4462_s27   ;;  %s399_s30 = sadd.s32 1, %s4458_s26 }
   0x9   : > { %5432 = sst [smem:[#allocation7_spill]] %s4599_s0  ;;  %s396_s18 = ssub.s32 %s4462_s27, %s4599_s0 }
   0xa   : > { %p409_p0 = scmp.ne.s32.totalorder %s4458_s26, %s4454_s25  ;;  %p397_p1 = scmp.eq.s32.totalorder %s396_s18, 0 }
   0xb   : > { %p410_p2 = scmp.eq.s32.totalorder %s4595_s28, 1  ;;  %p415_p3 = scmp.ne.s32.totalorder %s4454_s25, %s4450_s24 }
   0xc   : > { %p416_p4 = scmp.eq.s32.totalorder %s3657_s29, 1  ;;  %p3660_p7 = scmp.ge.s32.totalorder %s4462_s27, 1 }
   0xd   : > { %s4610_s19 = scalar_select %p397_p1, %s4458_s26, %s399_s30  }
   0xe   : > { %p4612_p5 = por %p410_p2, %p409_p0  ;;  %p4616_p6 = por %p416_p4, %p415_p3 }
   0xf   : > { %5433 = sst [smem:[#allocation8_spill]] %s4610_s19  ;;  %p492_p8 = scmp.lt.s32.totalorder %s4462_s27, 3 }
  0x10   : > { %s5435_s20 = scalar_select %p4616_p6, 1, 0 }
  0x11   : > { %p493_p9 = pnand %p3660_p7, %p492_p8 }
  0x12   : > { %5436 = sst [smem:[#allocation9_spill]] %s5435_s20 }
  0x13   : > { %496 = sbr.rel (%p493_p9) target bundleno = 7597 (0x1dad), region = 88 }
  0x1a   : > { %s3662_s21 = sshll.u32 %s4595_s28, 1  ;;  %vm598_vm0 = vcmask 261120   ;;  %s5437_s30 = sld [smem:[#allocation12_spill]]  ;;  %v4637_v14 = vld [vmem:[%s5406_s3] ss:$0 sm:$0xff]  ;;  %v5426_v38 = vmov 0.0  }
  0x1b   : > { %p546_p10 = scmp.lt.s32.totalorder %s3662_s21, 3  ;;  %v4642_v15 = vld [vmem:[%s5407_s4] ss:$0 sm:$0xff]  ;;  %v4652_v17 = vld [vmem:[%s5416_s13 + $0x4] sm:$0xf]  ;;  %3860 = vmatprep.subr.bf16.mxu0 %v5426_v38  ;;  %3866 = vmatprep.subr.bf16.mxu1 %v5426_v38  ;;  %vm4473_vm1 = vmmov 0  }
  0x1c   : > { %v4647_v16 = vld [vmem:[%s5416_s13] sm:$0xf]  ;;  %5439 = vst [vmem:[#allocation11_spill] sm:$0xff] %v4652_v17  ;;  %v4657_v18 = vld [vmem:[%s5416_s13 + $0x8] sm:$0xf]  ;;  %3862 = vmatprep.mubr.msk.bf16.mxu0 %vm4473_vm1, %v5426_v38  ;;  %3868 = vmatprep.mubr.msk.bf16.mxu1 %vm4473_vm1, %v5426_v38  ;;  %v4474_v40 = vmov 0  }
  0x1d   : > { %s5452_s21 = smov (!%p546_p10, %s3662_s21), 3  ;;  %5438 = vst [vmem:[#allocation10_spill] sm:$0xff] %v4647_v16  ;;  %v4662_v19 = vld [vmem:[%s5416_s13 + $0xc] sm:$0xf]  ;;  %v4667_v20 = vld [vmem:[%s5417_s14] ss:$0 sm:$0xff]  ;;  %4222 = vset.pattern.permute.xlu1 %v4474_v40  ;;  %4223 = vset.pattern.permute.xlu0 %v4474_v40 }
  0x1e   : > { %s3749_s22 = sshll.u32 %s5452_s21, 4  ;;  %v4672_v21 = vld [vmem:[%s5418_s15] sm:$0xf]  ;;  %v4677_v22 = vld [vmem:[%s5418_s15 + $0x4] sm:$0xf]  ;;  %v561_v41 = vld [vmem:[%s5409_s6 + $0x8] sm:$0xff] }
  0x1f   : > { %v4682_v23 = vld [vmem:[%s5418_s15 + $0x8] sm:$0xf]  ;;  %v4687_v24 = vld [vmem:[%s5418_s15 + $0xc] sm:$0xf]  ;;  %v4692_v25 = vld [vmem:[%s5418_s15 + $0x10] sm:$0xf] }
  0x20   : > { %s4626_s18 = scalar_lea.vmem %s5437_s30, %s3749_s22  ;;  %v4697_v26 = vld [vmem:[%s5418_s15 + $0x14] sm:$0xf]  ;;  %v4702_v27 = vld [vmem:[%s5418_s15 + $0x18] sm:$0xf]  ;;  %v4707_v28 = vld [vmem:[%s5418_s15 + $0x1c] sm:$0xf] }
  0x21   : > { %v596_v0 = vld [vmem:[%s4626_s18] sm:$0xff]  ;;  %v597_v1 = vld [vmem:[%s4626_s18 + $0x8] sm:$0xff]  ;;  %v4732_v33 = vld [vmem:[%s5418_s15 + $0x30] sm:$0xf]  ;;  %s5440_s19 = sld [smem:[#allocation13_spill]]  ;;  %s4475_s30 = smov 112  }
  0x22   : > { %v599_v2 = vsel %vm598_vm0, %v596_v0, 0.0  ;;  %v602_v3 = vsel %vm598_vm0, %v597_v1, 0.0  ;;  %v4712_v29 = vld [vmem:[%s5418_s15 + $0x20] sm:$0xf]  ;;  %v4717_v30 = vld [vmem:[%s5418_s15 + $0x24] sm:$0xf] }
  0x23   : > { %600 = vadd.xlane.f32.xlu0 %v599_v2  ;;  %v4722_v31 = vld [vmem:[%s5418_s15 + $0x28] sm:$0xf]  ;;  %v4727_v32 = vld [vmem:[%s5418_s15 + $0x2c] sm:$0xf]  ;;  %v4737_v34 = vld [vmem:[%s5418_s15 + $0x34] sm:$0xf] }
  0x24   : > { %v4742_v35 = vld [vmem:[%s5418_s15 + $0x38] sm:$0xf]  ;;  %v4747_v36 = vld [vmem:[%s5418_s15 + $0x3c] sm:$0xf]  ;;  %v4752_v37 = vld [vmem:[%s5419_s16] ss:$0 sm:$0xff] }
  0x25   : > { %v560_v39 = vld [vmem:[%s5409_s6] sm:$0xff]  ;;  %v569_v60 = vld [vmem:[%s5413_s10 + $0x8] sm:$0xff]  ;;  %vm658_vm2 = vcmask 130048   ;;  %s542_s20 = sand.u32 1, %s4454_s25   ;;  %s4476_s23 = smov 16   ;;  %vm1916_vm3 = vcmask 261248  }
  0x26   : > { %v564_v51 = vld [vmem:[%s5411_s8] sm:$0xff]  ;;  %v573_v63 = vld [vmem:[%s5415_s12 + $0x8] sm:$0xff]  ;;  %s3661_s21 = sshll.u32 %s542_s20, 5  ;;  %s5030_s29 = smov 0  }
  0x27   : > { %603 = vadd.xlane.f32.xlu0 %v602_v3  ;;  %v4769_v50 = vld [vmem:[%s5440_s19] ss:$0 sm:$0xff]  ;;  %s5015_s22 = scalar_lea.vmem [#allocation2], %s3661_s21 }
  0x28   : > { %v568_v55 = vld [vmem:[%s5413_s10] sm:$0xff] }
  0x29   : > { %v4781_v56 = vld [vmem:[%s5405_s2] ss:$0 sm:$0xff] }
  0x2a   : > { %v4792_v62 = vld [vmem:[%s5408_s5] sm:$0xff]  }
  0xb0   : > { %v601_v4 = vpop.xlane.xlu0 %600 }
  0xb1   : > { %v606_v5 = vmul.f32 0.03125, %v601_v4 }
  0xb3   : > { %v608_v6 = vsub.f32 %v596_v0, %v606_v5 }
  0xb4   : > { %v604_v7 = vpop.xlane.xlu0 %603 }
  0xb5   : > { %v607_v8 = vmul.f32 0.03125, %v604_v7  ;;  %v610_v9 = vmul.f32 %v608_v6, %v608_v6 }
  0xb7   : > { %v609_v10 = vsub.f32 %v597_v1, %v607_v8  ;;  %v612_v11 = vsel %vm598_vm0, %v610_v9, 0.0  ;;  %v565_v1 = vld [vmem:[%s5411_s8 + $0x8] sm:$0xff] }
  0xb8   : > { %613 = vadd.xlane.f32.xlu1 %v612_v11 }
  0xb9   : > { %v611_v12 = vmul.f32 %v609_v10, %v609_v10 }
  0xbb   : > { %v615_v13 = vsel %vm598_vm0, %v611_v12, 0.0 }
  0xbc   : > { %616 = vadd.xlane.f32.xlu1 %v615_v13 }
  0xcd   : > { %645 = vperm.xlu1 %4222, %v560_v39  }
  0xd1   : > { %650 = vperm.xlu1 %4222, %v561_v41  }
  0xd5   : > { %769 = vperm.xlu1 %4222, %v564_v51  }
  0xd9   : > { %847 = vperm.xlu1 %4222, %v568_v55  }
  0xdd   : > { %852 = vperm.xlu1 %4222, %v569_v60  }
  0xe1   : > { %1837 = vperm.xlu1 %4222, %v573_v63  }
 0x145   : > { %v614_v42 = vpop.xlane.xlu1 %613 }
 0x146   : > { %v618_v43 = vmul.f32 0.03125, %v614_v42 }
 0x148   : > { %v620_v44 = vadd.f32 1e-06, %v618_v43 }
 0x149   : > { %v617_v45 = vpop.xlane.xlu1 %616 }
 0x14a   : > { %4228 = vrsqrt.f32 %v620_v44  ;;  %v619_v46 = vmul.f32 0.03125, %v617_v45 }
 0x14c   : > { %v621_v47 = vadd.f32 1e-06, %v619_v46  ;;  %v572_v46 = vld [vmem:[%s5415_s12] sm:$0xff] }
 0x14d   : > { %v4811_v2 = vpop.permute.xlu1 %645 }
 0x14e   : > { %4230 = vrsqrt.f32 %v621_v47 }
 0x151   : > { %v4813_v4 = vpop.permute.xlu1 %650 }
 0x154   : > { %v4229_v48 = vpop.eup %4228 }
 0x155   : > { %v624_v49 = vmul.f32 %v4229_v48, %v608_v6 }
 0x157   : > { %v632_v54 = vmul.f32 %v4769_v50, %v624_v49 }
 0x158   : > { %v4231_v52 = vpop.eup %4230 }
 0x159   : > { %v625_v53 = vmul.f32 %v4231_v52, %v609_v10  ;;  %v640_v58 = vadd.f32 %v4781_v56, %v632_v54 }
 0x15b   : > { %v633_v57 = vmul.f32 %v4769_v50, %v625_v53 }
 0x15d   : > { %v641_v59 = vadd.f32 %v4781_v56, %v633_v57  ;;  %v4837_v57 = vld [vmem:[%s5410_s7] sm:$0xff]  }
 0x15f   : > { %v642_v61 = vpack.c.bf16 %v641_v59, %v640_v58 }
 0x161   : > { %704 = vrot.lane.b32.xlu0 %v642_v61, %s4475_s30  ;;  %3861 = vmatpush3.bf16.msra.mxu0 %v642_v61 }
 0x162   : > { %3872 = vmatprep.subr.bf16.mxu0 %v5426_v38 }
 0x164   : > { %3863 = vmatmul.mubr.msk.bf16.vlgmr.msra.gmra.mrb[0].mxu0 %vm658_vm2, %v4792_v62 }
 0x165   : > { %3874 = vmatprep.mubr.msk.bf16.mxu0 %vm4473_vm1, %v5426_v38  ;;  %774 = vperm.xlu0 %4223, %v565_v1  }
 0x169   : > { %1832 = vperm.xlu0 %4223, %v572_v46  }
 0x1d3   : > { %v705_v0 = vpop.permute.xlu0 %704 }
 0x1d4   : > { %3867 = vmatpush3.bf16.msra.mxu1 %v705_v0 }
 0x1d5   : > { %3878 = vmatprep.subr.bf16.mxu1 %v5426_v38 }
 0x1d7   : > { %3869 = vmatmul.mubr.msk.bf16.vlgmr.msra.gmra.mrb[0].mxu1 %vm658_vm2, %v4792_v62 }
 0x1d8   : > { %3880 = vmatprep.mubr.msk.bf16.mxu1 %vm4473_vm1, %v5426_v38 }
 0x237   : > { %v696_v3 = vpop.f32.mrb[0].mxu0 }
 0x238   : > { %v4816_v5 = vadd.f32 %v696_v3, %v4811_v2  ;;  %v3864_v6 = vpop.f32.mrb[1].mxu0 }
 0x239   : > { %v699_v7 = vpop.f32.mrb[2].mxu0 }
 0x23a   : > { %v4819_v8 = vadd.f32 %v699_v7, %v4813_v4  ;;  %v750_v9 = vmul.f32 %v4816_v5, %v4816_v5  ;;  %v3865_v10 = vpop.f32.mrb[3].mxu0  ;;  %v748_v45 = vmul.f32 0.5, %v4816_v5 }
 0x23c   : > { %v751_v11 = vmul.f32 %v4819_v8, %v4819_v8  ;;  %v752_v12 = vmul.f32 %v750_v9, %v4816_v5  ;;  %v749_v48 = vmul.f32 0.5, %v4819_v8 }
 0x23e   : > { %v753_v13 = vmul.f32 %v751_v11, %v4819_v8  ;;  %v754_v39 = vmul.f32 0.044715, %v752_v12 }
 0x240   : > { %v755_v40 = vmul.f32 0.044715, %v753_v13  ;;  %v756_v41 = vadd.f32 %v754_v39, %v4816_v5 }
 0x242   : > { %v757_v42 = vadd.f32 %v755_v40, %v4819_v8  ;;  %v758_v43 = vmul.f32 0.7978846, %v756_v41 }
 0x244   : > { %v759_v44 = vmul.f32 0.7978846, %v757_v42  ;;  %4232 = vtanh.f32 %v758_v43 }
 0x246   : > { %4234 = vtanh.f32 %v759_v44 }
 0x24e   : > { %v4233_v47 = vpop.eup %4232 }
 0x24f   : > { %v762_v49 = vadd.f32 1.0, %v4233_v47 }
 0x250   : > { %v4235_v51 = vpop.eup %4234 }
 0x251   : > { %v763_v52 = vadd.f32 1.0, %v4235_v51  ;;  %v764_v53 = vmul.f32 %v762_v49, %v748_v45  ;;  %v4865_v49 = vpop.permute.xlu1 %769 }
 0x253   : > { %v765_v54 = vmul.f32 %v763_v52, %v749_v48  ;;  %v4867_v52 = vpop.permute.xlu0 %774 }
 0x255   : > { %v766_v55 = vpack.c.bf16 %v765_v54, %v764_v53 }
 0x257   : > { %3873 = vmatpush3.bf16.msra.mxu0 %v766_v55 }
 0x258   : > { %3884 = vmatprep.subr.bf16.mxu0 %v5426_v38 }
 0x25a   : > { %3875 = vmatmul.mubr.msk.bf16.vlgmr.msra.gmra.mrb[4].mxu0 %vm658_vm2, %v4837_v57 }
 0x25b   : > { %3886 = vmatprep.mubr.msk.bf16.mxu0 %vm4473_vm1, %v5426_v38 }
 0x2aa   : > { %v741_v58 = vpop.f32.mrb[0].mxu1 }
 0x2ab   : > { %v4845_v59 = vadd.f32 %v741_v58, %v4811_v2  ;;  %v3870_v60 = vpop.f32.mrb[1].mxu1 }
 0x2ac   : > { %v744_v61 = vpop.f32.mrb[2].mxu1 }
 0x2ad   : > { %v4848_v63 = vadd.f32 %v744_v61, %v4813_v4  ;;  %v3871_v0 = vpop.f32.mrb[3].mxu1  ;;  %v908_v1 = vmul.f32 %v4845_v59, %v4845_v59  ;;  %v906_v43 = vmul.f32 0.5, %v4845_v59 }
 0x2af   : > { %v909_v3 = vmul.f32 %v4848_v63, %v4848_v63  ;;  %v910_v6 = vmul.f32 %v908_v1, %v4845_v59  ;;  %v907_v44 = vmul.f32 0.5, %v4848_v63 }
 0x2b1   : > { %v911_v7 = vmul.f32 %v909_v3, %v4848_v63  ;;  %v912_v9 = vmul.f32 0.044715, %v910_v6 }
 0x2b3   : > { %v913_v10 = vmul.f32 0.044715, %v911_v7  ;;  %v914_v11 = vadd.f32 %v912_v9, %v4845_v59 }
 0x2b5   : > { %v915_v12 = vadd.f32 %v913_v10, %v4848_v63  ;;  %v916_v13 = vmul.f32 0.7978846, %v914_v11 }
 0x2b7   : > { %v917_v39 = vmul.f32 0.7978846, %v915_v12  ;;  %4236 = vtanh.f32 %v916_v13 }
 0x2b9   : > { %4238 = vtanh.f32 %v917_v39 }
 0x2c1   : > { %v4237_v40 = vpop.eup %4236 }
 0x2c2   : > { %v920_v41 = vadd.f32 1.0, %v4237_v40 }
 0x2c3   : > { %v4239_v42 = vpop.eup %4238 }
 0x2c4   : > { %v921_v45 = vadd.f32 1.0, %v4239_v42  ;;  %v922_v46 = vmul.f32 %v920_v41, %v906_v43 }
 0x2c6   : > { %v923_v47 = vmul.f32 %v921_v45, %v907_v44 }
 0x2c8   : > { %v924_v48 = vpack.c.bf16 %v923_v47, %v922_v46  ;;  %v4874_v47 = vld [vmem:[%s5412_s9] sm:$0xff]  }
 0x2ca   : > { %3885 = vmatpush3.bf16.msra.mxu0 %v924_v48 }
 0x2cb   : > { %3896 = vmatprep.subr.bf16.mxu0 %v5426_v38 }
 0x2cd   : > { %3887 = vmatmul.mubr.msk.bf16.vlgmr.msra.gmra.mrb[8].mxu0 %vm658_vm2, %v4837_v57 }
 0x2ce   : > { %3898 = vmatprep.mubr.msk.bf16.mxu0 %vm4473_vm1, %v5426_v38 }
 0x32d   : > { %v819_v51 = vpop.f32.mrb[4].mxu0 }
 0x32e   : > { %v820_v53 = vadd.f32 %v819_v51, %v4865_v49  ;;  %v3876_v54 = vpop.f32.mrb[5].mxu0 }
 0x32f   : > { %v822_v55 = vpop.f32.mrb[6].mxu0 }
 0x330   : > { %v828_v58 = vmul.f32 %v820_v53, %v820_v53  ;;  %v823_v60 = vadd.f32 %v822_v55, %v4867_v52  ;;  %v3877_v61 = vpop.f32.mrb[7].mxu0  ;;  %v826_v42 = vmul.f32 0.5, %v820_v53 }
 0x332   : > { %v830_v0 = vmul.f32 %v828_v58, %v820_v53  ;;  %v829_v1 = vmul.f32 %v823_v60, %v823_v60  ;;  %v827_v39 = vmul.f32 0.5, %v823_v60 }
 0x334   : > { %v832_v3 = vmul.f32 0.044715, %v830_v0  ;;  %v831_v6 = vmul.f32 %v829_v1, %v823_v60 }
 0x336   : > { %v834_v7 = vadd.f32 %v832_v3, %v820_v53  ;;  %v833_v9 = vmul.f32 0.044715, %v831_v6 }
 0x338   : > { %v836_v10 = vmul.f32 0.7978846, %v834_v7  ;;  %v835_v11 = vadd.f32 %v833_v9, %v823_v60 }
 0x33a   : > { %4240 = vtanh.f32 %v836_v10  ;;  %v837_v12 = vmul.f32 0.7978846, %v835_v11 }
 0x33c   : > { %4242 = vtanh.f32 %v837_v12 }
 0x344   : > { %v4241_v13 = vpop.eup %4240 }
 0x345   : > { %v840_v40 = vadd.f32 1.0, %v4241_v13 }
 0x346   : > { %v4243_v41 = vpop.eup %4242 }
 0x347   : > { %v841_v43 = vadd.f32 1.0, %v4243_v41  ;;  %v842_v44 = vmul.f32 %v840_v40, %v826_v42 }
 0x349   : > { %v843_v45 = vmul.f32 %v841_v43, %v827_v39 }
 0x34b   : > { %v844_v46 = vpack.c.bf16 %v843_v45, %v842_v44 }
 0x34d   : > { %3879 = vmatpush3.bf16.msra.mxu1 %v844_v46  ;;  %v4888_v46 = vpop.permute.xlu1 %847 }
 0x34e   : > { %3890 = vmatprep.subr.bf16.mxu1 %v5426_v38 }
 0x350   : > { %3881 = vmatmul.mubr.msk.bf16.vlgmr.msra.gmra.mrb[4].mxu1 %vm658_vm2, %v4874_v47 }
 0x351   : > { %3892 = vmatprep.mubr.msk.bf16.mxu1 %vm4473_vm1, %v5426_v38 }
 0x3a0   : > { %v959_v48 = vpop.f32.mrb[8].mxu0 }
 0x3a1   : > { %v960_v51 = vadd.f32 %v959_v48, %v4865_v49  ;;  %v3888_v53 = vpop.f32.mrb[9].mxu0 }
 0x3a2   : > { %v962_v54 = vpop.f32.mrb[10].mxu0 }
 0x3a3   : > { %v968_v55 = vmul.f32 %v960_v51, %v960_v51  ;;  %v963_v58 = vadd.f32 %v962_v54, %v4867_v52  ;;  %v3889_v60 = vpop.f32.mrb[11].mxu0  ;;  %v966_v40 = vmul.f32 0.5, %v960_v51  ;;  %v4891_v54 = vpop.permute.xlu1 %852 }
 0x3a5   : > { %v970_v61 = vmul.f32 %v968_v55, %v960_v51  ;;  %v969_v0 = vmul.f32 %v963_v58, %v963_v58  ;;  %v967_v41 = vmul.f32 0.5, %v963_v58 }
 0x3a7   : > { %v972_v1 = vmul.f32 0.044715, %v970_v61  ;;  %v971_v3 = vmul.f32 %v969_v0, %v963_v58 }
 0x3a9   : > { %v974_v6 = vadd.f32 %v972_v1, %v960_v51  ;;  %v973_v7 = vmul.f32 0.044715, %v971_v3 }
 0x3ab   : > { %v976_v9 = vmul.f32 0.7978846, %v974_v6  ;;  %v975_v10 = vadd.f32 %v973_v7, %v963_v58 }
 0x3ad   : > { %4244 = vtanh.f32 %v976_v9  ;;  %v977_v11 = vmul.f32 0.7978846, %v975_v10 }
 0x3af   : > { %4246 = vtanh.f32 %v977_v11 }
 0x3b7   : > { %v4245_v12 = vpop.eup %4244 }
 0x3b8   : > { %v980_v13 = vadd.f32 1.0, %v4245_v12 }
 0x3b9   : > { %v4247_v39 = vpop.eup %4246 }
 0x3ba   : > { %v981_v42 = vadd.f32 1.0, %v4247_v39  ;;  %v982_v43 = vmul.f32 %v980_v13, %v966_v40 }
 0x3bc   : > { %v983_v44 = vmul.f32 %v981_v42, %v967_v41 }
 0x3be   : > { %v984_v45 = vpack.c.bf16 %v983_v44, %v982_v43 }
 0x3c0   : > { %3891 = vmatpush3.bf16.msra.mxu1 %v984_v45 }
 0x3c1   : > { %3902 = vmatprep.subr.bf16.mxu1 %v5426_v38 }
 0x3c3   : > { %3893 = vmatmul.mubr.msk.bf16.vlgmr.msra.gmra.mrb[8].mxu1 %vm658_vm2, %v4874_v47 }
 0x3c4   : > { %3904 = vmatprep.mubr.msk.bf16.mxu1 %vm4473_vm1, %v5426_v38 }
 0x423   : > { %v897_v48 = vpop.f32.mrb[4].mxu1 }
 0x424   : > { %v898_v53 = vadd.f32 %v897_v48, %v4888_v46  ;;  %v3882_v51 = vpop.f32.mrb[5].mxu1 }
 0x425   : > { %v900_v55 = vpop.f32.mrb[6].mxu1 }
 0x426   : > { %v904_v58 = vadd.f32 %v898_v53, %v4816_v5  ;;  %v901_v60 = vadd.f32 %v900_v55, %v4891_v54  ;;  %v3883_v61 = vpop.f32.mrb[7].mxu1 }
 0x428   : > { %v1030_v0 = vmul.f32 %v904_v58, %v904_v58  ;;  %v905_v1 = vadd.f32 %v901_v60, %v4819_v8  ;;  %v1028_v43 = vmul.f32 0.5, %v904_v58 }
 0x42a   : > { %v1032_v3 = vmul.f32 %v1030_v0, %v904_v58  ;;  %v1031_v6 = vmul.f32 %v905_v1, %v905_v1  ;;  %v1029_v44 = vmul.f32 0.5, %v905_v1 }
 0x42c   : > { %v1034_v7 = vmul.f32 0.044715, %v1032_v3  ;;  %v1033_v9 = vmul.f32 %v1031_v6, %v905_v1 }
 0x42e   : > { %v1036_v10 = vadd.f32 %v1034_v7, %v904_v58  ;;  %v1035_v11 = vmul.f32 0.044715, %v1033_v9 }
 0x430   : > { %v1038_v12 = vmul.f32 0.7978846, %v1036_v10  ;;  %v1037_v13 = vadd.f32 %v1035_v11, %v905_v1 }
 0x432   : > { %4248 = vtanh.f32 %v1038_v12  ;;  %v1039_v39 = vmul.f32 0.7978846, %v1037_v13 }
 0x434   : > { %4250 = vtanh.f32 %v1039_v39 }
 0x43c   : > { %v4249_v40 = vpop.eup %4248 }
 0x43d   : > { %v1042_v41 = vadd.f32 1.0, %v4249_v40 }
 0x43e   : > { %v4251_v42 = vpop.eup %4250 }
 0x43f   : > { %v1043_v45 = vadd.f32 1.0, %v4251_v42  ;;  %v1044_v48 = vmul.f32 %v1042_v41, %v1028_v43 }
 0x441   : > { %v1045_v53 = vmul.f32 %v1043_v45, %v1029_v44 }
 0x443   : > { %v1046_v51 = vpack.c.bf16 %v1045_v53, %v1044_v48 }
 0x445   : > { %3897 = vmatpush3.bf16.msra.mxu0 %v1046_v51 }
 0x446   : > { %3908 = vmatprep.subr.bf16.mxu0 %v5426_v38 }
 0x448   : > { %3899 = vmatmul.mubr.msk.bf16.vlgmr.msra.gmra.mrb[12].mxu0 %vm658_vm2, %v4837_v57 }
 0x449   : > { %3910 = vmatprep.mubr.msk.bf16.mxu0 %vm4473_vm1, %v5426_v38 }
 0x496   : > { %v1019_v55 = vpop.f32.mrb[8].mxu1 }
 0x497   : > { %v1020_v60 = vadd.f32 %v1019_v55, %v4888_v46  ;;  %v3894_v61 = vpop.f32.mrb[9].mxu1 }
 0x498   : > { %v1022_v0 = vpop.f32.mrb[10].mxu1 }
 0x499   : > { %v1026_v58 = vadd.f32 %v1020_v60, %v4845_v59  ;;  %v1023_v1 = vadd.f32 %v1022_v0, %v4891_v54  ;;  %v3895_v3 = vpop.f32.mrb[11].mxu1 }
 0x49b   : > { %v1152_v6 = vmul.f32 %v1026_v58, %v1026_v58  ;;  %v1027_v7 = vadd.f32 %v1023_v1, %v4848_v63  ;;  %v1150_v48 = vmul.f32 0.5, %v1026_v58 }
 0x49d   : > { %v1154_v9 = vmul.f32 %v1152_v6, %v1026_v58  ;;  %v1153_v10 = vmul.f32 %v1027_v7, %v1027_v7  ;;  %v1151_v53 = vmul.f32 0.5, %v1027_v7 }
 0x49f   : > { %v1156_v11 = vmul.f32 0.044715, %v1154_v9  ;;  %v1155_v12 = vmul.f32 %v1153_v10, %v1027_v7 }
 0x4a1   : > { %v1158_v13 = vadd.f32 %v1156_v11, %v1026_v58  ;;  %v1157_v39 = vmul.f32 0.044715, %v1155_v12 }
 0x4a3   : > { %v1160_v40 = vmul.f32 0.7978846, %v1158_v13  ;;  %v1159_v41 = vadd.f32 %v1157_v39, %v1027_v7 }
 0x4a5   : > { %4252 = vtanh.f32 %v1160_v40  ;;  %v1161_v42 = vmul.f32 0.7978846, %v1159_v41 }
 0x4a7   : > { %4254 = vtanh.f32 %v1161_v42 }
 0x4af   : > { %v4253_v43 = vpop.eup %4252 }
 0x4b0   : > { %v1164_v44 = vadd.f32 1.0, %v4253_v43 }
 0x4b1   : > { %v4255_v45 = vpop.eup %4254 }
 0x4b2   : > { %v1165_v51 = vadd.f32 1.0, %v4255_v45  ;;  %v1166_v55 = vmul.f32 %v1164_v44, %v1150_v48 }
 0x4b4   : > { %v1167_v60 = vmul.f32 %v1165_v51, %v1151_v53 }
 0x4b6   : > { %v1168_v61 = vpack.c.bf16 %v1167_v60, %v1166_v55 }
 0x4b8   : > { %3909 = vmatpush3.bf16.msra.mxu0 %v1168_v61 }
 0x4b9   : > { %3920 = vmatprep.subr.bf16.mxu0 %v5426_v38 }
 0x4bb   : > { %3911 = vmatmul.mubr.msk.bf16.vlgmr.msra.gmra.mrb[16].mxu0 %vm658_vm2, %v4837_v57 }
 0x4bc   : > { %3922 = vmatprep.mubr.msk.bf16.mxu0 %vm4473_vm1, %v5426_v38 }
 0x51b   : > { %v1081_v0 = vpop.f32.mrb[12].mxu0 }
 0x51c   : > { %v1082_v1 = vadd.f32 %v1081_v0, %v4865_v49  ;;  %v3900_v3 = vpop.f32.mrb[13].mxu0 }
 0x51d   : > { %v1084_v6 = vpop.f32.mrb[14].mxu0 }
 0x51e   : > { %v1090_v58 = vmul.f32 %v1082_v1, %v1082_v1  ;;  %v1085_v7 = vadd.f32 %v1084_v6, %v4867_v52  ;;  %v3901_v9 = vpop.f32.mrb[15].mxu0  ;;  %v1088_v53 = vmul.f32 0.5, %v1082_v1 }
 0x520   : > { %v1092_v10 = vmul.f32 %v1090_v58, %v1082_v1  ;;  %v1091_v11 = vmul.f32 %v1085_v7, %v1085_v7  ;;  %v1089_v51 = vmul.f32 0.5, %v1085_v7 }
 0x522   : > { %v1094_v12 = vmul.f32 0.044715, %v1092_v10  ;;  %v1093_v13 = vmul.f32 %v1091_v11, %v1085_v7 }
 0x524   : > { %v1096_v39 = vadd.f32 %v1094_v12, %v1082_v1  ;;  %v1095_v40 = vmul.f32 0.044715, %v1093_v13 }
 0x526   : > { %v1098_v41 = vmul.f32 0.7978846, %v1096_v39  ;;  %v1097_v42 = vadd.f32 %v1095_v40, %v1085_v7 }
 0x528   : > { %4256 = vtanh.f32 %v1098_v41  ;;  %v1099_v43 = vmul.f32 0.7978846, %v1097_v42 }
 0x52a   : > { %4258 = vtanh.f32 %v1099_v43 }
 0x532   : > { %v4257_v44 = vpop.eup %4256 }
 0x533   : > { %v1102_v45 = vadd.f32 1.0, %v4257_v44 }
 0x534   : > { %v4259_v48 = vpop.eup %4258 }
 0x535   : > { %v1103_v55 = vadd.f32 1.0, %v4259_v48  ;;  %v1104_v60 = vmul.f32 %v1102_v45, %v1088_v53 }
 0x537   : > { %v1105_v61 = vmul.f32 %v1103_v55, %v1089_v51 }
 0x539   : > { %v1106_v0 = vpack.c.bf16 %v1105_v61, %v1104_v60 }
 0x53b   : > { %3903 = vmatpush3.bf16.msra.mxu1 %v1106_v0 }
 0x53c   : > { %3914 = vmatprep.subr.bf16.mxu1 %v5426_v38 }
 0x53e   : > { %3905 = vmatmul.mubr.msk.bf16.vlgmr.msra.gmra.mrb[12].mxu1 %vm658_vm2, %v4874_v47 }
 0x53f   : > { %3916 = vmatprep.mubr.msk.bf16.mxu1 %vm4473_vm1, %v5426_v38 }
 0x58e   : > { %v1203_v3 = vpop.f32.mrb[16].mxu0 }
 0x58f   : > { %v1204_v6 = vadd.f32 %v1203_v3, %v4865_v49  ;;  %v3912_v58 = vpop.f32.mrb[17].mxu0 }
 0x590   : > { %v1206_v9 = vpop.f32.mrb[18].mxu0 }
 0x591   : > { %v1212_v1 = vmul.f32 %v1204_v6, %v1204_v6  ;;  %v1207_v7 = vadd.f32 %v1206_v9, %v4867_v52  ;;  %v3913_v10 = vpop.f32.mrb[19].mxu0  ;;  %v1210_v51 = vmul.f32 0.5, %v1204_v6 }
 0x593   : > { %v1214_v11 = vmul.f32 %v1212_v1, %v1204_v6  ;;  %v1213_v12 = vmul.f32 %v1207_v7, %v1207_v7  ;;  %v1211_v55 = vmul.f32 0.5, %v1207_v7 }
 0x595   : > { %v1216_v13 = vmul.f32 0.044715, %v1214_v11  ;;  %v1215_v39 = vmul.f32 %v1213_v12, %v1207_v7 }
 0x597   : > { %v1218_v40 = vadd.f32 %v1216_v13, %v1204_v6  ;;  %v1217_v41 = vmul.f32 0.044715, %v1215_v39 }
 0x599   : > { %v1220_v42 = vmul.f32 0.7978846, %v1218_v40  ;;  %v1219_v43 = vadd.f32 %v1217_v41, %v1207_v7 }
 0x59b   : > { %4260 = vtanh.f32 %v1220_v42  ;;  %v1221_v44 = vmul.f32 0.7978846, %v1219_v43 }
 0x59d   : > { %4262 = vtanh.f32 %v1221_v44 }
 0x5a5   : > { %v4261_v45 = vpop.eup %4260 }
 0x5a6   : > { %v1224_v48 = vadd.f32 1.0, %v4261_v45 }
 0x5a7   : > { %v4263_v53 = vpop.eup %4262 }
 0x5a8   : > { %v1225_v60 = vadd.f32 1.0, %v4263_v53  ;;  %v1226_v61 = vmul.f32 %v1224_v48, %v1210_v51 }
 0x5aa   : > { %v1227_v0 = vmul.f32 %v1225_v60, %v1211_v55 }
 0x5ac   : > { %v1228_v3 = vpack.c.bf16 %v1227_v0, %v1226_v61 }
 0x5ae   : > { %3915 = vmatpush3.bf16.msra.mxu1 %v1228_v3 }
 0x5af   : > { %3926 = vmatprep.subr.bf16.mxu1 %v5426_v38 }
 0x5b1   : > { %3917 = vmatmul.mubr.msk.bf16.vlgmr.msra.gmra.mrb[16].mxu1 %vm658_vm2, %v4874_v47 }
 0x5b2   : > { %3928 = vmatprep.mubr.msk.bf16.mxu1 %vm4473_vm1, %v5426_v38 }
 0x611   : > { %v1141_v58 = vpop.f32.mrb[12].mxu1 }
 0x612   : > { %v1142_v9 = vadd.f32 %v1141_v58, %v4888_v46  ;;  %v3906_v1 = vpop.f32.mrb[13].mxu1 }
 0x613   : > { %v1144_v10 = vpop.f32.mrb[14].mxu1 }
 0x614   : > { %v1148_v6 = vadd.f32 %v1142_v9, %v4816_v5  ;;  %v1145_v7 = vadd.f32 %v1144_v10, %v4891_v54  ;;  %v3907_v11 = vpop.f32.mrb[15].mxu1 }
 0x616   : > { %v1274_v12 = vmul.f32 %v1148_v6, %v1148_v6  ;;  %v1149_v13 = vadd.f32 %v1145_v7, %v4819_v8  ;;  %v1272_v61 = vmul.f32 0.5, %v1148_v6 }
 0x618   : > { %v1276_v39 = vmul.f32 %v1274_v12, %v1148_v6  ;;  %v1275_v40 = vmul.f32 %v1149_v13, %v1149_v13  ;;  %v1273_v0 = vmul.f32 0.5, %v1149_v13 }
 0x61a   : > { %v1278_v41 = vmul.f32 0.044715, %v1276_v39  ;;  %v1277_v42 = vmul.f32 %v1275_v40, %v1149_v13 }
 0x61c   : > { %v1280_v43 = vadd.f32 %v1278_v41, %v1148_v6  ;;  %v1279_v44 = vmul.f32 0.044715, %v1277_v42 }
 0x61e   : > { %v1282_v45 = vmul.f32 0.7978846, %v1280_v43  ;;  %v1281_v48 = vadd.f32 %v1279_v44, %v1149_v13 }
 0x620   : > { %4264 = vtanh.f32 %v1282_v45  ;;  %v1283_v53 = vmul.f32 0.7978846, %v1281_v48 }
 0x622   : > { %4266 = vtanh.f32 %v1283_v53 }
 0x62a   : > { %v4265_v51 = vpop.eup %4264 }
 0x62b   : > { %v1286_v55 = vadd.f32 1.0, %v4265_v51 }
 0x62c   : > { %v4267_v60 = vpop.eup %4266 }
 0x62d   : > { %v1287_v3 = vadd.f32 1.0, %v4267_v60  ;;  %v1288_v58 = vmul.f32 %v1286_v55, %v1272_v61 }
 0x62f   : > { %v1289_v9 = vmul.f32 %v1287_v3, %v1273_v0 }
 0x631   : > { %v1290_v1 = vpack.c.bf16 %v1289_v9, %v1288_v58 }
 0x633   : > { %3921 = vmatpush3.bf16.msra.mxu0 %v1290_v1 }
 0x634   : > { %3932 = vmatprep.subr.bf16.mxu0 %v5426_v38 }
 0x636   : > { %3923 = vmatmul.mubr.msk.bf16.vlgmr.msra.gmra.mrb[20].mxu0 %vm658_vm2, %v4837_v57 }
 0x637   : > { %3934 = vmatprep.mubr.msk.bf16.mxu0 %vm4473_vm1, %v5426_v38 }
 0x684   : > { %v1263_v10 = vpop.f32.mrb[16].mxu1 }
 0x685   : > { %v1264_v7 = vadd.f32 %v1263_v10, %v4888_v46  ;;  %v3918_v11 = vpop.f32.mrb[17].mxu1 }
 0x686   : > { %v1266_v12 = vpop.f32.mrb[18].mxu1 }
 0x687   : > { %v1270_v6 = vadd.f32 %v1264_v7, %v4845_v59  ;;  %v1267_v13 = vadd.f32 %v1266_v12, %v4891_v54  ;;  %v3919_v39 = vpop.f32.mrb[19].mxu1 }
 0x689   : > { %v1396_v40 = vmul.f32 %v1270_v6, %v1270_v6  ;;  %v1271_v41 = vadd.f32 %v1267_v13, %v4848_v63  ;;  %v1394_v58 = vmul.f32 0.5, %v1270_v6 }
 0x68b   : > { %v1398_v42 = vmul.f32 %v1396_v40, %v1270_v6  ;;  %v1397_v43 = vmul.f32 %v1271_v41, %v1271_v41  ;;  %v1395_v9 = vmul.f32 0.5, %v1271_v41 }
 0x68d   : > { %v1400_v44 = vmul.f32 0.044715, %v1398_v42  ;;  %v1399_v45 = vmul.f32 %v1397_v43, %v1271_v41 }
 0x68f   : > { %v1402_v48 = vadd.f32 %v1400_v44, %v1270_v6  ;;  %v1401_v53 = vmul.f32 0.044715, %v1399_v45 }
 0x691   : > { %v1404_v51 = vmul.f32 0.7978846, %v1402_v48  ;;  %v1403_v55 = vadd.f32 %v1401_v53, %v1271_v41 }
 0x693   : > { %4268 = vtanh.f32 %v1404_v51  ;;  %v1405_v60 = vmul.f32 0.7978846, %v1403_v55 }
 0x695   : > { %4270 = vtanh.f32 %v1405_v60 }
 0x69d   : > { %v4269_v61 = vpop.eup %4268 }
 0x69e   : > { %v1408_v0 = vadd.f32 1.0, %v4269_v61 }
 0x69f   : > { %v4271_v3 = vpop.eup %4270 }
 0x6a0   : > { %v1409_v1 = vadd.f32 1.0, %v4271_v3  ;;  %v1410_v10 = vmul.f32 %v1408_v0, %v1394_v58 }
 0x6a2   : > { %v1411_v7 = vmul.f32 %v1409_v1, %v1395_v9 }
 0x6a4   : > { %v1412_v11 = vpack.c.bf16 %v1411_v7, %v1410_v10 }
 0x6a6   : > { %3933 = vmatpush3.bf16.msra.mxu0 %v1412_v11 }
 0x6a7   : > { %3944 = vmatprep.subr.bf16.mxu0 %v5426_v38 }
 0x6a9   : > { %3935 = vmatmul.mubr.msk.bf16.vlgmr.msra.gmra.mrb[24].mxu0 %vm658_vm2, %v4837_v57 }
 0x6aa   : > { %3946 = vmatprep.mubr.msk.bf16.mxu0 %vm4473_vm1, %v5426_v38 }
 0x709   : > { %v1325_v12 = vpop.f32.mrb[20].mxu0 }
 0x70a   : > { %v1326_v13 = vadd.f32 %v1325_v12, %v4865_v49  ;;  %v3924_v39 = vpop.f32.mrb[21].mxu0 }
 0x70b   : > { %v1328_v40 = vpop.f32.mrb[22].mxu0 }
 0x70c   : > { %v1334_v6 = vmul.f32 %v1326_v13, %v1326_v13  ;;  %v1329_v41 = vadd.f32 %v1328_v40, %v4867_v52  ;;  %v3925_v42 = vpop.f32.mrb[23].mxu0  ;;  %v1332_v9 = vmul.f32 0.5, %v1326_v13 }
 0x70e   : > { %v1336_v43 = vmul.f32 %v1334_v6, %v1326_v13  ;;  %v1335_v44 = vmul.f32 %v1329_v41, %v1329_v41  ;;  %v1333_v1 = vmul.f32 0.5, %v1329_v41 }
 0x710   : > { %v1338_v45 = vmul.f32 0.044715, %v1336_v43  ;;  %v1337_v48 = vmul.f32 %v1335_v44, %v1329_v41 }
 0x712   : > { %v1340_v53 = vadd.f32 %v1338_v45, %v1326_v13  ;;  %v1339_v51 = vmul.f32 0.044715, %v1337_v48 }
 0x714   : > { %v1342_v55 = vmul.f32 0.7978846, %v1340_v53  ;;  %v1341_v60 = vadd.f32 %v1339_v51, %v1329_v41 }
 0x716   : > { %4272 = vtanh.f32 %v1342_v55  ;;  %v1343_v61 = vmul.f32 0.7978846, %v1341_v60 }
 0x718   : > { %4274 = vtanh.f32 %v1343_v61 }
 0x720   : > { %v4273_v0 = vpop.eup %4272 }
 0x721   : > { %v1346_v3 = vadd.f32 1.0, %v4273_v0 }
 0x722   : > { %v4275_v58 = vpop.eup %4274 }
 0x723   : > { %v1347_v10 = vadd.f32 1.0, %v4275_v58  ;;  %v1348_v7 = vmul.f32 %v1346_v3, %v1332_v9 }
 0x725   : > { %v1349_v11 = vmul.f32 %v1347_v10, %v1333_v1 }
 0x727   : > { %v1350_v12 = vpack.c.bf16 %v1349_v11, %v1348_v7 }
 0x729   : > { %3927 = vmatpush3.bf16.msra.mxu1 %v1350_v12 }
 0x72a   : > { %3938 = vmatprep.subr.bf16.mxu1 %v5426_v38 }
 0x72c   : > { %3929 = vmatmul.mubr.msk.bf16.vlgmr.msra.gmra.mrb[20].mxu1 %vm658_vm2, %v4874_v47 }
 0x72d   : > { %3940 = vmatprep.mubr.msk.bf16.mxu1 %vm4473_vm1, %v5426_v38 }
 0x77c   : > { %v1447_v39 = vpop.f32.mrb[24].mxu0 }
 0x77d   : > { %v1448_v40 = vadd.f32 %v1447_v39, %v4865_v49  ;;  %v3936_v6 = vpop.f32.mrb[25].mxu0 }
 0x77e   : > { %v1450_v42 = vpop.f32.mrb[26].mxu0 }
 0x77f   : > { %v1456_v13 = vmul.f32 %v1448_v40, %v1448_v40  ;;  %v1451_v41 = vadd.f32 %v1450_v42, %v4867_v52  ;;  %v3937_v43 = vpop.f32.mrb[27].mxu0  ;;  %v1454_v1 = vmul.f32 0.5, %v1448_v40 }
 0x781   : > { %v1458_v44 = vmul.f32 %v1456_v13, %v1448_v40  ;;  %v1457_v45 = vmul.f32 %v1451_v41, %v1451_v41  ;;  %v1455_v10 = vmul.f32 0.5, %v1451_v41 }
 0x783   : > { %v1460_v48 = vmul.f32 0.044715, %v1458_v44  ;;  %v1459_v53 = vmul.f32 %v1457_v45, %v1451_v41 }
 0x785   : > { %v1462_v51 = vadd.f32 %v1460_v48, %v1448_v40  ;;  %v1461_v55 = vmul.f32 0.044715, %v1459_v53 }
 0x787   : > { %v1464_v60 = vmul.f32 0.7978846, %v1462_v51  ;;  %v1463_v61 = vadd.f32 %v1461_v55, %v1451_v41 }
 0x789   : > { %4276 = vtanh.f32 %v1464_v60  ;;  %v1465_v0 = vmul.f32 0.7978846, %v1463_v61 }
 0x78b   : > { %4278 = vtanh.f32 %v1465_v0 }
 0x793   : > { %v4277_v3 = vpop.eup %4276 }
 0x794   : > { %v1468_v58 = vadd.f32 1.0, %v4277_v3 }
 0x795   : > { %v4279_v9 = vpop.eup %4278 }
 0x796   : > { %v1469_v7 = vadd.f32 1.0, %v4279_v9  ;;  %v1470_v11 = vmul.f32 %v1468_v58, %v1454_v1 }
 0x798   : > { %v1471_v12 = vmul.f32 %v1469_v7, %v1455_v10 }
 0x79a   : > { %v1472_v39 = vpack.c.bf16 %v1471_v12, %v1470_v11 }
 0x79c   : > { %3939 = vmatpush3.bf16.msra.mxu1 %v1472_v39 }
 0x79d   : > { %3950 = vmatprep.subr.bf16.mxu1 %v5426_v38 }
 0x79f   : > { %3941 = vmatmul.mubr.msk.bf16.vlgmr.msra.gmra.mrb[24].mxu1 %vm658_vm2, %v4874_v47 }
 0x7a0   : > { %3952 = vmatprep.mubr.msk.bf16.mxu1 %vm4473_vm1, %v5426_v38 }
 0x7ff   : > { %v1385_v6 = vpop.f32.mrb[20].mxu1 }
 0x800   : > { %v1386_v42 = vadd.f32 %v1385_v6, %v4888_v46  ;;  %v3930_v13 = vpop.f32.mrb[21].mxu1 }
 0x801   : > { %v1388_v43 = vpop.f32.mrb[22].mxu1 }
 0x802   : > { %v1392_v40 = vadd.f32 %v1386_v42, %v4816_v5  ;;  %v1389_v41 = vadd.f32 %v1388_v43, %v4891_v54  ;;  %v3931_v44 = vpop.f32.mrb[23].mxu1 }
 0x804   : > { %v1518_v45 = vmul.f32 %v1392_v40, %v1392_v40  ;;  %v1393_v48 = vadd.f32 %v1389_v41, %v4819_v8  ;;  %v1516_v11 = vmul.f32 0.5, %v1392_v40 }
 0x806   : > { %v1520_v53 = vmul.f32 %v1518_v45, %v1392_v40  ;;  %v1519_v51 = vmul.f32 %v1393_v48, %v1393_v48  ;;  %v1517_v12 = vmul.f32 0.5, %v1393_v48 }
 0x808   : > { %v1522_v55 = vmul.f32 0.044715, %v1520_v53  ;;  %v1521_v60 = vmul.f32 %v1519_v51, %v1393_v48 }
 0x80a   : > { %v1524_v61 = vadd.f32 %v1522_v55, %v1392_v40  ;;  %v1523_v0 = vmul.f32 0.044715, %v1521_v60 }
 0x80c   : > { %v1526_v3 = vmul.f32 0.7978846, %v1524_v61  ;;  %v1525_v58 = vadd.f32 %v1523_v0, %v1393_v48 }
 0x80e   : > { %4280 = vtanh.f32 %v1526_v3  ;;  %v1527_v9 = vmul.f32 0.7978846, %v1525_v58 }
 0x810   : > { %4282 = vtanh.f32 %v1527_v9 }
 0x818   : > { %v4281_v1 = vpop.eup %4280 }
 0x819   : > { %v1530_v10 = vadd.f32 1.0, %v4281_v1 }
 0x81a   : > { %v4283_v7 = vpop.eup %4282 }
 0x81b   : > { %v1531_v39 = vadd.f32 1.0, %v4283_v7  ;;  %v1532_v6 = vmul.f32 %v1530_v10, %v1516_v11 }
 0x81d   : > { %v1533_v42 = vmul.f32 %v1531_v39, %v1517_v12 }
 0x81f   : > { %v1534_v13 = vpack.c.bf16 %v1533_v42, %v1532_v6 }
 0x821   : > { %3945 = vmatpush3.bf16.msra.mxu0 %v1534_v13 }
 0x822   : > { %3956 = vmatprep.subr.bf16.mxu0 %v5426_v38 }
 0x824   : > { %3947 = vmatmul.mubr.msk.bf16.vlgmr.msra.gmra.mrb[28].mxu0 %vm658_vm2, %v4837_v57 }
 0x825   : > { %3958 = vmatprep.mubr.msk.bf16.mxu0 %vm4473_vm1, %v5426_v38 }
 0x872   : > { %v1507_v43 = vpop.f32.mrb[24].mxu1 }
 0x873   : > { %v1508_v41 = vadd.f32 %v1507_v43, %v4888_v46  ;;  %v3942_v44 = vpop.f32.mrb[25].mxu1 }
 0x874   : > { %v1510_v45 = vpop.f32.mrb[26].mxu1 }
 0x875   : > { %v1514_v40 = vadd.f32 %v1508_v41, %v4845_v59  ;;  %v1511_v48 = vadd.f32 %v1510_v45, %v4891_v54  ;;  %v3943_v53 = vpop.f32.mrb[27].mxu1 }
 0x877   : > { %v1640_v51 = vmul.f32 %v1514_v40, %v1514_v40  ;;  %v1515_v55 = vadd.f32 %v1511_v48, %v4848_v63  ;;  %v1638_v6 = vmul.f32 0.5, %v1514_v40 }
 0x879   : > { %v1642_v60 = vmul.f32 %v1640_v51, %v1514_v40  ;;  %v1641_v61 = vmul.f32 %v1515_v55, %v1515_v55  ;;  %v1639_v42 = vmul.f32 0.5, %v1515_v55 }
 0x87b   : > { %v1644_v0 = vmul.f32 0.044715, %v1642_v60  ;;  %v1643_v3 = vmul.f32 %v1641_v61, %v1515_v55 }
 0x87d   : > { %v1646_v58 = vadd.f32 %v1644_v0, %v1514_v40  ;;  %v1645_v9 = vmul.f32 0.044715, %v1643_v3 }
 0x87f   : > { %v1648_v1 = vmul.f32 0.7978846, %v1646_v58  ;;  %v1647_v10 = vadd.f32 %v1645_v9, %v1515_v55 }
 0x881   : > { %4284 = vtanh.f32 %v1648_v1  ;;  %v1649_v7 = vmul.f32 0.7978846, %v1647_v10 }
 0x883   : > { %4286 = vtanh.f32 %v1649_v7 }
 0x88b   : > { %v4285_v11 = vpop.eup %4284 }
 0x88c   : > { %v1652_v12 = vadd.f32 1.0, %v4285_v11 }
 0x88d   : > { %v4287_v39 = vpop.eup %4286 }
 0x88e   : > { %v1653_v13 = vadd.f32 1.0, %v4287_v39  ;;  %v1654_v43 = vmul.f32 %v1652_v12, %v1638_v6 }
 0x890   : > { %v1655_v41 = vmul.f32 %v1653_v13, %v1639_v42 }
 0x892   : > { %v1656_v44 = vpack.c.bf16 %v1655_v41, %v1654_v43 }
 0x894   : > { %3957 = vmatpush3.bf16.msra.mxu0 %v1656_v44 }
 0x895   : > { %3968 = vmatprep.subr.bf16.mxu0 %v5426_v38 }
 0x897   : > { %3959 = vmatmul.mubr.msk.bf16.vlgmr.msra.gmra.mrb[32].mxu0 %vm658_vm2, %v4837_v57 }
 0x898   : > { %3970 = vmatprep.mubr.msk.bf16.mxu0 %vm4473_vm1, %v5426_v38 }
 0x8f7   : > { %v1569_v45 = vpop.f32.mrb[28].mxu0 }
 0x8f8   : > { %v1570_v48 = vadd.f32 %v1569_v45, %v4865_v49  ;;  %v3948_v53 = vpop.f32.mrb[29].mxu0 }
 0x8f9   : > { %v1572_v51 = vpop.f32.mrb[30].mxu0 }
 0x8fa   : > { %v1578_v40 = vmul.f32 %v1570_v48, %v1570_v48  ;;  %v1573_v55 = vadd.f32 %v1572_v51, %v4867_v52  ;;  %v3949_v60 = vpop.f32.mrb[31].mxu0  ;;  %v1576_v42 = vmul.f32 0.5, %v1570_v48 }
 0x8fc   : > { %v1580_v61 = vmul.f32 %v1578_v40, %v1570_v48  ;;  %v1579_v0 = vmul.f32 %v1573_v55, %v1573_v55  ;;  %v1577_v13 = vmul.f32 0.5, %v1573_v55 }
 0x8fe   : > { %v1582_v3 = vmul.f32 0.044715, %v1580_v61  ;;  %v1581_v58 = vmul.f32 %v1579_v0, %v1573_v55 }
 0x900   : > { %v1584_v9 = vadd.f32 %v1582_v3, %v1570_v48  ;;  %v1583_v1 = vmul.f32 0.044715, %v1581_v58 }
 0x902   : > { %v1586_v10 = vmul.f32 0.7978846, %v1584_v9  ;;  %v1585_v7 = vadd.f32 %v1583_v1, %v1573_v55 }
 0x904   : > { %4288 = vtanh.f32 %v1586_v10  ;;  %v1587_v11 = vmul.f32 0.7978846, %v1585_v7 }
 0x906   : > { %4290 = vtanh.f32 %v1587_v11 }
 0x90e   : > { %v4289_v12 = vpop.eup %4288 }
 0x90f   : > { %v1590_v39 = vadd.f32 1.0, %v4289_v12 }
 0x910   : > { %v4291_v6 = vpop.eup %4290 }
 0x911   : > { %v1591_v43 = vadd.f32 1.0, %v4291_v6  ;;  %v1592_v41 = vmul.f32 %v1590_v39, %v1576_v42 }
 0x913   : > { %v1593_v44 = vmul.f32 %v1591_v43, %v1577_v13 }
 0x915   : > { %v1594_v45 = vpack.c.bf16 %v1593_v44, %v1592_v41 }
 0x917   : > { %3951 = vmatpush3.bf16.msra.mxu1 %v1594_v45 }
 0x918   : > { %3962 = vmatprep.subr.bf16.mxu1 %v5426_v38 }
 0x91a   : > { %3953 = vmatmul.mubr.msk.bf16.vlgmr.msra.gmra.mrb[28].mxu1 %vm658_vm2, %v4874_v47 }
 0x91b   : > { %3964 = vmatprep.mubr.msk.bf16.mxu1 %vm4473_vm1, %v5426_v38 }
 0x96a   : > { %v1691_v53 = vpop.f32.mrb[32].mxu0 }
 0x96b   : > { %v1692_v51 = vadd.f32 %v1691_v53, %v4865_v49  ;;  %v3960_v40 = vpop.f32.mrb[33].mxu0 }
 0x96c   : > { %v1694_v60 = vpop.f32.mrb[34].mxu0 }
 0x96d   : > { %v1700_v48 = vmul.f32 %v1692_v51, %v1692_v51  ;;  %v1695_v55 = vadd.f32 %v1694_v60, %v4867_v52  ;;  %v3961_v61 = vpop.f32.mrb[35].mxu0  ;;  %v1698_v13 = vmul.f32 0.5, %v1692_v51 }
 0x96f   : > { %v1702_v0 = vmul.f32 %v1700_v48, %v1692_v51  ;;  %v1701_v3 = vmul.f32 %v1695_v55, %v1695_v55  ;;  %v1699_v43 = vmul.f32 0.5, %v1695_v55 }
 0x971   : > { %v1704_v58 = vmul.f32 0.044715, %v1702_v0  ;;  %v1703_v9 = vmul.f32 %v1701_v3, %v1695_v55 }
 0x973   : > { %v1706_v1 = vadd.f32 %v1704_v58, %v1692_v51  ;;  %v1705_v10 = vmul.f32 0.044715, %v1703_v9 }
 0x975   : > { %v1708_v7 = vmul.f32 0.7978846, %v1706_v1  ;;  %v1707_v11 = vadd.f32 %v1705_v10, %v1695_v55 }
 0x977   : > { %4292 = vtanh.f32 %v1708_v7  ;;  %v1709_v12 = vmul.f32 0.7978846, %v1707_v11 }
 0x979   : > { %4294 = vtanh.f32 %v1709_v12 }
 0x981   : > { %v4293_v39 = vpop.eup %4292 }
 0x982   : > { %v1712_v6 = vadd.f32 1.0, %v4293_v39 }
 0x983   : > { %v4295_v42 = vpop.eup %4294 }
 0x984   : > { %v1713_v41 = vadd.f32 1.0, %v4295_v42  ;;  %v1714_v44 = vmul.f32 %v1712_v6, %v1698_v13 }
 0x986   : > { %v1715_v45 = vmul.f32 %v1713_v41, %v1699_v43 }
 0x988   : > { %v1716_v53 = vpack.c.bf16 %v1715_v45, %v1714_v44 }
 0x98a   : > { %3963 = vmatpush3.bf16.msra.mxu1 %v1716_v53 }
 0x98b   : > { %3974 = vmatprep.subr.bf16.mxu1 %v5426_v38 }
 0x98d   : > { %3965 = vmatmul.mubr.msk.bf16.vlgmr.msra.gmra.mrb[32].mxu1 %vm658_vm2, %v4874_v47 }
 0x98e   : > { %3976 = vmatprep.mubr.msk.bf16.mxu1 %vm4473_vm1, %v5426_v38 }
 0x9ed   : > { %v1629_v40 = vpop.f32.mrb[28].mxu1 }
 0x9ee   : > { %v1630_v60 = vadd.f32 %v1629_v40, %v4888_v46  ;;  %v3954_v48 = vpop.f32.mrb[29].mxu1 }
 0x9ef   : > { %v1632_v61 = vpop.f32.mrb[30].mxu1 }
 0x9f0   : > { %v1636_v51 = vadd.f32 %v1630_v60, %v4816_v5  ;;  %v1633_v55 = vadd.f32 %v1632_v61, %v4891_v54  ;;  %v3955_v0 = vpop.f32.mrb[31].mxu1  ;;  %v4995_v60 = vld [vmem:[%s5414_s11] sm:$0xff]  }
 0x9f2   : > { %v1762_v3 = vmul.f32 %v1636_v51, %v1636_v51  ;;  %v1637_v58 = vadd.f32 %v1633_v55, %v4819_v8  ;;  %v1760_v41 = vmul.f32 0.5, %v1636_v51 }
 0x9f4   : > { %v1764_v9 = vmul.f32 %v1762_v3, %v1636_v51  ;;  %v1763_v1 = vmul.f32 %v1637_v58, %v1637_v58  ;;  %v1761_v44 = vmul.f32 0.5, %v1637_v58 }
 0x9f6   : > { %v1766_v10 = vmul.f32 0.044715, %v1764_v9  ;;  %v1765_v7 = vmul.f32 %v1763_v1, %v1637_v58 }
 0x9f8   : > { %v1768_v11 = vadd.f32 %v1766_v10, %v1636_v51  ;;  %v1767_v12 = vmul.f32 0.044715, %v1765_v7 }
 0x9fa   : > { %v1770_v39 = vmul.f32 0.7978846, %v1768_v11  ;;  %v1769_v6 = vadd.f32 %v1767_v12, %v1637_v58 }
 0x9fc   : > { %4296 = vtanh.f32 %v1770_v39  ;;  %v1771_v42 = vmul.f32 0.7978846, %v1769_v6 }
 0x9fe   : > { %4298 = vtanh.f32 %v1771_v42 }
 0xa06   : > { %v4297_v13 = vpop.eup %4296 }
 0xa07   : > { %v1774_v43 = vadd.f32 1.0, %v4297_v13 }
 0xa08   : > { %v4299_v5 = vpop.eup %4298 }
 0xa09   : > { %v1775_v45 = vadd.f32 1.0, %v4299_v5  ;;  %v1776_v53 = vmul.f32 %v1774_v43, %v1760_v41 }
 0xa0b   : > { %v1777_v40 = vmul.f32 %v1775_v45, %v1761_v44 }
 0xa0d   : > { %v1778_v8 = vpack.c.bf16 %v1777_v40, %v1776_v53 }
 0xa0f   : > { %3969 = vmatpush3.bf16.msra.mxu0 %v1778_v8 }
 0xa12   : > { %3971 = vmatmul.mubr.msk.bf16.vlgmr.msra.gmra.mrb[36].mxu0 %vm658_vm2, %v4995_v60 }
 0xa60   : > { %v1751_v48 = vpop.f32.mrb[32].mxu1 }
 0xa61   : > { %v1752_v61 = vadd.f32 %v1751_v48, %v4888_v46  ;;  %v3966_v55 = vpop.f32.mrb[33].mxu1 }
 0xa62   : > { %v1754_v0 = vpop.f32.mrb[34].mxu1 }
 0xa63   : > { %v1758_v51 = vadd.f32 %v1752_v61, %v4845_v59  ;;  %v1755_v3 = vadd.f32 %v1754_v0, %v4891_v54  ;;  %v3967_v58 = vpop.f32.mrb[35].mxu1  ;;  %v4304_v61 = vld [vmem:[%s4626_s18] sm:$0xff] }
 0xa65   : > { %v1846_v9 = vmul.f32 %v1758_v51, %v1758_v51  ;;  %v1759_v1 = vadd.f32 %v1755_v3, %v4848_v63  ;;  %v1844_v44 = vmul.f32 0.5, %v1758_v51  ;;  %v5009_v3 = vpop.permute.xlu0 %1832 }
 0xa67   : > { %v1848_v10 = vmul.f32 %v1846_v9, %v1758_v51  ;;  %v1847_v7 = vmul.f32 %v1759_v1, %v1759_v1  ;;  %v1845_v45 = vmul.f32 0.5, %v1759_v1  ;;  %v4305_v9 = vld [vmem:[%s4626_s18 + $0x8] sm:$0xff] }
 0xa69   : > { %v1850_v11 = vmul.f32 0.044715, %v1848_v10  ;;  %v1849_v12 = vmul.f32 %v1847_v7, %v1759_v1  ;;  %v5013_v7 = vpop.permute.xlu1 %1837 }
 0xa6b   : > { %v1852_v39 = vadd.f32 %v1850_v11, %v1758_v51  ;;  %v1851_v6 = vmul.f32 0.044715, %v1849_v12 }
 0xa6d   : > { %v1854_v42 = vmul.f32 0.7978846, %v1852_v39  ;;  %v1853_v13 = vadd.f32 %v1851_v6, %v1759_v1 }
 0xa6f   : > { %4300 = vtanh.f32 %v1854_v42  ;;  %v1855_v43 = vmul.f32 0.7978846, %v1853_v13 }
 0xa71   : > { %4302 = vtanh.f32 %v1855_v43 }
 0xa79   : > { %v4301_v59 = vpop.eup %4300 }
 0xa7a   : > { %v1858_v5 = vadd.f32 1.0, %v4301_v59 }
 0xa7b   : > { %v4303_v41 = vpop.eup %4302 }
 0xa7c   : > { %v1859_v63 = vadd.f32 1.0, %v4303_v41  ;;  %v1860_v53 = vmul.f32 %v1858_v5, %v1844_v44 }
 0xa7e   : > { %v1861_v40 = vmul.f32 %v1859_v63, %v1845_v45 }
 0xa80   : > { %v1862_v8 = vpack.c.bf16 %v1861_v40, %v1860_v53 }
 0xa82   : > { %3975 = vmatpush3.bf16.msra.mxu1 %v1862_v8 }
 0xa85   : > { %3977 = vmatmul.mubr.msk.bf16.vlgmr.msra.gmra.mrb[36].mxu1 %vm658_vm2, %v4995_v60 }
 0xae5   : > { %v1821_v48 = vpop.f32.mrb[36].mxu0 }
 0xae6   : > { %v1828_v55 = vadd.f32 %v4304_v61, %v1821_v48  ;;  %v3972_v0 = vpop.f32.mrb[37].mxu0 }
 0xae7   : > { %v1824_v51 = vpop.f32.mrb[38].mxu0 }
 0xae8   : > { %v1840_v58 = vadd.f32 %v5009_v3, %v1828_v55  ;;  %v1829_v1 = vadd.f32 %v4305_v9, %v1824_v51  ;;  %v3973_v10 = vpop.f32.mrb[39].mxu0 }
 0xaea   : > { %1842 = vst.msk [vmem:[%s5015_s22] sm:$0xff] %vm658_vm2, %v1840_v58  ;;  %v1841_v11 = vadd.f32 %v5013_v7, %v1829_v1 }
 0xaec   : > { %1843 = vst.msk [vmem:[%s5015_s22 + $0x8] sm:$0xff] %vm658_vm2, %v1841_v11 }
 0xb58   : > { %v1897_v12 = vpop.f32.mrb[36].mxu1 }
 0xb59   : > { %1906 = vrot.lane.b32.xlu0 %v1897_v12, %s4476_s23  ;;  %v3978_v39 = vpop.f32.mrb[37].mxu1 }
 0xb5a   : > { %v1900_v6 = vpop.f32.mrb[38].mxu1 }
 0xb5b   : > { %1908 = vrot.lane.b32.xlu1 %v1900_v6, %s4476_s23  ;;  %v3979_v42 = vpop.f32.mrb[39].mxu1 }
 0xbcb   : > { %v1907_v13 = vpop.permute.xlu0 %1906 }
 0xbcc   : > { %v1912_v43 = vadd.f32 %v4304_v61, %v1907_v13 }
 0xbcd   : > { %v1909_v59 = vpop.permute.xlu1 %1908 }
 0xbce   : > { %v1914_v5 = vadd.f32 %v1912_v43, %v5009_v3  ;;  %v1913_v41 = vadd.f32 %v4305_v9, %v1909_v59 }
 0xbd0   : > { %1917 = vst.msk [vmem:[%s5015_s22] sm:$0xff] %vm1916_vm3, %v1914_v5  ;;  %v1915_v44 = vadd.f32 %v1913_v41, %v5013_v7 }
 0xbd2   : > { %1918 = vst.msk [vmem:[%s5015_s22 + $0x8] sm:$0xff] %vm1916_vm3, %v1915_v44 }
 0xbd3 LB: >> { %s3691_s19 = sshll.u32 %s4466_s29, 3  ;;  %v5441_v17 = vld [vmem:[#allocation11_spill] sm:$0xff]  ;;  %v5442_v16 = vld [vmem:[#allocation10_spill] sm:$0xff]  ;;  %v4477_v0 = vmov 0.0   ;;  %vm4478_vm4 = vmmov 0   ;;  %v5053_v51 = vcombine.low %v4657_v18, %v4662_v19  ;;  %v5058_v58 = vcombine.low %v4672_v21, %v4677_v22  ;;  %s1924_s29 = sadd.s32 1, %s4466_s29   ;;  %s4466_s29 = sphi %s5030_s29, %s1924_s29  }
 0xbd4   : >> { %s5037_s26 = scalar_lea.vmem %s5015_s22, %s3691_s19 [#allocation2]  ;;  %v5048_v55 = vcombine.low %v5442_v16, %v5441_v17  ;;  %3980 = vmatprep.subr.bf16.mxu0 %v4477_v0  ;;  %3984 = vmatprep.mubr.msk.bf16.mxu0 %vm4478_vm4, %v4477_v0  ;;  %v5066_v13 = vcombine.low %v4682_v23, %v4687_v24  ;;  %v5071_v43 = vcombine.low %v4692_v25, %v4697_v26  ;;  %p1921_p11 = scmp.ge.s32.totalorder %s1924_s29, 2  }
 0xbd5   : >> { %3988 = vmatprep.subr.bf16.mxu1 %v4477_v0  ;;  %4004 = vmatprep.mubr.msk.bf16.mxu1 %vm4478_vm4, %v4477_v0  ;;  %v5076_v59 = vcombine.low %v4702_v27, %v4707_v28  ;;  %v5081_v5 = vcombine.low %v4712_v29, %v4717_v30  ;;  %v5086_v41 = vcombine.low %v4722_v31, %v4727_v32 }
 0xbd6   : >> { %3981 = vmatpush3.bf16.msra.mxu0 %v5048_v55  ;;  %3989 = vmatpush3.bf16.msra.mxu1 %v5058_v58  ;;  %v5091_v44 = vcombine.low %v4732_v33, %v4737_v34 }
 0xbd7   : >> { %3982 = vmatprep.subr.bf16.mxu0 %v4477_v0  ;;  %3990 = vmatprep.subr.bf16.mxu1 %v4477_v0 }
 0xbd9   : >> { %v5040_v45 = vld [vmem:[%s5037_s26] sm:$0xff] }
 0xbda   : >> { %v1928_v63 = vsel %vm598_vm0, %v5040_v45, 0.0  ;;  %3983 = vmatpush3.bf16.msra.mxu0 %v5053_v51  ;;  %3991 = vmatpush3.bf16.msra.mxu1 %v5066_v13 }
 0xbdb   : >> { %1929 = vadd.xlane.f32.xlu0 %v1928_v63  ;;  %3992 = vmatprep.subr.bf16.mxu1 %v4477_v0  ;;  %v5096_v63 = vcombine.low %v4742_v35, %v4747_v36 }
 0xbde   : >> { %3993 = vmatpush3.bf16.msra.mxu1 %v5071_v43 }
 0xbdf   : >> { %3994 = vmatprep.subr.bf16.mxu1 %v4477_v0 }
 0xbe2   : >> { %3995 = vmatpush3.bf16.msra.mxu1 %v5076_v59 }
 0xbe3   : >> { %3996 = vmatprep.subr.bf16.mxu1 %v4477_v0 }
 0xbe6   : >> { %3997 = vmatpush3.bf16.msra.mxu1 %v5081_v5 }
 0xbe7   : >> { %3998 = vmatprep.subr.bf16.mxu1 %v4477_v0 }
 0xbea   : >> { %3999 = vmatpush3.bf16.msra.mxu1 %v5086_v41 }
 0xbeb   : >> { %4000 = vmatprep.subr.bf16.mxu1 %v4477_v0 }
 0xbee   : >> { %4001 = vmatpush3.bf16.msra.mxu1 %v5091_v44 }
 0xbef   : >> { %4002 = vmatprep.subr.bf16.mxu1 %v4477_v0 }
 0xbf2   : >> { %4003 = vmatpush3.bf16.msra.mxu1 %v5096_v63 }
 0xc68   : >> { %v1930_v53 = vpop.xlane.xlu0 %1929 }
 0xc69   : >> { %v1931_v40 = vmul.f32 0.03125, %v1930_v53 }
 0xc6b   : >> { %v1932_v8 = vsub.f32 %v5040_v45, %v1931_v40 }
 0xc6d   : >> { %v1933_v48 = vmul.f32 %v1932_v8, %v1932_v8 }
 0xc6f   : >> { %v1934_v61 = vsel %vm598_vm0, %v1933_v48, 0.0 }
 0xc70   : >> { %1935 = vadd.xlane.f32.xlu0 %v1934_v61 }
 0xcfd   : >> { %v1936_v9 = vpop.xlane.xlu0 %1935 }
 0xcfe   : >> { %v1937_v1 = vmul.f32 0.03125, %v1936_v9 }
 0xd00   : >> { %v1938_v10 = vadd.f32 1e-06, %v1937_v1 }
 0xd02   : >> { %4306 = vrsqrt.f32 %v1938_v10 }
 0xd0c   : >> { %v4307_v11 = vpop.eup %4306 }
 0xd0d   : >> { %v1940_v12 = vmul.f32 %v4307_v11, %v1932_v8 }
 0xd0f   : >> { %v1947_v39 = vmul.f32 %v4637_v14, %v1940_v12 }
 0xd11   : >> { %v1954_v6 = vadd.f32 %v4642_v15, %v1947_v39 }
 0xd13   : >> { %v1955_v42 = vpack.c.bf16 %v1954_v6, %v1954_v6 }
 0xd15   : >> { %3985 = vmatmul.mubr.msk.bf16.vlgmr.msra.gmra.mrb[0].mxu0 %vm598_vm0, %v1955_v42 }
 0xde8   : >> { %v2011_v53 = vpop.f32.mrb[0].mxu0 }
 0xde9   : >> { %v2012_v40 = vadd.f32 %v4667_v20, %v2011_v53  ;;  %v3986_v8 = vpop.f32.mrb[1].mxu0 }
 0xdea   : >> { %v2014_v48 = vpop.f32.mrb[2].mxu0 }
 0xdeb   : >> { %v2018_v61 = vmul.f32 %v2012_v40, %v2012_v40  ;;  %v3987_v9 = vpop.f32.mrb[3].mxu0  ;;  %v2017_v6 = vmul.f32 0.5, %v2012_v40 }
 0xded   : >> { %v2019_v1 = vmul.f32 %v2018_v61, %v2012_v40  ;;  %v5443_v61 = vmov (%p1921_p11), 0.0  }
 0xdee   : > { %4008 = vmatprep.subr.bf16.mxu0 (%p1921_p11), %v5443_v61  ;;  %4010 = vmatprep.mubr.msk.bf16.mxu0 (%p1921_p11), %vm4473_vm1, %v5443_v61 }
 0xdef   : >> { %v2020_v10 = vmul.f32 0.044715, %v2019_v1  ;;  %4014 = vmatprep.subr.bf16.mxu1 (%p1921_p11), %v5443_v61 }
 0xdf1   : >> { %v2021_v11 = vadd.f32 %v2020_v10, %v2012_v40  ;;  %v3704_v40 = vld [vmem:[%s4626_s18 + $0x18] sm:$0xff] (%p1921_p11) }
 0xdf3   : >> { %v2022_v12 = vmul.f32 0.7978846, %v2021_v11 }
 0xdf5   : >> { %4308 = vtanh.f32 %v2022_v12 }
 0xdff   : >> { %v4309_v39 = vpop.eup %4308 }
 0xe00   : >> { %v2024_v42 = vadd.f32 1.0, %v4309_v39 }
 0xe02   : >> { %v2025_v38 = vmul.f32 %v2024_v42, %v2017_v6 }
 0xe04   : >> { %v2026_v0 = vpack.c.bf16 %v2025_v38, %v2025_v38  ;;  %v3703_v38 = vld [vmem:[%s4626_s18 + $0x10] sm:$0xff] (%p1921_p11) }
 0xe06   : >> { %4005 = vmatmul.mubr.bf16.vlgmr.msra.gmra.mrb[0].mxu1 %v2026_v0 }
 0xe07   : > { %4016 = vmatprep.mubr.msk.bf16.mxu1 (%p1921_p11), %vm4473_vm1, %v5443_v61 }
 0xed8   : > { %1923 = sbr.rel (!%p1921_p11) target bundleno = 3027 (0xbd3), region = 141 }
 0xed9   : >> { %v2115_v16 = vpop.f32.mrb[0].mxu1 }
 0xeda   : >> { %v2116_v17 = vadd.f32 %v4752_v37, %v2115_v16  ;;  %v4006_v53 = vpop.f32.mrb[1].mxu1  ;;  %v2126_v16 = vsel (%p1921_p11), %vm598_vm0, %v3703_v38, 0.0 }
 0xedb   : >> { %v2118_v8 = vpop.f32.mrb[2].mxu1  ;;  %2127 = vadd.xlane.f32.xlu0 (%p1921_p11), %v2126_v16 }
 0xedc   : >> { %v2121_v48 = vadd.f32 %v2116_v17, %v5040_v45  ;;  %v4007_v9 = vpop.f32.mrb[3].mxu1  ;;  %v2129_v17 = vsel (%p1921_p11), %vm598_vm0, %v3704_v40, 0.0 }
 0xede   : >> { %2122 = vst.msk [vmem:[%s5037_s26] sm:$0xff] %vm598_vm0, %v2121_v48 }
 0xedf   : > { %2130 = vadd.xlane.f32.xlu0 %v2129_v17 }
 0xf68   : > { %v2128_v18 = vpop.xlane.xlu0 %2127 }
 0xf69   : > { %v2132_v19 = vmul.f32 0.03125, %v2128_v18 }
 0xf6b   : > { %v2134_v21 = vsub.f32 %v3703_v38, %v2132_v19 }
 0xf6c   : > { %v2131_v22 = vpop.xlane.xlu0 %2130 }
 0xf6d   : > { %v2133_v23 = vmul.f32 0.03125, %v2131_v22  ;;  %v2136_v24 = vmul.f32 %v2134_v21, %v2134_v21 }
 0xf6f   : > { %v2135_v25 = vsub.f32 %v3704_v40, %v2133_v23  ;;  %v2138_v26 = vsel %vm598_vm0, %v2136_v24, 0.0 }
 0xf70   : > { %2139 = vadd.xlane.f32.xlu1 %v2138_v26 }
 0xf71   : > { %v2137_v27 = vmul.f32 %v2135_v25, %v2135_v25 }
 0xf73   : > { %v2141_v28 = vsel %vm598_vm0, %v2137_v27, 0.0 }
 0xf74   : > { %2142 = vadd.xlane.f32.xlu1 %v2141_v28 }
 0xffd   : > { %v2140_v29 = vpop.xlane.xlu1 %2139 }
 0xffe   : > { %v2144_v30 = vmul.f32 0.03125, %v2140_v29 }
0x1000   : > { %v2146_v31 = vadd.f32 1e-06, %v2144_v30 }
0x1001   : > { %v2143_v32 = vpop.xlane.xlu1 %2142 }
0x1002   : > { %4310 = vrsqrt.f32 %v2146_v31  ;;  %v2145_v33 = vmul.f32 0.03125, %v2143_v32 }
0x1004   : > { %v2147_v34 = vadd.f32 1e-06, %v2145_v33 }
0x1006   : > { %4312 = vrsqrt.f32 %v2147_v34 }
0x100c   : > { %v4311_v35 = vpop.eup %4310 }
0x100d   : > { %v2150_v36 = vmul.f32 %v4311_v35, %v2134_v21 }
0x100f   : > { %v2152_v10 = vmul.f32 %v4769_v50, %v2150_v36 }
0x1010   : > { %v4313_v45 = vpop.eup %4312 }
0x1011   : > { %v2151_v1 = vmul.f32 %v4313_v45, %v2135_v25  ;;  %v2154_v12 = vadd.f32 %v4781_v56, %v2152_v10 }
0x1013   : > { %v2153_v11 = vmul.f32 %v4769_v50, %v2151_v1 }
0x1015   : > { %v2155_v39 = vadd.f32 %v4781_v56, %v2153_v11 }
0x1017   : > { %v2156_v6 = vpack.c.bf16 %v2155_v39, %v2154_v12 }
0x1019   : > { %2199 = vrot.lane.b32.xlu0 %v2156_v6, %s4475_s30  ;;  %4009 = vmatpush3.bf16.msra.mxu0 %v2156_v6 }
0x101a   : > { %4020 = vmatprep.subr.bf16.mxu0 %v5443_v61 }
0x101c   : > { %4011 = vmatmul.mubr.msk.bf16.vlgmr.msra.gmra.mrb[0].mxu0 %vm658_vm2, %v4792_v62 }
0x101d   : > { %4022 = vmatprep.mubr.msk.bf16.mxu0 %vm4473_vm1, %v5443_v61 }
0x108b   : > { %v2200_v42 = vpop.permute.xlu0 %2199 }
0x108c   : > { %4015 = vmatpush3.bf16.msra.mxu1 %v2200_v42 }
0x108d   : > { %4026 = vmatprep.subr.bf16.mxu1 %v5443_v61 }
0x108f   : > { %4017 = vmatmul.mubr.msk.bf16.vlgmr.msra.gmra.mrb[0].mxu1 %vm658_vm2, %v4792_v62 }
0x1090   : > { %4028 = vmatprep.mubr.msk.bf16.mxu1 %vm4473_vm1, %v5443_v61 }
0x10ef   : > { %v2191_v50 = vpop.f32.mrb[0].mxu0 }
0x10f0   : > { %v5135_v56 = vadd.f32 %v2191_v50, %v4811_v2  ;;  %v4012_v0 = vpop.f32.mrb[1].mxu0 }
0x10f1   : > { %v2194_v53 = vpop.f32.mrb[2].mxu0 }
0x10f2   : > { %v5138_v8 = vadd.f32 %v2194_v53, %v4813_v4  ;;  %v2245_v48 = vmul.f32 %v5135_v56, %v5135_v56  ;;  %v4013_v9 = vpop.f32.mrb[3].mxu0  ;;  %v2243_v23 = vmul.f32 0.5, %v5135_v56 }
0x10f4   : > { %v2246_v38 = vmul.f32 %v5138_v8, %v5138_v8  ;;  %v2247_v62 = vmul.f32 %v2245_v48, %v5135_v56  ;;  %v2244_v25 = vmul.f32 0.5, %v5138_v8 }
0x10f6   : > { %v2248_v40 = vmul.f32 %v2246_v38, %v5138_v8  ;;  %v2249_v16 = vmul.f32 0.044715, %v2247_v62 }
0x10f8   : > { %v2250_v17 = vmul.f32 0.044715, %v2248_v40  ;;  %v2251_v18 = vadd.f32 %v2249_v16, %v5135_v56 }
0x10fa   : > { %v2252_v19 = vadd.f32 %v2250_v17, %v5138_v8  ;;  %v2253_v21 = vmul.f32 0.7978846, %v2251_v18 }
0x10fc   : > { %v2254_v22 = vmul.f32 0.7978846, %v2252_v19  ;;  %4314 = vtanh.f32 %v2253_v21 }
0x10fe   : > { %4316 = vtanh.f32 %v2254_v22 }
0x1106   : > { %v4315_v24 = vpop.eup %4314 }
0x1107   : > { %v2257_v26 = vadd.f32 1.0, %v4315_v24 }
0x1108   : > { %v4317_v27 = vpop.eup %4316 }
0x1109   : > { %v2258_v28 = vadd.f32 1.0, %v4317_v27  ;;  %v2259_v29 = vmul.f32 %v2257_v26, %v2243_v23 }
0x110b   : > { %v2260_v30 = vmul.f32 %v2258_v28, %v2244_v25 }
0x110d   : > { %v2261_v31 = vpack.c.bf16 %v2260_v30, %v2259_v29 }
0x110f   : > { %4021 = vmatpush3.bf16.msra.mxu0 %v2261_v31 }
0x1110   : > { %4032 = vmatprep.subr.bf16.mxu0 %v5443_v61 }
0x1112   : > { %4023 = vmatmul.mubr.msk.bf16.vlgmr.msra.gmra.mrb[4].mxu0 %vm658_vm2, %v4837_v57 }
0x1113   : > { %4034 = vmatprep.mubr.msk.bf16.mxu0 %vm4473_vm1, %v5443_v61 }
0x1162   : > { %v2236_v32 = vpop.f32.mrb[0].mxu1 }
0x1163   : > { %v5156_v33 = vadd.f32 %v2236_v32, %v4811_v2  ;;  %v4018_v34 = vpop.f32.mrb[1].mxu1 }
0x1164   : > { %v2239_v35 = vpop.f32.mrb[2].mxu1 }
0x1165   : > { %v5159_v36 = vadd.f32 %v2239_v35, %v4813_v4  ;;  %v4019_v45 = vpop.f32.mrb[3].mxu1  ;;  %v2367_v1 = vmul.f32 %v5156_v33, %v5156_v33  ;;  %v2365_v9 = vmul.f32 0.5, %v5156_v33 }
0x1167   : > { %v2368_v10 = vmul.f32 %v5159_v36, %v5159_v36  ;;  %v2369_v11 = vmul.f32 %v2367_v1, %v5156_v33  ;;  %v2366_v38 = vmul.f32 0.5, %v5159_v36 }
0x1169   : > { %v2370_v12 = vmul.f32 %v2368_v10, %v5159_v36  ;;  %v2371_v39 = vmul.f32 0.044715, %v2369_v11 }
0x116b   : > { %v2372_v6 = vmul.f32 0.044715, %v2370_v12  ;;  %v2373_v2 = vadd.f32 %v2371_v39, %v5156_v33 }
0x116d   : > { %v2374_v42 = vadd.f32 %v2372_v6, %v5159_v36  ;;  %v2375_v50 = vmul.f32 0.7978846, %v2373_v2 }
0x116f   : > { %v2376_v4 = vmul.f32 0.7978846, %v2374_v42  ;;  %4318 = vtanh.f32 %v2375_v50 }
0x1171   : > { %4320 = vtanh.f32 %v2376_v4 }
0x1179   : > { %v4319_v0 = vpop.eup %4318 }
0x117a   : > { %v2379_v53 = vadd.f32 1.0, %v4319_v0 }
0x117b   : > { %v4321_v48 = vpop.eup %4320 }
0x117c   : > { %v2380_v62 = vadd.f32 1.0, %v4321_v48  ;;  %v2381_v40 = vmul.f32 %v2379_v53, %v2365_v9 }
0x117e   : > { %v2382_v16 = vmul.f32 %v2380_v62, %v2366_v38 }
0x1180   : > { %v2383_v17 = vpack.c.bf16 %v2382_v16, %v2381_v40 }
0x1182   : > { %4033 = vmatpush3.bf16.msra.mxu0 %v2383_v17 }
0x1183   : > { %4044 = vmatprep.subr.bf16.mxu0 %v5443_v61 }
0x1185   : > { %4035 = vmatmul.mubr.msk.bf16.vlgmr.msra.gmra.mrb[8].mxu0 %vm658_vm2, %v4837_v57 }
0x1186   : > { %4046 = vmatprep.mubr.msk.bf16.mxu0 %vm4473_vm1, %v5443_v61 }
0x11e5   : > { %v2296_v18 = vpop.f32.mrb[4].mxu0 }
0x11e6   : > { %v2297_v19 = vadd.f32 %v2296_v18, %v4865_v49  ;;  %v4024_v21 = vpop.f32.mrb[5].mxu0 }
0x11e7   : > { %v2299_v22 = vpop.f32.mrb[6].mxu0 }
0x11e8   : > { %v2305_v23 = vmul.f32 %v2297_v19, %v2297_v19  ;;  %v2300_v24 = vadd.f32 %v2299_v22, %v4867_v52  ;;  %v4025_v25 = vpop.f32.mrb[7].mxu0  ;;  %v2303_v45 = vmul.f32 0.5, %v2297_v19 }
0x11ea   : > { %v2307_v26 = vmul.f32 %v2305_v23, %v2297_v19  ;;  %v2306_v27 = vmul.f32 %v2300_v24, %v2300_v24  ;;  %v2304_v10 = vmul.f32 0.5, %v2300_v24 }
0x11ec   : > { %v2309_v28 = vmul.f32 0.044715, %v2307_v26  ;;  %v2308_v29 = vmul.f32 %v2306_v27, %v2300_v24 }
0x11ee   : > { %v2311_v30 = vadd.f32 %v2309_v28, %v2297_v19  ;;  %v2310_v31 = vmul.f32 0.044715, %v2308_v29 }
0x11f0   : > { %v2313_v32 = vmul.f32 0.7978846, %v2311_v30  ;;  %v2312_v34 = vadd.f32 %v2310_v31, %v2300_v24 }
0x11f2   : > { %4322 = vtanh.f32 %v2313_v32  ;;  %v2314_v35 = vmul.f32 0.7978846, %v2312_v34 }
0x11f4   : > { %4324 = vtanh.f32 %v2314_v35 }
0x11fc   : > { %v4323_v1 = vpop.eup %4322 }
0x11fd   : > { %v2317_v11 = vadd.f32 1.0, %v4323_v1 }
0x11fe   : > { %v4325_v12 = vpop.eup %4324 }
0x11ff   : > { %v2318_v39 = vadd.f32 1.0, %v4325_v12  ;;  %v2319_v6 = vmul.f32 %v2317_v11, %v2303_v45 }
0x1201   : > { %v2320_v2 = vmul.f32 %v2318_v39, %v2304_v10 }
0x1203   : > { %v2321_v42 = vpack.c.bf16 %v2320_v2, %v2319_v6 }
0x1205   : > { %4027 = vmatpush3.bf16.msra.mxu1 %v2321_v42 }
0x1206   : > { %4038 = vmatprep.subr.bf16.mxu1 %v5443_v61 }
0x1208   : > { %4029 = vmatmul.mubr.msk.bf16.vlgmr.msra.gmra.mrb[4].mxu1 %vm658_vm2, %v4874_v47 }
0x1209   : > { %4040 = vmatprep.mubr.msk.bf16.mxu1 %vm4473_vm1, %v5443_v61 }
0x1258   : > { %v2418_v50 = vpop.f32.mrb[8].mxu0 }
0x1259   : > { %v2419_v4 = vadd.f32 %v2418_v50, %v4865_v49  ;;  %v4036_v0 = vpop.f32.mrb[9].mxu0 }
0x125a   : > { %v2421_v53 = vpop.f32.mrb[10].mxu0 }
0x125b   : > { %v2427_v48 = vmul.f32 %v2419_v4, %v2419_v4  ;;  %v2422_v9 = vadd.f32 %v2421_v53, %v4867_v52  ;;  %v4037_v38 = vpop.f32.mrb[11].mxu0  ;;  %v2425_v27 = vmul.f32 0.5, %v2419_v4 }
0x125d   : > { %v2429_v62 = vmul.f32 %v2427_v48, %v2419_v4  ;;  %v2428_v40 = vmul.f32 %v2422_v9, %v2422_v9  ;;  %v2426_v28 = vmul.f32 0.5, %v2422_v9 }
0x125f   : > { %v2431_v16 = vmul.f32 0.044715, %v2429_v62  ;;  %v2430_v17 = vmul.f32 %v2428_v40, %v2422_v9 }
0x1261   : > { %v2433_v18 = vadd.f32 %v2431_v16, %v2419_v4  ;;  %v2432_v19 = vmul.f32 0.044715, %v2430_v17 }
0x1263   : > { %v2435_v21 = vmul.f32 0.7978846, %v2433_v18  ;;  %v2434_v22 = vadd.f32 %v2432_v19, %v2422_v9 }
0x1265   : > { %4326 = vtanh.f32 %v2435_v21  ;;  %v2436_v23 = vmul.f32 0.7978846, %v2434_v22 }
0x1267   : > { %4328 = vtanh.f32 %v2436_v23 }
0x126f   : > { %v4327_v24 = vpop.eup %4326 }
0x1270   : > { %v2439_v25 = vadd.f32 1.0, %v4327_v24 }
0x1271   : > { %v4329_v26 = vpop.eup %4328 }
0x1272   : > { %v2440_v29 = vadd.f32 1.0, %v4329_v26  ;;  %v2441_v30 = vmul.f32 %v2439_v25, %v2425_v27 }
0x1274   : > { %v2442_v31 = vmul.f32 %v2440_v29, %v2426_v28 }
0x1276   : > { %v2443_v32 = vpack.c.bf16 %v2442_v31, %v2441_v30 }
0x1278   : > { %4039 = vmatpush3.bf16.msra.mxu1 %v2443_v32 }
0x1279   : > { %4050 = vmatprep.subr.bf16.mxu1 %v5443_v61 }
0x127b   : > { %4041 = vmatmul.mubr.msk.bf16.vlgmr.msra.gmra.mrb[8].mxu1 %vm658_vm2, %v4874_v47 }
0x127c   : > { %4052 = vmatprep.mubr.msk.bf16.mxu1 %vm4473_vm1, %v5443_v61 }
0x12db   : > { %v2356_v34 = vpop.f32.mrb[4].mxu1 }
0x12dc   : > { %v2357_v35 = vadd.f32 %v2356_v34, %v4888_v46  ;;  %v4030_v45 = vpop.f32.mrb[5].mxu1 }
0x12dd   : > { %v2359_v1 = vpop.f32.mrb[6].mxu1 }
0x12de   : > { %v2363_v10 = vadd.f32 %v2357_v35, %v5135_v56  ;;  %v2360_v11 = vadd.f32 %v2359_v1, %v4891_v54  ;;  %v4031_v12 = vpop.f32.mrb[7].mxu1 }
0x12e0   : > { %v2489_v39 = vmul.f32 %v2363_v10, %v2363_v10  ;;  %v2364_v6 = vadd.f32 %v2360_v11, %v5138_v8  ;;  %v2487_v17 = vmul.f32 0.5, %v2363_v10 }
0x12e2   : > { %v2491_v2 = vmul.f32 %v2489_v39, %v2363_v10  ;;  %v2490_v42 = vmul.f32 %v2364_v6, %v2364_v6  ;;  %v2488_v18 = vmul.f32 0.5, %v2364_v6 }
0x12e4   : > { %v2493_v50 = vmul.f32 0.044715, %v2491_v2  ;;  %v2492_v4 = vmul.f32 %v2490_v42, %v2364_v6 }
0x12e6   : > { %v2495_v0 = vadd.f32 %v2493_v50, %v2363_v10  ;;  %v2494_v53 = vmul.f32 0.044715, %v2492_v4 }
0x12e8   : > { %v2497_v48 = vmul.f32 0.7978846, %v2495_v0  ;;  %v2496_v9 = vadd.f32 %v2494_v53, %v2364_v6 }
0x12ea   : > { %4330 = vtanh.f32 %v2497_v48  ;;  %v2498_v38 = vmul.f32 0.7978846, %v2496_v9 }
0x12ec   : > { %4332 = vtanh.f32 %v2498_v38 }
0x12f4   : > { %v4331_v62 = vpop.eup %4330 }
0x12f5   : > { %v2501_v40 = vadd.f32 1.0, %v4331_v62 }
0x12f6   : > { %v4333_v16 = vpop.eup %4332 }
0x12f7   : > { %v2502_v19 = vadd.f32 1.0, %v4333_v16  ;;  %v2503_v21 = vmul.f32 %v2501_v40, %v2487_v17 }
0x12f9   : > { %v2504_v22 = vmul.f32 %v2502_v19, %v2488_v18 }
0x12fb   : > { %v2505_v23 = vpack.c.bf16 %v2504_v22, %v2503_v21 }
0x12fd   : > { %4045 = vmatpush3.bf16.msra.mxu0 %v2505_v23 }
0x12fe   : > { %4056 = vmatprep.subr.bf16.mxu0 %v5443_v61 }
0x1300   : > { %4047 = vmatmul.mubr.msk.bf16.vlgmr.msra.gmra.mrb[12].mxu0 %vm658_vm2, %v4837_v57 }
0x1301   : > { %4058 = vmatprep.mubr.msk.bf16.mxu0 %vm4473_vm1, %v5443_v61 }
0x134e   : > { %v2478_v24 = vpop.f32.mrb[8].mxu1 }
0x134f   : > { %v2479_v25 = vadd.f32 %v2478_v24, %v4888_v46  ;;  %v4042_v26 = vpop.f32.mrb[9].mxu1 }
0x1350   : > { %v2481_v27 = vpop.f32.mrb[10].mxu1 }
0x1351   : > { %v2485_v28 = vadd.f32 %v2479_v25, %v5156_v33  ;;  %v2482_v29 = vadd.f32 %v2481_v27, %v4891_v54  ;;  %v4043_v30 = vpop.f32.mrb[11].mxu1 }
0x1353   : > { %v2611_v31 = vmul.f32 %v2485_v28, %v2485_v28  ;;  %v2486_v32 = vadd.f32 %v2482_v29, %v5159_v36  ;;  %v2609_v4 = vmul.f32 0.5, %v2485_v28 }
0x1355   : > { %v2613_v34 = vmul.f32 %v2611_v31, %v2485_v28  ;;  %v2612_v35 = vmul.f32 %v2486_v32, %v2486_v32  ;;  %v2610_v0 = vmul.f32 0.5, %v2486_v32 }
0x1357   : > { %v2615_v45 = vmul.f32 0.044715, %v2613_v34  ;;  %v2614_v1 = vmul.f32 %v2612_v35, %v2486_v32 }
0x1359   : > { %v2617_v10 = vadd.f32 %v2615_v45, %v2485_v28  ;;  %v2616_v11 = vmul.f32 0.044715, %v2614_v1 }
0x135b   : > { %v2619_v12 = vmul.f32 0.7978846, %v2617_v10  ;;  %v2618_v39 = vadd.f32 %v2616_v11, %v2486_v32 }
0x135d   : > { %4334 = vtanh.f32 %v2619_v12  ;;  %v2620_v6 = vmul.f32 0.7978846, %v2618_v39 }
0x135f   : > { %4336 = vtanh.f32 %v2620_v6 }
0x1367   : > { %v4335_v2 = vpop.eup %4334 }
0x1368   : > { %v2623_v42 = vadd.f32 1.0, %v4335_v2 }
0x1369   : > { %v4337_v50 = vpop.eup %4336 }
0x136a   : > { %v2624_v53 = vadd.f32 1.0, %v4337_v50  ;;  %v2625_v48 = vmul.f32 %v2623_v42, %v2609_v4 }
0x136c   : > { %v2626_v9 = vmul.f32 %v2624_v53, %v2610_v0 }
0x136e   : > { %v2627_v38 = vpack.c.bf16 %v2626_v9, %v2625_v48 }
0x1370   : > { %4057 = vmatpush3.bf16.msra.mxu0 %v2627_v38 }
0x1371   : > { %4068 = vmatprep.subr.bf16.mxu0 %v5443_v61 }
0x1373   : > { %4059 = vmatmul.mubr.msk.bf16.vlgmr.msra.gmra.mrb[16].mxu0 %vm658_vm2, %v4837_v57 }
0x1374   : > { %4070 = vmatprep.mubr.msk.bf16.mxu0 %vm4473_vm1, %v5443_v61 }
0x13d3   : > { %v2540_v62 = vpop.f32.mrb[12].mxu0 }
0x13d4   : > { %v2541_v40 = vadd.f32 %v2540_v62, %v4865_v49  ;;  %v4048_v16 = vpop.f32.mrb[13].mxu0 }
0x13d5   : > { %v2543_v17 = vpop.f32.mrb[14].mxu0 }
0x13d6   : > { %v2549_v18 = vmul.f32 %v2541_v40, %v2541_v40  ;;  %v2544_v19 = vadd.f32 %v2543_v17, %v4867_v52  ;;  %v4049_v21 = vpop.f32.mrb[15].mxu0  ;;  %v2547_v31 = vmul.f32 0.5, %v2541_v40 }
0x13d8   : > { %v2551_v22 = vmul.f32 %v2549_v18, %v2541_v40  ;;  %v2550_v23 = vmul.f32 %v2544_v19, %v2544_v19  ;;  %v2548_v34 = vmul.f32 0.5, %v2544_v19 }
0x13da   : > { %v2553_v24 = vmul.f32 0.044715, %v2551_v22  ;;  %v2552_v25 = vmul.f32 %v2550_v23, %v2544_v19 }
0x13dc   : > { %v2555_v26 = vadd.f32 %v2553_v24, %v2541_v40  ;;  %v2554_v27 = vmul.f32 0.044715, %v2552_v25 }
0x13de   : > { %v2557_v28 = vmul.f32 0.7978846, %v2555_v26  ;;  %v2556_v29 = vadd.f32 %v2554_v27, %v2544_v19 }
0x13e0   : > { %4338 = vtanh.f32 %v2557_v28  ;;  %v2558_v30 = vmul.f32 0.7978846, %v2556_v29 }
0x13e2   : > { %4340 = vtanh.f32 %v2558_v30 }
0x13ea   : > { %v4339_v32 = vpop.eup %4338 }
0x13eb   : > { %v2561_v35 = vadd.f32 1.0, %v4339_v32 }
0x13ec   : > { %v4341_v45 = vpop.eup %4340 }
0x13ed   : > { %v2562_v1 = vadd.f32 1.0, %v4341_v45  ;;  %v2563_v10 = vmul.f32 %v2561_v35, %v2547_v31 }
0x13ef   : > { %v2564_v11 = vmul.f32 %v2562_v1, %v2548_v34 }
0x13f1   : > { %v2565_v12 = vpack.c.bf16 %v2564_v11, %v2563_v10 }
0x13f3   : > { %4051 = vmatpush3.bf16.msra.mxu1 %v2565_v12 }
0x13f4   : > { %4062 = vmatprep.subr.bf16.mxu1 %v5443_v61 }
0x13f6   : > { %4053 = vmatmul.mubr.msk.bf16.vlgmr.msra.gmra.mrb[12].mxu1 %vm658_vm2, %v4874_v47 }
0x13f7   : > { %4064 = vmatprep.mubr.msk.bf16.mxu1 %vm4473_vm1, %v5443_v61 }
0x1446   : > { %v2662_v39 = vpop.f32.mrb[16].mxu0 }
0x1447   : > { %v2663_v6 = vadd.f32 %v2662_v39, %v4865_v49  ;;  %v4060_v2 = vpop.f32.mrb[17].mxu0 }
0x1448   : > { %v2665_v42 = vpop.f32.mrb[18].mxu0 }
0x1449   : > { %v2671_v50 = vmul.f32 %v2663_v6, %v2663_v6  ;;  %v2666_v4 = vadd.f32 %v2665_v42, %v4867_v52  ;;  %v4061_v0 = vpop.f32.mrb[19].mxu0  ;;  %v2669_v23 = vmul.f32 0.5, %v2663_v6 }
0x144b   : > { %v2673_v53 = vmul.f32 %v2671_v50, %v2663_v6  ;;  %v2672_v48 = vmul.f32 %v2666_v4, %v2666_v4  ;;  %v2670_v24 = vmul.f32 0.5, %v2666_v4 }
0x144d   : > { %v2675_v9 = vmul.f32 0.044715, %v2673_v53  ;;  %v2674_v38 = vmul.f32 %v2672_v48, %v2666_v4 }
0x144f   : > { %v2677_v62 = vadd.f32 %v2675_v9, %v2663_v6  ;;  %v2676_v40 = vmul.f32 0.044715, %v2674_v38 }
0x1451   : > { %v2679_v16 = vmul.f32 0.7978846, %v2677_v62  ;;  %v2678_v17 = vadd.f32 %v2676_v40, %v2666_v4 }
0x1453   : > { %4342 = vtanh.f32 %v2679_v16  ;;  %v2680_v18 = vmul.f32 0.7978846, %v2678_v17 }
0x1455   : > { %4344 = vtanh.f32 %v2680_v18 }
0x145d   : > { %v4343_v19 = vpop.eup %4342 }
0x145e   : > { %v2683_v21 = vadd.f32 1.0, %v4343_v19 }
0x145f   : > { %v4345_v22 = vpop.eup %4344 }
0x1460   : > { %v2684_v25 = vadd.f32 1.0, %v4345_v22  ;;  %v2685_v26 = vmul.f32 %v2683_v21, %v2669_v23 }
0x1462   : > { %v2686_v27 = vmul.f32 %v2684_v25, %v2670_v24 }
0x1464   : > { %v2687_v28 = vpack.c.bf16 %v2686_v27, %v2685_v26 }
0x1466   : > { %4063 = vmatpush3.bf16.msra.mxu1 %v2687_v28 }
0x1467   : > { %4074 = vmatprep.subr.bf16.mxu1 %v5443_v61 }
0x1469   : > { %4065 = vmatmul.mubr.msk.bf16.vlgmr.msra.gmra.mrb[16].mxu1 %vm658_vm2, %v4874_v47 }
0x146a   : > { %4076 = vmatprep.mubr.msk.bf16.mxu1 %vm4473_vm1, %v5443_v61 }
0x14c9   : > { %v2600_v29 = vpop.f32.mrb[12].mxu1 }
0x14ca   : > { %v2601_v30 = vadd.f32 %v2600_v29, %v4888_v46  ;;  %v4054_v31 = vpop.f32.mrb[13].mxu1 }
0x14cb   : > { %v2603_v32 = vpop.f32.mrb[14].mxu1 }
0x14cc   : > { %v2607_v34 = vadd.f32 %v2601_v30, %v5135_v56  ;;  %v2604_v35 = vadd.f32 %v2603_v32, %v4891_v54  ;;  %v4055_v45 = vpop.f32.mrb[15].mxu1 }
0x14ce   : > { %v2733_v1 = vmul.f32 %v2607_v34, %v2607_v34  ;;  %v2608_v10 = vadd.f32 %v2604_v35, %v5138_v8  ;;  %v2731_v38 = vmul.f32 0.5, %v2607_v34 }
0x14d0   : > { %v2735_v11 = vmul.f32 %v2733_v1, %v2607_v34  ;;  %v2734_v12 = vmul.f32 %v2608_v10, %v2608_v10  ;;  %v2732_v62 = vmul.f32 0.5, %v2608_v10 }
0x14d2   : > { %v2737_v39 = vmul.f32 0.044715, %v2735_v11  ;;  %v2736_v6 = vmul.f32 %v2734_v12, %v2608_v10 }
0x14d4   : > { %v2739_v2 = vadd.f32 %v2737_v39, %v2607_v34  ;;  %v2738_v42 = vmul.f32 0.044715, %v2736_v6 }
0x14d6   : > { %v2741_v50 = vmul.f32 0.7978846, %v2739_v2  ;;  %v2740_v4 = vadd.f32 %v2738_v42, %v2608_v10 }
0x14d8   : > { %4346 = vtanh.f32 %v2741_v50  ;;  %v2742_v0 = vmul.f32 0.7978846, %v2740_v4 }
0x14da   : > { %4348 = vtanh.f32 %v2742_v0 }
0x14e2   : > { %v4347_v53 = vpop.eup %4346 }
0x14e3   : > { %v2745_v48 = vadd.f32 1.0, %v4347_v53 }
0x14e4   : > { %v4349_v9 = vpop.eup %4348 }
0x14e5   : > { %v2746_v40 = vadd.f32 1.0, %v4349_v9  ;;  %v2747_v16 = vmul.f32 %v2745_v48, %v2731_v38 }
0x14e7   : > { %v2748_v17 = vmul.f32 %v2746_v40, %v2732_v62 }
0x14e9   : > { %v2749_v18 = vpack.c.bf16 %v2748_v17, %v2747_v16 }
0x14eb   : > { %4069 = vmatpush3.bf16.msra.mxu0 %v2749_v18 }
0x14ec   : > { %4080 = vmatprep.subr.bf16.mxu0 %v5443_v61 }
0x14ee   : > { %4071 = vmatmul.mubr.msk.bf16.vlgmr.msra.gmra.mrb[20].mxu0 %vm658_vm2, %v4837_v57 }
0x14ef   : > { %4082 = vmatprep.mubr.msk.bf16.mxu0 %vm4473_vm1, %v5443_v61 }
0x153c   : > { %v2722_v19 = vpop.f32.mrb[16].mxu1 }
0x153d   : > { %v2723_v21 = vadd.f32 %v2722_v19, %v4888_v46  ;;  %v4066_v22 = vpop.f32.mrb[17].mxu1 }
0x153e   : > { %v2725_v23 = vpop.f32.mrb[18].mxu1 }
0x153f   : > { %v2729_v24 = vadd.f32 %v2723_v21, %v5156_v33  ;;  %v2726_v25 = vadd.f32 %v2725_v23, %v4891_v54  ;;  %v4067_v26 = vpop.f32.mrb[19].mxu1 }
0x1541   : > { %v2855_v27 = vmul.f32 %v2729_v24, %v2729_v24  ;;  %v2730_v28 = vadd.f32 %v2726_v25, %v5159_v36  ;;  %v2853_v6 = vmul.f32 0.5, %v2729_v24 }
0x1543   : > { %v2857_v29 = vmul.f32 %v2855_v27, %v2729_v24  ;;  %v2856_v30 = vmul.f32 %v2730_v28, %v2730_v28  ;;  %v2854_v2 = vmul.f32 0.5, %v2730_v28 }
0x1545   : > { %v2859_v31 = vmul.f32 0.044715, %v2857_v29  ;;  %v2858_v32 = vmul.f32 %v2856_v30, %v2730_v28 }
0x1547   : > { %v2861_v34 = vadd.f32 %v2859_v31, %v2729_v24  ;;  %v2860_v35 = vmul.f32 0.044715, %v2858_v32 }
0x1549   : > { %v2863_v45 = vmul.f32 0.7978846, %v2861_v34  ;;  %v2862_v1 = vadd.f32 %v2860_v35, %v2730_v28 }
0x154b   : > { %4350 = vtanh.f32 %v2863_v45  ;;  %v2864_v10 = vmul.f32 0.7978846, %v2862_v1 }
0x154d   : > { %4352 = vtanh.f32 %v2864_v10 }
0x1555   : > { %v4351_v11 = vpop.eup %4350 }
0x1556   : > { %v2867_v12 = vadd.f32 1.0, %v4351_v11 }
0x1557   : > { %v4353_v39 = vpop.eup %4352 }
0x1558   : > { %v2868_v42 = vadd.f32 1.0, %v4353_v39  ;;  %v2869_v50 = vmul.f32 %v2867_v12, %v2853_v6 }
0x155a   : > { %v2870_v4 = vmul.f32 %v2868_v42, %v2854_v2 }
0x155c   : > { %v2871_v0 = vpack.c.bf16 %v2870_v4, %v2869_v50 }
0x155e   : > { %4081 = vmatpush3.bf16.msra.mxu0 %v2871_v0 }
0x155f   : > { %4092 = vmatprep.subr.bf16.mxu0 %v5443_v61 }
0x1561   : > { %4083 = vmatmul.mubr.msk.bf16.vlgmr.msra.gmra.mrb[24].mxu0 %vm658_vm2, %v4837_v57 }
0x1562   : > { %4094 = vmatprep.mubr.msk.bf16.mxu0 %vm4473_vm1, %v5443_v61 }
0x15c1   : > { %v2784_v53 = vpop.f32.mrb[20].mxu0 }
0x15c2   : > { %v2785_v48 = vadd.f32 %v2784_v53, %v4865_v49  ;;  %v4072_v9 = vpop.f32.mrb[21].mxu0 }
0x15c3   : > { %v2787_v38 = vpop.f32.mrb[22].mxu0 }
0x15c4   : > { %v2793_v62 = vmul.f32 %v2785_v48, %v2785_v48  ;;  %v2788_v40 = vadd.f32 %v2787_v38, %v4867_v52  ;;  %v4073_v16 = vpop.f32.mrb[23].mxu0  ;;  %v2791_v27 = vmul.f32 0.5, %v2785_v48 }
0x15c6   : > { %v2795_v17 = vmul.f32 %v2793_v62, %v2785_v48  ;;  %v2794_v18 = vmul.f32 %v2788_v40, %v2788_v40  ;;  %v2792_v29 = vmul.f32 0.5, %v2788_v40 }
0x15c8   : > { %v2797_v19 = vmul.f32 0.044715, %v2795_v17  ;;  %v2796_v21 = vmul.f32 %v2794_v18, %v2788_v40 }
0x15ca   : > { %v2799_v22 = vadd.f32 %v2797_v19, %v2785_v48  ;;  %v2798_v23 = vmul.f32 0.044715, %v2796_v21 }
0x15cc   : > { %v2801_v24 = vmul.f32 0.7978846, %v2799_v22  ;;  %v2800_v25 = vadd.f32 %v2798_v23, %v2788_v40 }
0x15ce   : > { %4354 = vtanh.f32 %v2801_v24  ;;  %v2802_v26 = vmul.f32 0.7978846, %v2800_v25 }
0x15d0   : > { %4356 = vtanh.f32 %v2802_v26 }
0x15d8   : > { %v4355_v28 = vpop.eup %4354 }
0x15d9   : > { %v2805_v30 = vadd.f32 1.0, %v4355_v28 }
0x15da   : > { %v4357_v31 = vpop.eup %4356 }
0x15db   : > { %v2806_v32 = vadd.f32 1.0, %v4357_v31  ;;  %v2807_v34 = vmul.f32 %v2805_v30, %v2791_v27 }
0x15dd   : > { %v2808_v35 = vmul.f32 %v2806_v32, %v2792_v29 }
0x15df   : > { %v2809_v45 = vpack.c.bf16 %v2808_v35, %v2807_v34 }
0x15e1   : > { %4075 = vmatpush3.bf16.msra.mxu1 %v2809_v45 }
0x15e2   : > { %4086 = vmatprep.subr.bf16.mxu1 %v5443_v61 }
0x15e4   : > { %4077 = vmatmul.mubr.msk.bf16.vlgmr.msra.gmra.mrb[20].mxu1 %vm658_vm2, %v4874_v47 }
0x15e5   : > { %4088 = vmatprep.mubr.msk.bf16.mxu1 %vm4473_vm1, %v5443_v61 }
0x1634   : > { %v2906_v1 = vpop.f32.mrb[24].mxu0 }
0x1635   : > { %v2907_v10 = vadd.f32 %v2906_v1, %v4865_v49  ;;  %v4084_v11 = vpop.f32.mrb[25].mxu0 }
0x1636   : > { %v2909_v12 = vpop.f32.mrb[26].mxu0 }
0x1637   : > { %v2915_v39 = vmul.f32 %v2907_v10, %v2907_v10  ;;  %v2910_v6 = vadd.f32 %v2909_v12, %v4867_v52  ;;  %v4085_v2 = vpop.f32.mrb[27].mxu0  ;;  %v2913_v18 = vmul.f32 0.5, %v2907_v10 }
0x1639   : > { %v2917_v42 = vmul.f32 %v2915_v39, %v2907_v10  ;;  %v2916_v50 = vmul.f32 %v2910_v6, %v2910_v6  ;;  %v2914_v19 = vmul.f32 0.5, %v2910_v6 }
0x163b   : > { %v2919_v4 = vmul.f32 0.044715, %v2917_v42  ;;  %v2918_v0 = vmul.f32 %v2916_v50, %v2910_v6 }
0x163d   : > { %v2921_v53 = vadd.f32 %v2919_v4, %v2907_v10  ;;  %v2920_v48 = vmul.f32 0.044715, %v2918_v0 }
0x163f   : > { %v2923_v9 = vmul.f32 0.7978846, %v2921_v53  ;;  %v2922_v38 = vadd.f32 %v2920_v48, %v2910_v6 }
0x1641   : > { %4358 = vtanh.f32 %v2923_v9  ;;  %v2924_v62 = vmul.f32 0.7978846, %v2922_v38 }
0x1643   : > { %4360 = vtanh.f32 %v2924_v62 }
0x164b   : > { %v4359_v40 = vpop.eup %4358 }
0x164c   : > { %v2927_v16 = vadd.f32 1.0, %v4359_v40 }
0x164d   : > { %v4361_v17 = vpop.eup %4360 }
0x164e   : > { %v2928_v21 = vadd.f32 1.0, %v4361_v17  ;;  %v2929_v22 = vmul.f32 %v2927_v16, %v2913_v18 }
0x1650   : > { %v2930_v23 = vmul.f32 %v2928_v21, %v2914_v19 }
0x1652   : > { %v2931_v24 = vpack.c.bf16 %v2930_v23, %v2929_v22 }
0x1654   : > { %4087 = vmatpush3.bf16.msra.mxu1 %v2931_v24 }
0x1655   : > { %4098 = vmatprep.subr.bf16.mxu1 %v5443_v61 }
0x1657   : > { %4089 = vmatmul.mubr.msk.bf16.vlgmr.msra.gmra.mrb[24].mxu1 %vm658_vm2, %v4874_v47 }
0x1658   : > { %4100 = vmatprep.mubr.msk.bf16.mxu1 %vm4473_vm1, %v5443_v61 }
0x16b7   : > { %v2844_v25 = vpop.f32.mrb[20].mxu1 }
0x16b8   : > { %v2845_v26 = vadd.f32 %v2844_v25, %v4888_v46  ;;  %v4078_v27 = vpop.f32.mrb[21].mxu1 }
0x16b9   : > { %v2847_v28 = vpop.f32.mrb[22].mxu1 }
0x16ba   : > { %v2851_v29 = vadd.f32 %v2845_v26, %v5135_v56  ;;  %v2848_v30 = vadd.f32 %v2847_v28, %v4891_v54  ;;  %v4079_v31 = vpop.f32.mrb[23].mxu1 }
0x16bc   : > { %v2977_v32 = vmul.f32 %v2851_v29, %v2851_v29  ;;  %v2852_v34 = vadd.f32 %v2848_v30, %v5138_v8  ;;  %v2975_v0 = vmul.f32 0.5, %v2851_v29 }
0x16be   : > { %v2979_v35 = vmul.f32 %v2977_v32, %v2851_v29  ;;  %v2978_v45 = vmul.f32 %v2852_v34, %v2852_v34  ;;  %v2976_v53 = vmul.f32 0.5, %v2852_v34 }
0x16c0   : > { %v2981_v1 = vmul.f32 0.044715, %v2979_v35  ;;  %v2980_v10 = vmul.f32 %v2978_v45, %v2852_v34 }
0x16c2   : > { %v2983_v11 = vadd.f32 %v2981_v1, %v2851_v29  ;;  %v2982_v12 = vmul.f32 0.044715, %v2980_v10 }
0x16c4   : > { %v2985_v39 = vmul.f32 0.7978846, %v2983_v11  ;;  %v2984_v6 = vadd.f32 %v2982_v12, %v2852_v34 }
0x16c6   : > { %4362 = vtanh.f32 %v2985_v39  ;;  %v2986_v2 = vmul.f32 0.7978846, %v2984_v6 }
0x16c8   : > { %4364 = vtanh.f32 %v2986_v2 }
0x16d0   : > { %v4363_v42 = vpop.eup %4362 }
0x16d1   : > { %v2989_v50 = vadd.f32 1.0, %v4363_v42 }
0x16d2   : > { %v4365_v4 = vpop.eup %4364 }
0x16d3   : > { %v2990_v48 = vadd.f32 1.0, %v4365_v4  ;;  %v2991_v9 = vmul.f32 %v2989_v50, %v2975_v0 }
0x16d5   : > { %v2992_v38 = vmul.f32 %v2990_v48, %v2976_v53 }
0x16d7   : > { %v2993_v62 = vpack.c.bf16 %v2992_v38, %v2991_v9 }
0x16d9   : > { %4093 = vmatpush3.bf16.msra.mxu0 %v2993_v62 }
0x16da   : > { %4104 = vmatprep.subr.bf16.mxu0 %v5443_v61 }
0x16dc   : > { %4095 = vmatmul.mubr.msk.bf16.vlgmr.msra.gmra.mrb[28].mxu0 %vm658_vm2, %v4837_v57 }
0x16dd   : > { %4106 = vmatprep.mubr.msk.bf16.mxu0 %vm4473_vm1, %v5443_v61 }
0x172a   : > { %v2966_v40 = vpop.f32.mrb[24].mxu1 }
0x172b   : > { %v2967_v16 = vadd.f32 %v2966_v40, %v4888_v46  ;;  %v4090_v17 = vpop.f32.mrb[25].mxu1 }
0x172c   : > { %v2969_v18 = vpop.f32.mrb[26].mxu1 }
0x172d   : > { %v2973_v19 = vadd.f32 %v2967_v16, %v5156_v33  ;;  %v2970_v21 = vadd.f32 %v2969_v18, %v4891_v54  ;;  %v4091_v22 = vpop.f32.mrb[27].mxu1 }
0x172f   : > { %v3099_v23 = vmul.f32 %v2973_v19, %v2973_v19  ;;  %v2974_v24 = vadd.f32 %v2970_v21, %v5159_v36  ;;  %v3097_v10 = vmul.f32 0.5, %v2973_v19 }
0x1731   : > { %v3101_v25 = vmul.f32 %v3099_v23, %v2973_v19  ;;  %v3100_v26 = vmul.f32 %v2974_v24, %v2974_v24  ;;  %v3098_v11 = vmul.f32 0.5, %v2974_v24 }
0x1733   : > { %v3103_v27 = vmul.f32 0.044715, %v3101_v25  ;;  %v3102_v28 = vmul.f32 %v3100_v26, %v2974_v24 }
0x1735   : > { %v3105_v29 = vadd.f32 %v3103_v27, %v2973_v19  ;;  %v3104_v30 = vmul.f32 0.044715, %v3102_v28 }
0x1737   : > { %v3107_v31 = vmul.f32 0.7978846, %v3105_v29  ;;  %v3106_v32 = vadd.f32 %v3104_v30, %v2974_v24 }
0x1739   : > { %4366 = vtanh.f32 %v3107_v31  ;;  %v3108_v34 = vmul.f32 0.7978846, %v3106_v32 }
0x173b   : > { %4368 = vtanh.f32 %v3108_v34 }
0x1743   : > { %v4367_v35 = vpop.eup %4366 }
0x1744   : > { %v3111_v45 = vadd.f32 1.0, %v4367_v35 }
0x1745   : > { %v4369_v1 = vpop.eup %4368 }
0x1746   : > { %v3112_v12 = vadd.f32 1.0, %v4369_v1  ;;  %v3113_v39 = vmul.f32 %v3111_v45, %v3097_v10 }
0x1748   : > { %v3114_v6 = vmul.f32 %v3112_v12, %v3098_v11 }
0x174a   : > { %v3115_v2 = vpack.c.bf16 %v3114_v6, %v3113_v39 }
0x174c   : > { %4105 = vmatpush3.bf16.msra.mxu0 %v3115_v2 }
0x174d   : > { %4116 = vmatprep.subr.bf16.mxu0 %v5443_v61 }
0x174f   : > { %4107 = vmatmul.mubr.msk.bf16.vlgmr.msra.gmra.mrb[32].mxu0 %vm658_vm2, %v4837_v57 }
0x1750   : > { %4118 = vmatprep.mubr.msk.bf16.mxu0 %vm4473_vm1, %v5443_v61 }
0x17af   : > { %v3028_v42 = vpop.f32.mrb[28].mxu0 }
0x17b0   : > { %v3029_v50 = vadd.f32 %v3028_v42, %v4865_v49  ;;  %v4096_v4 = vpop.f32.mrb[29].mxu0 }
0x17b1   : > { %v3031_v0 = vpop.f32.mrb[30].mxu0 }
0x17b2   : > { %v3037_v53 = vmul.f32 %v3029_v50, %v3029_v50  ;;  %v3032_v48 = vadd.f32 %v3031_v0, %v4867_v52  ;;  %v4097_v9 = vpop.f32.mrb[31].mxu0  ;;  %v3035_v22 = vmul.f32 0.5, %v3029_v50 }
0x17b4   : > { %v3039_v38 = vmul.f32 %v3037_v53, %v3029_v50  ;;  %v3038_v62 = vmul.f32 %v3032_v48, %v3032_v48  ;;  %v3036_v24 = vmul.f32 0.5, %v3032_v48 }
0x17b6   : > { %v3041_v40 = vmul.f32 0.044715, %v3039_v38  ;;  %v3040_v16 = vmul.f32 %v3038_v62, %v3032_v48 }
0x17b8   : > { %v3043_v17 = vadd.f32 %v3041_v40, %v3029_v50  ;;  %v3042_v18 = vmul.f32 0.044715, %v3040_v16 }
0x17ba   : > { %v3045_v19 = vmul.f32 0.7978846, %v3043_v17  ;;  %v3044_v57 = vadd.f32 %v3042_v18, %v3032_v48 }
0x17bc   : > { %4370 = vtanh.f32 %v3045_v19  ;;  %v3046_v21 = vmul.f32 0.7978846, %v3044_v57 }
0x17be   : > { %4372 = vtanh.f32 %v3046_v21 }
0x17c6   : > { %v4371_v23 = vpop.eup %4370 }
0x17c7   : > { %v3049_v25 = vadd.f32 1.0, %v4371_v23 }
0x17c8   : > { %v4373_v26 = vpop.eup %4372 }
0x17c9   : > { %v3050_v27 = vadd.f32 1.0, %v4373_v26  ;;  %v3051_v28 = vmul.f32 %v3049_v25, %v3035_v22 }
0x17cb   : > { %v3052_v29 = vmul.f32 %v3050_v27, %v3036_v24 }
0x17cd   : > { %v3053_v30 = vpack.c.bf16 %v3052_v29, %v3051_v28 }
0x17cf   : > { %4099 = vmatpush3.bf16.msra.mxu1 %v3053_v30 }
0x17d0   : > { %4110 = vmatprep.subr.bf16.mxu1 %v5443_v61 }
0x17d2   : > { %4101 = vmatmul.mubr.msk.bf16.vlgmr.msra.gmra.mrb[28].mxu1 %vm658_vm2, %v4874_v47 }
0x17d3   : > { %4112 = vmatprep.mubr.msk.bf16.mxu1 %vm4473_vm1, %v5443_v61 }
0x1822   : > { %v3150_v31 = vpop.f32.mrb[32].mxu0 }
0x1823   : > { %v3151_v32 = vadd.f32 %v3150_v31, %v4865_v49  ;;  %v4108_v34 = vpop.f32.mrb[33].mxu0 }
0x1824   : > { %v3153_v35 = vpop.f32.mrb[34].mxu0 }
0x1825   : > { %v3159_v45 = vmul.f32 %v3151_v32, %v3151_v32  ;;  %v3154_v1 = vadd.f32 %v3153_v35, %v4867_v52  ;;  %v4109_v10 = vpop.f32.mrb[35].mxu0  ;;  %v3157_v9 = vmul.f32 0.5, %v3151_v32 }
0x1827   : > { %v3161_v11 = vmul.f32 %v3159_v45, %v3151_v32  ;;  %v3160_v12 = vmul.f32 %v3154_v1, %v3154_v1  ;;  %v3158_v38 = vmul.f32 0.5, %v3154_v1 }
0x1829   : > { %v3163_v39 = vmul.f32 0.044715, %v3161_v11  ;;  %v3162_v6 = vmul.f32 %v3160_v12, %v3154_v1 }
0x182b   : > { %v3165_v2 = vadd.f32 %v3163_v39, %v3151_v32  ;;  %v3164_v42 = vmul.f32 0.044715, %v3162_v6 }
0x182d   : > { %v3167_v50 = vmul.f32 0.7978846, %v3165_v2  ;;  %v3166_v4 = vadd.f32 %v3164_v42, %v3154_v1 }
0x182f   : > { %4374 = vtanh.f32 %v3167_v50  ;;  %v3168_v0 = vmul.f32 0.7978846, %v3166_v4 }
0x1831   : > { %4376 = vtanh.f32 %v3168_v0 }
0x1839   : > { %v4375_v53 = vpop.eup %4374 }
0x183a   : > { %v3171_v48 = vadd.f32 1.0, %v4375_v53 }
0x183b   : > { %v4377_v49 = vpop.eup %4376 }
0x183c   : > { %v3172_v62 = vadd.f32 1.0, %v4377_v49  ;;  %v3173_v40 = vmul.f32 %v3171_v48, %v3157_v9 }
0x183e   : > { %v3174_v52 = vmul.f32 %v3172_v62, %v3158_v38 }
0x1840   : > { %v3175_v16 = vpack.c.bf16 %v3174_v52, %v3173_v40 }
0x1842   : > { %4111 = vmatpush3.bf16.msra.mxu1 %v3175_v16 }
0x1843   : > { %4122 = vmatprep.subr.bf16.mxu1 %v5443_v61 }
0x1845   : > { %4113 = vmatmul.mubr.msk.bf16.vlgmr.msra.gmra.mrb[32].mxu1 %vm658_vm2, %v4874_v47 }
0x1846   : > { %4124 = vmatprep.mubr.msk.bf16.mxu1 %vm4473_vm1, %v5443_v61 }
0x18a5   : > { %v3088_v17 = vpop.f32.mrb[28].mxu1 }
0x18a6   : > { %v3089_v18 = vadd.f32 %v3088_v17, %v4888_v46  ;;  %v4102_v19 = vpop.f32.mrb[29].mxu1 }
0x18a7   : > { %v3091_v57 = vpop.f32.mrb[30].mxu1 }
0x18a8   : > { %v3095_v21 = vadd.f32 %v3089_v18, %v5135_v56  ;;  %v3092_v22 = vadd.f32 %v3091_v57, %v4891_v54  ;;  %v4103_v23 = vpop.f32.mrb[31].mxu1 }
0x18aa   : > { %v3221_v24 = vmul.f32 %v3095_v21, %v3095_v21  ;;  %v3096_v25 = vadd.f32 %v3092_v22, %v5138_v8  ;;  %v3219_v45 = vmul.f32 0.5, %v3095_v21 }
0x18ac   : > { %v3223_v26 = vmul.f32 %v3221_v24, %v3095_v21  ;;  %v3222_v27 = vmul.f32 %v3096_v25, %v3096_v25  ;;  %v3220_v1 = vmul.f32 0.5, %v3096_v25 }
0x18ae   : > { %v3225_v28 = vmul.f32 0.044715, %v3223_v26  ;;  %v3224_v47 = vmul.f32 %v3222_v27, %v3096_v25  ;;  %v4386_v26 = vld [vmem:[%s4626_s18 + $0x10] sm:$0xff] }
0x18b0   : > { %v3227_v29 = vadd.f32 %v3225_v28, %v3095_v21  ;;  %v3226_v30 = vmul.f32 0.044715, %v3224_v47 }
0x18b2   : > { %v3229_v61 = vmul.f32 0.7978846, %v3227_v29  ;;  %v3228_v31 = vadd.f32 %v3226_v30, %v3096_v25  ;;  %v4387_v30 = vld [vmem:[%s4626_s18 + $0x18] sm:$0xff]  ;;  %s5314_s18 = smov 0  }
0x18b4   : > { %4378 = vtanh.f32 %v3229_v61  ;;  %v3230_v32 = vmul.f32 0.7978846, %v3228_v31 }
0x18b6   : > { %4380 = vtanh.f32 %v3230_v32 }
0x18be   : > { %v4379_v34 = vpop.eup %4378 }
0x18bf   : > { %v3233_v35 = vadd.f32 1.0, %v4379_v34 }
0x18c0   : > { %v4381_v56 = vpop.eup %4380 }
0x18c1   : > { %v3234_v10 = vadd.f32 1.0, %v4381_v56  ;;  %v3235_v11 = vmul.f32 %v3233_v35, %v3219_v45 }
0x18c3   : > { %v3236_v12 = vmul.f32 %v3234_v10, %v3220_v1 }
0x18c5   : > { %v3237_v8 = vpack.c.bf16 %v3236_v12, %v3235_v11 }
0x18c7   : > { %4117 = vmatpush3.bf16.msra.mxu0 %v3237_v8 }
0x18ca   : > { %4119 = vmatmul.mubr.msk.bf16.vlgmr.msra.gmra.mrb[36].mxu0 %vm658_vm2, %v4995_v60 }
0x1918   : > { %v3210_v39 = vpop.f32.mrb[32].mxu1 }
0x1919   : > { %v3211_v6 = vadd.f32 %v3210_v39, %v4888_v46  ;;  %v4114_v2 = vpop.f32.mrb[33].mxu1 }
0x191a   : > { %v3213_v42 = vpop.f32.mrb[34].mxu1 }
0x191b   : > { %v3217_v50 = vadd.f32 %v3211_v6, %v5156_v33  ;;  %v3214_v4 = vadd.f32 %v3213_v42, %v4891_v54  ;;  %v4115_v0 = vpop.f32.mrb[35].mxu1 }
0x191d   : > { %v3288_v53 = vmul.f32 %v3217_v50, %v3217_v50  ;;  %v3218_v48 = vadd.f32 %v3214_v4, %v5159_v36  ;;  %v3286_v54 = vmul.f32 0.5, %v3217_v50 }
0x191f   : > { %v3290_v49 = vmul.f32 %v3288_v53, %v3217_v50  ;;  %v3289_v9 = vmul.f32 %v3218_v48, %v3218_v48  ;;  %v3287_v57 = vmul.f32 0.5, %v3218_v48 }
0x1921   : > { %v3292_v38 = vmul.f32 0.044715, %v3290_v49  ;;  %v3291_v62 = vmul.f32 %v3289_v9, %v3218_v48 }
0x1923   : > { %v3294_v40 = vadd.f32 %v3292_v38, %v3217_v50  ;;  %v3293_v52 = vmul.f32 0.044715, %v3291_v62 }
0x1925   : > { %v3296_v16 = vmul.f32 0.7978846, %v3294_v40  ;;  %v3295_v17 = vadd.f32 %v3293_v52, %v3218_v48 }
0x1927   : > { %4382 = vtanh.f32 %v3296_v16  ;;  %v3297_v46 = vmul.f32 0.7978846, %v3295_v17 }
0x1929   : > { %4384 = vtanh.f32 %v3297_v46 }
0x1931   : > { %v4383_v18 = vpop.eup %4382 }
0x1932   : > { %v3300_v33 = vadd.f32 1.0, %v4383_v18 }
0x1933   : > { %v4385_v19 = vpop.eup %4384 }
0x1934   : > { %v3301_v36 = vadd.f32 1.0, %v4385_v19  ;;  %v3302_v21 = vmul.f32 %v3300_v33, %v3286_v54 }
0x1936   : > { %v3303_v22 = vmul.f32 %v3301_v36, %v3287_v57 }
0x1938   : > { %v3304_v23 = vpack.c.bf16 %v3303_v22, %v3302_v21 }
0x193a   : > { %4123 = vmatpush3.bf16.msra.mxu1 %v3304_v23 }
0x193d   : > { %4125 = vmatmul.mubr.msk.bf16.vlgmr.msra.gmra.mrb[36].mxu1 %vm658_vm2, %v4995_v60 }
0x199d   : > { %v3272_v24 = vpop.f32.mrb[36].mxu0 }
0x199e   : > { %v4120_v25 = vpop.f32.mrb[37].mxu0  ;;  %v3279_v27 = vadd.f32 %v4386_v26, %v3272_v24 }
0x199f   : > { %v3275_v28 = vpop.f32.mrb[38].mxu0 }
0x19a0   : > { %v4121_v47 = vpop.f32.mrb[39].mxu0  ;;  %v3281_v29 = vadd.f32 %v3279_v27, %v5009_v3  ;;  %v3280_v61 = vadd.f32 %v4387_v30, %v3275_v28 }
0x19a2   : > { %3724 = vst.msk [vmem:[%s5015_s22 + $0x10] sm:$0xff] %vm658_vm2, %v3281_v29  ;;  %v3282_v31 = vadd.f32 %v3280_v61, %v5013_v7 }
0x19a4   : > { %3725 = vst.msk [vmem:[%s5015_s22 + $0x18] sm:$0xff] %vm658_vm2, %v3282_v31 }
0x1a10   : > { %v3339_v32 = vpop.f32.mrb[36].mxu1 }
0x1a11   : > { %3348 = vrot.lane.b32.xlu1 %v3339_v32, %s4476_s23  ;;  %v4126_v60 = vpop.f32.mrb[37].mxu1 }
0x1a12   : > { %v3342_v34 = vpop.f32.mrb[38].mxu1 }
0x1a13   : > { %v4127_v35 = vpop.f32.mrb[39].mxu1 }
0x1a15   : > { %3350 = vrot.lane.b32.xlu1 %v3342_v34, %s4476_s23 }
0x1a83   : > { %v3349_v56 = vpop.permute.xlu1 %3348 }
0x1a84   : > { %v3354_v45 = vadd.f32 %v4386_v26, %v3349_v56 }
0x1a86   : > { %v3356_v1 = vadd.f32 %v3354_v45, %v5009_v3 }
0x1a87   : > { %v3351_v10 = vpop.permute.xlu1 %3350 }
0x1a88   : > { %3727 = vst.msk [vmem:[%s5015_s22 + $0x10] sm:$0xff] %vm1916_vm3, %v3356_v1  ;;  %v3355_v11 = vadd.f32 %v4387_v30, %v3351_v10 }
0x1a8a   : > { %v3357_v12 = vadd.f32 %v3355_v11, %v5013_v7 }
0x1a8c   : > { %3728 = vst.msk [vmem:[%s5015_s22 + $0x18] sm:$0xff] %vm1916_vm3, %v3357_v12 }
0x1a8d LB: >> { %s3729_s30 = sshll.u32 %s4470_s18, 3  ;;  %v4479_v50 = vmov 0.0   ;;  %vm4480_vm5 = vmmov 0   ;;  %s3365_s18 = sadd.s32 1, %s4470_s18   ;;  %s4470_s18 = sphi %s5314_s18, %s3365_s18  }
0x1a8e   : >> { %s5321_s0 = scalar_lea.vmem %s5015_s22, %s3729_s30 [#allocation2]  ;;  %4128 = vmatprep.subr.bf16.mxu0 %v4479_v50  ;;  %4132 = vmatprep.mubr.msk.bf16.mxu0 %vm4480_vm5, %v4479_v50  ;;  %p3362_p12 = scmp.ge.s32.totalorder %s3365_s18, 2  }
0x1a8f   : >> { %4129 = vmatpush3.bf16.msra.mxu0 %v5048_v55  ;;  %4136 = vmatprep.subr.bf16.mxu1 %v4479_v50  ;;  %s3751_s24 = sshll.u32 (%p3362_p12), %s4595_s28, 9  ;;  %s3580_s19 = sshll.u32 (%p3362_p12), %s5015_s22, 4  ;;  %s5358_s19 = int_to_ptr.vmem [resolvable:$true] %s3580_s19 }
0x1a90   : >> { %4130 = vmatprep.subr.bf16.mxu0 %v4479_v50  ;;  %4137 = vmatpush3.bf16.msra.mxu1 %v5058_v58  ;;  %s5355_s29 = scalar_lea.hbm (%p3362_p12), %s5420_s17, %s3751_s24  ;;  %s5362_s26 = scalar_lea.sflag (%p3362_p12), [#allocation3], %s542_s20 }
0x1a91   : >> { %4138 = vmatprep.subr.bf16.mxu1 %v4479_v50  ;;  %4152 = vmatprep.mubr.msk.bf16.mxu1 %vm4480_vm5, %v4479_v50  ;;  %s4392_s18 = scalar_lea.vmem (%p3362_p12), %s5358_s19, 512  ;;  %s4481_s28 = smov (%p3362_p12), [#allocation2]  }
0x1a92   : > { %p4393_p13 = scmp.ne.s32.totalorder (%p3362_p12), %s5358_s19, %s4392_s18  ;;  %s4396_s30 = sshll.u32 (%p3362_p12), %s4481_s28, 4  ;;  %s4397_s30 = int_to_ptr.vmem [resolvable:$false] %s4396_s30 }
0x1a93   : >> { %v5324_v3 = vld [vmem:[%s5321_s0 + $0x10] sm:$0xff]  ;;  %4131 = vmatpush3.bf16.msra.mxu0 %v5053_v51  ;;  %p4399_p2 = scmp.lt.s32.totalorder (%p3362_p12), %s5358_s19, %s4397_s30 }
0x1a94   : >> { %v3370_v7 = vsel %vm598_vm0, %v5324_v3, 0.0  ;;  %4139 = vmatpush3.bf16.msra.mxu1 %v5066_v13  ;;  %p4394_p0 = pnand (%p3362_p12), %p4393_p13, %p4612_p5 }
0x1a95   : >> { %3371 = vadd.xlane.f32.xlu0 %v3370_v7  ;;  %4140 = vmatprep.subr.bf16.mxu1 %v4479_v50 }
0x1a96   : > { %p4395_p1 = pneg (%p3362_p12), %p4394_p0 }
0x1a98   : >> { %4141 = vmatpush3.bf16.msra.mxu1 %v5071_v43 }
0x1a99   : >> { %4142 = vmatprep.subr.bf16.mxu1 %v4479_v50 }
0x1a9c   : >> { %4143 = vmatpush3.bf16.msra.mxu1 %v5076_v59 }
0x1a9d   : >> { %4144 = vmatprep.subr.bf16.mxu1 %v4479_v50 }
0x1aa0   : >> { %4145 = vmatpush3.bf16.msra.mxu1 %v5081_v5 }
0x1aa1   : >> { %4146 = vmatprep.subr.bf16.mxu1 %v4479_v50 }
0x1aa4   : >> { %4147 = vmatpush3.bf16.msra.mxu1 %v5086_v41 }
0x1aa5   : >> { %4148 = vmatprep.subr.bf16.mxu1 %v4479_v50 }
0x1aa8   : >> { %4149 = vmatpush3.bf16.msra.mxu1 %v5091_v44 }
0x1aa9   : >> { %4150 = vmatprep.subr.bf16.mxu1 %v4479_v50 }
0x1aac   : >> { %4151 = vmatpush3.bf16.msra.mxu1 %v5096_v63 }
0x1b22   : >> { %v3372_v8 = vpop.xlane.xlu0 %3371 }
0x1b23   : >> { %v3373_v39 = vmul.f32 0.03125, %v3372_v8 }
0x1b25   : >> { %v3374_v6 = vsub.f32 %v5324_v3, %v3373_v39 }
0x1b27   : >> { %v3375_v2 = vmul.f32 %v3374_v6, %v3374_v6 }
0x1b29   : >> { %v3376_v42 = vsel %vm598_vm0, %v3375_v2, 0.0 }
0x1b2a   : >> { %3377 = vadd.xlane.f32.xlu0 %v3376_v42 }
0x1bb7   : >> { %v3378_v4 = vpop.xlane.xlu0 %3377 }
0x1bb8   : >> { %v3379_v0 = vmul.f32 0.03125, %v3378_v4 }
0x1bba   : >> { %v3380_v53 = vadd.f32 1e-06, %v3379_v0 }
0x1bbc   : >> { %4388 = vrsqrt.f32 %v3380_v53 }
0x1bc6   : >> { %v4389_v48 = vpop.eup %4388 }
0x1bc7   : >> { %v3382_v49 = vmul.f32 %v4389_v48, %v3374_v6 }
0x1bc9   : >> { %v3389_v9 = vmul.f32 %v4637_v14, %v3382_v49 }
0x1bcb   : >> { %v3396_v38 = vadd.f32 %v4642_v15, %v3389_v9 }
0x1bcd   : >> { %v3397_v62 = vpack.c.bf16 %v3396_v38, %v3396_v38 }
0x1bcf   : >> { %4133 = vmatmul.mubr.msk.bf16.vlgmr.msra.gmra.mrb[0].mxu0 %vm598_vm0, %v3397_v62 }
0x1ca2   : >> { %v3453_v40 = vpop.f32.mrb[0].mxu0 }
0x1ca3   : >> { %v3454_v52 = vadd.f32 %v4667_v20, %v3453_v40  ;;  %v4134_v16 = vpop.f32.mrb[1].mxu0 }
0x1ca4   : >> { %v3456_v17 = vpop.f32.mrb[2].mxu0 }
0x1ca5   : >> { %v3460_v46 = vmul.f32 %v3454_v52, %v3454_v52  ;;  %v4135_v18 = vpop.f32.mrb[3].mxu0  ;;  %v3459_v21 = vmul.f32 0.5, %v3454_v52 }
0x1ca7   : >> { %v3461_v33 = vmul.f32 %v3460_v46, %v3454_v52 }
0x1ca9   : >> { %v3462_v19 = vmul.f32 0.044715, %v3461_v33 }
0x1cab   : >> { %v3463_v54 = vadd.f32 %v3462_v19, %v3454_v52 }
0x1cad   : >> { %v3464_v57 = vmul.f32 0.7978846, %v3463_v54 }
0x1caf   : >> { %4390 = vtanh.f32 %v3464_v57 }
0x1cb9   : >> { %v4391_v36 = vpop.eup %4390 }
0x1cba   : >> { %v3466_v22 = vadd.f32 1.0, %v4391_v36 }
0x1cbc   : >> { %v3467_v23 = vmul.f32 %v3466_v22, %v3459_v21 }
0x1cbe   : >> { %v3468_v24 = vpack.c.bf16 %v3467_v23, %v3467_v23 }
0x1cc0   : >> { %4153 = vmatmul.mubr.bf16.vlgmr.msra.gmra.mrb[0].mxu1 %v3468_v24 }
0x1d92   : > { %3364 = sbr.rel (!%p3362_p12) target bundleno = 6797 (0x1a8d), region = 152 }
0x1d93   : >> { %v3557_v25 = vpop.f32.mrb[0].mxu1 }
0x1d94   : >> { %v3558_v26 = vadd.f32 %v4752_v37, %v3557_v25  ;;  %v4154_v27 = vpop.f32.mrb[1].mxu1 }
0x1d95   : >> { %v3560_v28 = vpop.f32.mrb[2].mxu1 }
0x1d96   : >> { %v3563_v47 = vadd.f32 %v5324_v3, %v3558_v26  ;;  %v4155_v29 = vpop.f32.mrb[3].mxu1 }
0x1d98   : >> { %3742 = vst.msk [vmem:[%s5321_s0 + $0x10] sm:$0xff] %vm598_vm0, %v3563_v47  ;;  %s4398_s0 = scalar_lea.vmem (%p3362_p12), %s4397_s30, 1024 }
0x1d99   : > { %p4400_p3 = scmp.lt.s32.totalorder %s4398_s0, %s4392_s18 }
0x1d9b   : > { %p4401_p4 = por %p4400_p3, %p4399_p2 }
0x1d9d   : > { %p4402_p7 = pnand %p4401_p4, %p4395_p1 }
0x1d9f   : > { %4405 = shalt.err (!%p4402_p7)
}
0x1da0   : > { %s4406_s20 = scalar_lea.hbm %s5355_s29, 512  ;;  %s4410_s21 = scalar_lea.hbm %s5420_s17, 1024 }
0x1da1   : > { %p4407_p8 = scmp.ne.s32.totalorder %s5355_s29, %s4406_s20  ;;  %p4411_p11 = scmp.lt.u32.totalorder %s5355_s29, %s5420_s17 }
0x1da2   : > { %p4412_p12 = scmp.lt.u32.totalorder %s4410_s21, %s4406_s20  ;;  %p4414_p0 = scmp.lt.u32.totalorder %s4406_s20, %s5355_s29 }
0x1da3   : > { %p4408_p9 = pnand %p4407_p8, %p4612_p5 }
0x1da4   : > { %p4413_p13 = por %p4412_p12, %p4411_p11 }
0x1da5   : > { %p4409_p10 = pneg %p4408_p9 }
0x1da6   : > { %p4415_p1 = por %p4414_p0, %p4413_p13 }
0x1da8   : > { %p4416_p2 = pnand %p4415_p1, %p4409_p10 }
0x1daa   : > { %4419 = shalt.err (!%p4416_p2)
}
0x1dab   : > { %s4482_s18 = smov 128   ;;  %s4483_s30 = smov 8  }
0x1dac   : > { %4156 = dma.vmem_to_hbm [thread:$0]  (%p4612_p5), %s5358_s19, 512, %s5355_s29, %s5362_s26, %s4482_s18, %s4482_s18, %s4483_s30  }
0x1dad PF: > { %s5444_s0 = sld [smem:[#allocation5_spill]]  ;;  %p4162_p3 = scmp.ge.s32.totalorder %s4462_s27, 2 }
0x1daf   : > { %p4159_p4 = pnand %p4162_p3, %p4616_p6 }
0x1db3   : > { %s3595_s24 = sand.u32 1, %s5444_s0  }
0x1db4   : > { %s3596_s20 = scalar_lea.sflag [#allocation3], %s3595_s24 }
0x1db5   : > { %4445 = dma.done.wait (!%p4159_p4), %s3596_s20, 512  }
0x1db6   : > { %4447 = vsyncadd (!%p4159_p4), %s3596_s20, 4294966784  ;;  %s5446_s27 = sld [smem:[#allocation7_spill]]  ;;  %s5447_s21 = sld [smem:[#allocation6_spill]] }
0x1db7   : > { %s5448_s26 = sld [smem:[#allocation8_spill]]  ;;  %s5449_s24 = smov %s4454_s25 }
0x1dbc   : > { %p27_p7 = scmp.ge.s32.totalorder %s5446_s27, 4   ;;  %s5450_s25 = smov %s5447_s21 }
0x1dbe   :  { %29 = sbr.rel (!%p27_p7) target bundleno = 6 (0x6), region = 163 }
0x1dc5   :  { %3601 = vsyncpa [#allocation3], 1 }
0x1dc6   :  { %3603 = vsyncpa [#allocation3 + $0x1], 1 }

</bundles_post_ra>
